<compile_context>
chip_gen: v5e
topology: v5e:2x2
jax: 0.10.0
libtpu: 0.0.40
codegen_flags: <defaults>
</compile_context>

<pallas_src>
import functools

import jax
import jax.numpy as jnp
from jax import lax
from jax.experimental import pallas as pl
from jax.experimental.pallas import tpu as pltpu

EPS = 1e-5   # nn.InstanceNorm2d default eps
ALIGN = 16   # sublane alignment (covers bf16 (16,128) tiling and f32 (8,128) tiling)


def _round_up(v, m):
    return ((v + m - 1) // m) * m


def _in_stats(h, inv_hw):
    """Single-pass InstanceNorm stats over the spatial (sublane) axis.

    Returns (mean, rsqrt(var + eps)), each of shape (1, channels), f32.
    """
    s = jnp.sum(h, axis=0, keepdims=True)
    ss = jnp.sum(h * h, axis=0, keepdims=True)
    mean = s * inv_hw
    var = jnp.maximum(ss * inv_hw - mean * mean, 0.0)  # guard tiny negative cancellation
    return mean, lax.rsqrt(var + EPS)


def _block_kernel(H, W, P, x_ref, w1_ref, w2_ref, w3_ref, out_ref, pad_ref):
    HW = H * W
    hid = w1_ref.shape[1]
    inv_hw = 1.0 / HW
    # NT contraction (contract the last axis of both operands): MXU-native.
    dimnums = (((1,), (1,)), ((), ()))

    # ---- conv1 (1x1): bf16 x bf16 -> f32 accumulation --------------------------------
    h1 = jnp.dot(x_ref[0], w1_ref[...], preferred_element_type=jnp.float32)   # (HW, hid)

    # ---- IN1: center + ReLU only; the scale is folded into conv2's weights below -----
    mean1, scale1 = _in_stats(h1, inv_hw)            # (1, hid) f32 each
    h1r = jnp.maximum(h1 - mean1, 0.0)               # (HW, hid) f32, un-scaled

    # ---- 3-tap horizontal window, lane-concatenated, bf16 ----------------------------
    #   wide[:, 0:hid]       = h1r shifted to x-1  (zero where x == 0)
    #   wide[:, hid:2*hid]   = h1r
    #   wide[:, 2*hid:3*hid] = h1r shifted to x+1  (zero where x == W-1)
    col = lax.broadcasted_iota(jnp.int32, (HW, 1), 0) % W
    mask_l = (col > 0).astype(jnp.float32).astype(jnp.bfloat16)        # valid for dx=-1
    mask_r = (col < (W - 1)).astype(jnp.float32).astype(jnp.bfloat16)  # valid for dx=+1
    # roll stays f32 (unpacked-dtype sublane rotate); masks/concat are bf16.
    left = pltpu.roll(h1r, 1, axis=0).astype(jnp.bfloat16) * mask_l       # row i <- h1r[i-1]
    right = pltpu.roll(h1r, HW - 1, axis=0).astype(jnp.bfloat16) * mask_r  # row i <- h1r[i+1]
    wide = jnp.concatenate([left, h1r.astype(jnp.bfloat16), right], axis=1)  # (HW, 3*hid)

    # ---- store interior + (re)zero only the two vertical halo strips -----------------
    pad_ref[P:P + HW, :] = wide
    zeros_halo = jnp.zeros((W, 3 * hid), jnp.bfloat16)
    pad_ref[P - W:P, :] = zeros_halo
    pad_ref[P + HW:P + HW + W, :] = zeros_halo

    # ---- conv2 (3x3, padding=1): 3 aligned K=3*hid matmuls, IN1 scale folded into w2 -
    s1 = scale1.astype(jnp.bfloat16)
    s1_row = jnp.concatenate([s1, s1, s1], axis=1)   # (1, 3*hid), one scale per in-chan
    acc = lax.dot_general(pad_ref[P:P + HW, :], w2_ref[1] * s1_row, dimnums,
                          preferred_element_type=jnp.float32)                  # dy = 0
    acc = acc + lax.dot_general(pad_ref[P - W:P - W + HW, :], w2_ref[0] * s1_row,
                                dimnums, preferred_element_type=jnp.float32)   # dy = -1
    acc = acc + lax.dot_general(pad_ref[P + W:P + W + HW, :], w2_ref[2] * s1_row,
                                dimnums, preferred_element_type=jnp.float32)   # dy = +1

    # ---- IN2: center + ReLU; scale folded into conv3's weights -----------------------
    mean2, scale2 = _in_stats(acc, inv_hw)
    h2r = jnp.maximum(acc - mean2, 0.0).astype(jnp.bfloat16)                   # (HW, hid)

    # ---- conv3 (1x1) ------------------------------------------------------------------
    h3 = lax.dot_general(h2r, w3_ref[...] * scale2.astype(jnp.bfloat16), dimnums,
                         preferred_element_type=jnp.float32)                   # (HW, C)

    # ---- IN3 + ReLU (full normalize: feeds the residual, nothing to fold into) --------
    mean3, scale3 = _in_stats(h3, inv_hw)
    h3n = jnp.maximum((h3 - mean3) * scale3, 0.0)

    # ---- residual: f32 add; re-read the resident bf16 input block only here -----------
    out_ref[0] = (x_ref[0].astype(jnp.float32) + h3n).astype(out_ref.dtype)


def resnet_1_3_1_block(x_nchw, conv1_w, conv1_b, conv2_w, conv2_b, conv3_w, conv3_b):
    """x_nchw: (N, C, H, W); conv weights/biases in PyTorch OIHW / (O,) form.

    Conv biases are accepted for API fidelity but unused: a per-channel constant is
    cancelled exactly by InstanceNorm2d(affine=False) that follows every conv, so the
    forward output is identical.  Output is bf16 (residual streamed in bf16).
    """
    del conv1_b, conv2_b, conv3_b
    N, C, H, W = x_nchw.shape
    HW = H * W
    hid = conv1_w.shape[0]

    # Aligned interior offset and padded flat-spatial scratch extent.
    P = _round_up(W + 1, ALIGN)
    pad_rows = _round_up(P + HW + W, ALIGN)

    # Repack conv weights into bf16, RHS-transposed ((out, in)) matmul form so the
    # per-input-channel IN scale broadcasts along lanes inside the kernel.
    w1 = conv1_w[:, :, 0, 0].T.astype(jnp.bfloat16)                       # (C, hid)
    w2 = jnp.stack([
        jnp.concatenate([conv2_w[:, :, ky, kx] for kx in range(3)], axis=1)
        for ky in range(3)
    ]).astype(jnp.bfloat16)                                               # (3, hid, 3*hid)
    w3 = conv3_w[:, :, 0, 0].astype(jnp.bfloat16)                         # (C, hid)

    # bf16 residual streaming: the cast fuses into the layout transpose we need anyway.
    x2 = jnp.transpose(x_nchw, (0, 2, 3, 1)).reshape(N, HW, C).astype(jnp.bfloat16)

    # Explicit scoped-VMEM budget (input/output blocks are double-buffered).
    bpe = 2  # bf16
    vmem_needed = (
        2 * (2 * HW * C * bpe)                              # in + out blocks, double-buffered
        + 2 * int(w1.size + w2.size + w3.size) * bpe        # weight blocks, double-buffered
        + pad_rows * 3 * hid * bpe                          # bf16 padded-window scratch
        + 8 * HW * hid * 4                                  # f32 intermediates (h1, rolls, acc,...)
        + 3 * HW * hid * bpe                                # bf16 window pieces
        + (2 << 20)                                         # slack
    )
    try:
        vmem_cap = int(pltpu.get_tpu_info().vmem_capacity_bytes)
    except Exception:                                       # pragma: no cover
        vmem_cap = 64 * 1024 * 1024                         # conservative (v7x per-TC)
    vmem_limit = int(min(max(vmem_needed, 32 * 1024 * 1024), vmem_cap - (8 << 20)))
    vmem_limit = max(vmem_limit, 16 << 20)

    kernel = functools.partial(_block_kernel, H, W, P)
    out2 = pl.pallas_call(
        kernel,
        out_shape=jax.ShapeDtypeStruct((N, HW, C), jnp.bfloat16),
        grid_spec=pltpu.PrefetchScalarGridSpec(
            num_scalar_prefetch=0,
            grid=(N,),
            in_specs=[
                pl.BlockSpec((1, HW, C), lambda n: (n, 0, 0)),
                pl.BlockSpec(w1.shape, lambda n: (0, 0)),
                pl.BlockSpec(w2.shape, lambda n: (0, 0, 0)),
                pl.BlockSpec(w3.shape, lambda n: (0, 0)),
            ],
            out_specs=pl.BlockSpec((1, HW, C), lambda n: (n, 0, 0)),
            scratch_shapes=[pltpu.VMEM((pad_rows, 3 * hid), jnp.bfloat16)],
        ),
        compiler_params=pltpu.CompilerParams(
            dimension_semantics=("parallel",),   # batch elements are independent
            vmem_limit_bytes=vmem_limit,
        ),
    )(x2, w1, w2, w3)

    return jnp.transpose(out2.reshape(N, H, W, C), (0, 3, 1, 2))


# ---------------- pure-JAX reference (for verification only) ----------------
def _torch_conv2d(x, w, b, padding):
    y = lax.conv_general_dilated(
        x, w, window_strides=(1, 1),
        padding=[(padding, padding), (padding, padding)],
        dimension_numbers=("NCHW", "OIHW", "NCHW"))
    return y + b[None, :, None, None]


def _in_relu_nchw(x):
    mean = jnp.mean(x, axis=(2, 3), keepdims=True)
    var = jnp.mean((x - mean) ** 2, axis=(2, 3), keepdims=True)
    return jnp.maximum((x - mean) * lax.rsqrt(var + EPS), 0.0)


def reference(x, c1w, c1b, c2w, c2b, c3w, c3b):
    h = _in_relu_nchw(_torch_conv2d(x, c1w, c1b, 0))
    h = _in_relu_nchw(_torch_conv2d(h, c2w, c2b, 1))
    h = _in_relu_nchw(_torch_conv2d(h, c3w, c3b, 0))
    return x + h


if __name__ == "__main__":
    N, dim, H, W = 2, 4, 16, 16
    hidden = 32

    key = jax.random.PRNGKey(0)
    ks = jax.random.split(key, 7)
    # PyTorch parameter shapes from the module's __init__ (deterministic synthetic init).
    conv1_w = jax.random.normal(ks[0], (hidden, dim, 1, 1), jnp.float32) * 0.3
    conv1_b = jax.random.normal(ks[1], (hidden,), jnp.float32) * 0.1
    conv2_w = jax.random.normal(ks[2], (hidden, hidden, 3, 3), jnp.float32) * 0.1
    conv2_b = jax.random.normal(ks[3], (hidden,), jnp.float32) * 0.1
    conv3_w = jax.random.normal(ks[4], (dim, hidden, 1, 1), jnp.float32) * 0.3
    conv3_b = jax.random.normal(ks[5], (dim,), jnp.float32) * 0.1
    x = jax.random.normal(ks[6], (N, dim, H, W), jnp.float32)

    out = resnet_1_3_1_block(x, conv1_w, conv1_b, conv2_w, conv2_b, conv3_w, conv3_b)
    out = jax.block_until_ready(out)

    ref = jax.block_until_ready(
        reference(x, conv1_w, conv1_b, conv2_w, conv2_b, conv3_w, conv3_b))

    out_f = out.astype(jnp.float32)
    abs_err = float(jnp.max(jnp.abs(out_f - ref)))
    rel_err = float(jnp.linalg.norm(out_f - ref) / jnp.linalg.norm(ref))
    # bf16 I/O + bf16 MXU operands vs. an all-f32 reference: small numeric drift is
    # expected; structural bugs would show O(1) absolute and O(10%+) relative error
    # since activations are renormalized to unit scale at every layer.
    if abs_err > 1e-1 or rel_err > 4e-2:
        raise AssertionError(
            f"Pallas kernel mismatch vs reference: abs_err={abs_err}, rel_err={rel_err}")

    print("KERNEL_OK")
</pallas_src>

<mosaic_0001>
module attributes {stable_mosaic.version = 11 : i64} {
  func.func @_block_kernel(%arg0: i32, %arg1: memref<1x256x4xbf16, #tpu.memory_space<vmem>>, %arg2: memref<4x32xbf16, #tpu.memory_space<vmem>>, %arg3: memref<3x32x96xbf16, #tpu.memory_space<vmem>>, %arg4: memref<4x32xbf16, #tpu.memory_space<vmem>>, %arg5: memref<1x256x4xbf16, #tpu.memory_space<vmem>>, %arg6: memref<304x96xbf16, #tpu.memory_space<vmem>>) attributes {dimension_semantics = [#tpu.dimension_semantics<parallel>], iteration_bounds = array<i64: 2>, scalar_prefetch = 0 : i64, scratch_operands = 1 : i64, tpu.core_type = #tpu.core_type<tc>, window_params = [{transform_indices = @transform_0, window_bounds = array<i64: 1, 256, 4>}, {pipeline_mode = #tpu.pipeline_mode<synchronous>, transform_indices = @transform_1, window_bounds = array<i64: 4, 32>}, {pipeline_mode = #tpu.pipeline_mode<synchronous>, transform_indices = @transform_2, window_bounds = array<i64: 3, 32, 96>}, {pipeline_mode = #tpu.pipeline_mode<synchronous>, transform_indices = @transform_3, window_bounds = array<i64: 4, 32>}, {transform_indices = @transform_4, window_bounds = array<i64: 1, 256, 4>}]} {
    %c0 = arith.constant 0 : index
    %c0_0 = arith.constant 0 : index
    %c0_1 = arith.constant 0 : index
    %0 = vector.load %arg1[%c0, %c0_0, %c0_1] : memref<1x256x4xbf16, #tpu.memory_space<vmem>>, vector<1x256x4xbf16>
    %1 = vector.shape_cast %0 : vector<1x256x4xbf16> to vector<256x4xbf16>
    %c0_2 = arith.constant 0 : index
    %c0_3 = arith.constant 0 : index
    %2 = vector.load %arg2[%c0_2, %c0_3] : memref<4x32xbf16, #tpu.memory_space<vmem>>, vector<4x32xbf16>
    %cst = arith.constant dense<0.000000e+00> : vector<256x32xf32>
    %3 = tpu.matmul %1, %2, %cst {dimension_numbers = #tpu.dot_dimension_numbers<[1], [0], [0], [1], [0, 0, 1, 1], [], []>} : vector<256x4xbf16>, vector<4x32xbf16>, vector<256x32xf32> -> vector<256x32xf32>
    %cst_4 = arith.constant dense<0.000000e+00> : vector<32xf32>
    %4 = vector.multi_reduction <add>, %3, %cst_4 [0] : vector<256x32xf32> to vector<32xf32>
    %5 = vector.shape_cast %4 : vector<32xf32> to vector<1x32xf32>
    %6 = arith.mulf %3, %3 : vector<256x32xf32>
    %cst_5 = arith.constant dense<0.000000e+00> : vector<32xf32>
    %7 = vector.multi_reduction <add>, %6, %cst_5 [0] : vector<256x32xf32> to vector<32xf32>
    %8 = vector.shape_cast %7 : vector<32xf32> to vector<1x32xf32>
    %cst_6 = arith.constant 3.906250e-03 : f32
    %9 = vector.broadcast %cst_6 : f32 to vector<1x32xf32>
    %10 = arith.mulf %5, %9 : vector<1x32xf32>
    %cst_7 = arith.constant 3.906250e-03 : f32
    %11 = vector.broadcast %cst_7 : f32 to vector<1x32xf32>
    %12 = arith.mulf %8, %11 : vector<1x32xf32>
    %13 = arith.mulf %10, %10 : vector<1x32xf32>
    %14 = arith.subf %12, %13 : vector<1x32xf32>
    %cst_8 = arith.constant 0.000000e+00 : f32
    %15 = vector.broadcast %cst_8 : f32 to vector<1x32xf32>
    %16 = arith.maximumf %14, %15 : vector<1x32xf32>
    %cst_9 = arith.constant 9.99999974E-6 : f32
    %17 = vector.broadcast %cst_9 : f32 to vector<1x32xf32>
    %18 = arith.addf %16, %17 : vector<1x32xf32>
    %19 = math.rsqrt %18 : vector<1x32xf32>
    %20 = vector.broadcast %10 : vector<1x32xf32> to vector<256x32xf32>
    %21 = arith.subf %3, %20 : vector<256x32xf32>
    %cst_10 = arith.constant 0.000000e+00 : f32
    %22 = vector.broadcast %cst_10 : f32 to vector<256x32xf32>
    %23 = arith.maximumf %21, %22 : vector<256x32xf32>
    %24 = tpu.iota {dimensions = array<i32: 0>} : vector<256x1xi32>
    %c16_i32 = arith.constant 16 : i32
    %c0_i32 = arith.constant 0 : i32
    %25 = arith.cmpi eq, %c16_i32, %c0_i32 : i32
    %c1_i32 = arith.constant 1 : i32
    %26 = arith.select %25, %c1_i32, %c16_i32 : i32
    %27 = vector.broadcast %26 : i32 to vector<256x1xi32>
    %28 = arith.remsi %24, %27 : vector<256x1xi32>
    %c0_i32_11 = arith.constant 0 : i32
    %29 = vector.broadcast %c0_i32_11 : i32 to vector<256x1xi32>
    %30 = arith.cmpi ne, %28, %29 : vector<256x1xi32>
    %c0_i32_12 = arith.constant 0 : i32
    %31 = vector.broadcast %c0_i32_12 : i32 to vector<256x1xi32>
    %32 = arith.cmpi slt, %28, %31 : vector<256x1xi32>
    %c0_i32_13 = arith.constant 0 : i32
    %33 = arith.cmpi slt, %26, %c0_i32_13 : i32
    %34 = vector.broadcast %33 : i1 to vector<256x1xi1>
    %35 = vector.broadcast %34 : vector<256x1xi1> to vector<256x1xi1>
    %36 = arith.xori %32, %35 : vector<256x1xi1>
    %37 = arith.andi %36, %30 : vector<256x1xi1>
    %38 = vector.broadcast %26 : i32 to vector<256x1xi32>
    %39 = arith.addi %28, %38 : vector<256x1xi32>
    %40 = arith.select %37, %39, %28 : vector<256x1xi1>, vector<256x1xi32>
    %c0_i32_14 = arith.constant 0 : i32
    %41 = vector.broadcast %c0_i32_14 : i32 to vector<256x1xi32>
    %42 = arith.cmpi sgt, %40, %41 : vector<256x1xi32>
    %43 = arith.extui %42 : vector<256x1xi1> to vector<256x1xi32>
    %44 = arith.sitofp %43 : vector<256x1xi32> to vector<256x1xf32>
    %45 = arith.truncf %44 : vector<256x1xf32> to vector<256x1xbf16>
    %c15_i32 = arith.constant 15 : i32
    %46 = vector.broadcast %c15_i32 : i32 to vector<256x1xi32>
    %47 = arith.cmpi slt, %40, %46 : vector<256x1xi32>
    %48 = arith.extui %47 : vector<256x1xi1> to vector<256x1xi32>
    %49 = arith.sitofp %48 : vector<256x1xi32> to vector<256x1xf32>
    %50 = arith.truncf %49 : vector<256x1xf32> to vector<256x1xbf16>
    %c1_i32_15 = arith.constant 1 : i32
    %51 = tpu.dynamic_rotate %23 by %c1_i32_15 dim 0 : vector<256x32xf32>, i32 -> vector<256x32xf32>
    %52 = arith.truncf %51 : vector<256x32xf32> to vector<256x32xbf16>
    %53 = vector.broadcast %45 : vector<256x1xbf16> to vector<256x32xbf16>
    %54 = arith.mulf %52, %53 : vector<256x32xbf16>
    %c255_i32 = arith.constant 255 : i32
    %55 = tpu.dynamic_rotate %23 by %c255_i32 dim 0 : vector<256x32xf32>, i32 -> vector<256x32xf32>
    %56 = arith.truncf %55 : vector<256x32xf32> to vector<256x32xbf16>
    %57 = vector.broadcast %50 : vector<256x1xbf16> to vector<256x32xbf16>
    %58 = arith.mulf %56, %57 : vector<256x32xbf16>
    %59 = arith.truncf %23 : vector<256x32xf32> to vector<256x32xbf16>
    %60 = tpu.concatenate %54, %59, %58 in 1 : vector<256x32xbf16>, vector<256x32xbf16>, vector<256x32xbf16> -> vector<256x96xbf16>
    %c32 = arith.constant 32 : index
    %c0_16 = arith.constant 0 : index
    %61 = vector.load %arg6[%c32, %c0_16] : memref<304x96xbf16, #tpu.memory_space<vmem>>, vector<256x96xbf16>
    tpu.vector_store %arg6[%c32, %c0_16], %60 {strides = array<i32>} : memref<304x96xbf16, #tpu.memory_space<vmem>>, vector<256x96xbf16>,
    %cst_17 = arith.constant 0.000000e+00 : bf16
    %62 = vector.broadcast %cst_17 : bf16 to vector<16x96xbf16>
    %c16 = arith.constant 16 : index
    %c0_18 = arith.constant 0 : index
    %63 = vector.load %arg6[%c16, %c0_18] : memref<304x96xbf16, #tpu.memory_space<vmem>>, vector<16x96xbf16>
    tpu.vector_store %arg6[%c16, %c0_18], %62 {strides = array<i32>} : memref<304x96xbf16, #tpu.memory_space<vmem>>, vector<16x96xbf16>,
    %c288 = arith.constant 288 : index
    %c0_19 = arith.constant 0 : index
    %64 = vector.load %arg6[%c288, %c0_19] : memref<304x96xbf16, #tpu.memory_space<vmem>>, vector<16x96xbf16>
    tpu.vector_store %arg6[%c288, %c0_19], %62 {strides = array<i32>} : memref<304x96xbf16, #tpu.memory_space<vmem>>, vector<16x96xbf16>,
    %65 = arith.truncf %19 : vector<1x32xf32> to vector<1x32xbf16>
    %66 = tpu.concatenate %65, %65, %65 in 1 : vector<1x32xbf16>, vector<1x32xbf16>, vector<1x32xbf16> -> vector<1x96xbf16>
    %c32_20 = arith.constant 32 : index
    %c0_21 = arith.constant 0 : index
    %67 = vector.load %arg6[%c32_20, %c0_21] : memref<304x96xbf16, #tpu.memory_space<vmem>>, vector<256x96xbf16>
    %c1 = arith.constant 1 : index
    %c0_22 = arith.constant 0 : index
    %c0_23 = arith.constant 0 : index
    %68 = vector.load %arg3[%c1, %c0_22, %c0_23] : memref<3x32x96xbf16, #tpu.memory_space<vmem>>, vector<1x32x96xbf16>
    %69 = vector.shape_cast %68 : vector<1x32x96xbf16> to vector<32x96xbf16>
    %70 = vector.broadcast %66 : vector<1x96xbf16> to vector<32x96xbf16>
    %71 = arith.mulf %69, %70 : vector<32x96xbf16>
    %cst_24 = arith.constant dense<0.000000e+00> : vector<256x32xf32>
    %72 = tpu.matmul %67, %71, %cst_24 {dimension_numbers = #tpu.dot_dimension_numbers<[1], [1], [0], [0], [0, 0, 1, 0], [], []>} : vector<256x96xbf16>, vector<32x96xbf16>, vector<256x32xf32> -> vector<256x32xf32>
    %c16_25 = arith.constant 16 : index
    %c0_26 = arith.constant 0 : index
    %73 = vector.load %arg6[%c16_25, %c0_26] : memref<304x96xbf16, #tpu.memory_space<vmem>>, vector<256x96xbf16>
    %c0_27 = arith.constant 0 : index
    %c0_28 = arith.constant 0 : index
    %c0_29 = arith.constant 0 : index
    %74 = vector.load %arg3[%c0_27, %c0_28, %c0_29] : memref<3x32x96xbf16, #tpu.memory_space<vmem>>, vector<1x32x96xbf16>
    %75 = vector.shape_cast %74 : vector<1x32x96xbf16> to vector<32x96xbf16>
    %76 = vector.broadcast %66 : vector<1x96xbf16> to vector<32x96xbf16>
    %77 = arith.mulf %75, %76 : vector<32x96xbf16>
    %cst_30 = arith.constant dense<0.000000e+00> : vector<256x32xf32>
    %78 = tpu.matmul %73, %77, %cst_30 {dimension_numbers = #tpu.dot_dimension_numbers<[1], [1], [0], [0], [0, 0, 1, 0], [], []>} : vector<256x96xbf16>, vector<32x96xbf16>, vector<256x32xf32> -> vector<256x32xf32>
    %79 = arith.addf %72, %78 : vector<256x32xf32>
    %c48 = arith.constant 48 : index
    %c0_31 = arith.constant 0 : index
    %80 = vector.load %arg6[%c48, %c0_31] : memref<304x96xbf16, #tpu.memory_space<vmem>>, vector<256x96xbf16>
    %c2 = arith.constant 2 : index
    %c0_32 = arith.constant 0 : index
    %c0_33 = arith.constant 0 : index
    %81 = vector.load %arg3[%c2, %c0_32, %c0_33] : memref<3x32x96xbf16, #tpu.memory_space<vmem>>, vector<1x32x96xbf16>
    %82 = vector.shape_cast %81 : vector<1x32x96xbf16> to vector<32x96xbf16>
    %83 = vector.broadcast %66 : vector<1x96xbf16> to vector<32x96xbf16>
    %84 = arith.mulf %82, %83 : vector<32x96xbf16>
    %cst_34 = arith.constant dense<0.000000e+00> : vector<256x32xf32>
    %85 = tpu.matmul %80, %84, %cst_34 {dimension_numbers = #tpu.dot_dimension_numbers<[1], [1], [0], [0], [0, 0, 1, 0], [], []>} : vector<256x96xbf16>, vector<32x96xbf16>, vector<256x32xf32> -> vector<256x32xf32>
    %86 = arith.addf %79, %85 : vector<256x32xf32>
    %cst_35 = arith.constant dense<0.000000e+00> : vector<32xf32>
    %87 = vector.multi_reduction <add>, %86, %cst_35 [0] : vector<256x32xf32> to vector<32xf32>
    %88 = vector.shape_cast %87 : vector<32xf32> to vector<1x32xf32>
    %89 = arith.mulf %86, %86 : vector<256x32xf32>
    %cst_36 = arith.constant dense<0.000000e+00> : vector<32xf32>
    %90 = vector.multi_reduction <add>, %89, %cst_36 [0] : vector<256x32xf32> to vector<32xf32>
    %91 = vector.shape_cast %90 : vector<32xf32> to vector<1x32xf32>
    %cst_37 = arith.constant 3.906250e-03 : f32
    %92 = vector.broadcast %cst_37 : f32 to vector<1x32xf32>
    %93 = arith.mulf %88, %92 : vector<1x32xf32>
    %cst_38 = arith.constant 3.906250e-03 : f32
    %94 = vector.broadcast %cst_38 : f32 to vector<1x32xf32>
    %95 = arith.mulf %91, %94 : vector<1x32xf32>
    %96 = arith.mulf %93, %93 : vector<1x32xf32>
    %97 = arith.subf %95, %96 : vector<1x32xf32>
    %cst_39 = arith.constant 0.000000e+00 : f32
    %98 = vector.broadcast %cst_39 : f32 to vector<1x32xf32>
    %99 = arith.maximumf %97, %98 : vector<1x32xf32>
    %cst_40 = arith.constant 9.99999974E-6 : f32
    %100 = vector.broadcast %cst_40 : f32 to vector<1x32xf32>
    %101 = arith.addf %99, %100 : vector<1x32xf32>
    %102 = math.rsqrt %101 : vector<1x32xf32>
    %103 = vector.broadcast %93 : vector<1x32xf32> to vector<256x32xf32>
    %104 = arith.subf %86, %103 : vector<256x32xf32>
    %cst_41 = arith.constant 0.000000e+00 : f32
    %105 = vector.broadcast %cst_41 : f32 to vector<256x32xf32>
    %106 = arith.maximumf %104, %105 : vector<256x32xf32>
    %107 = arith.truncf %106 : vector<256x32xf32> to vector<256x32xbf16>
    %c0_42 = arith.constant 0 : index
    %c0_43 = arith.constant 0 : index
    %108 = vector.load %arg4[%c0_42, %c0_43] : memref<4x32xbf16, #tpu.memory_space<vmem>>, vector<4x32xbf16>
    %109 = arith.truncf %102 : vector<1x32xf32> to vector<1x32xbf16>
    %110 = vector.broadcast %109 : vector<1x32xbf16> to vector<4x32xbf16>
    %111 = arith.mulf %108, %110 : vector<4x32xbf16>
    %cst_44 = arith.constant dense<0.000000e+00> : vector<256x4xf32>
    %112 = tpu.matmul %107, %111, %cst_44 {dimension_numbers = #tpu.dot_dimension_numbers<[1], [1], [0], [0], [0, 0, 1, 0], [], []>} : vector<256x32xbf16>, vector<4x32xbf16>, vector<256x4xf32> -> vector<256x4xf32>
    %cst_45 = arith.constant dense<0.000000e+00> : vector<4xf32>
    %113 = vector.multi_reduction <add>, %112, %cst_45 [0] : vector<256x4xf32> to vector<4xf32>
    %114 = vector.shape_cast %113 : vector<4xf32> to vector<1x4xf32>
    %115 = arith.mulf %112, %112 : vector<256x4xf32>
    %cst_46 = arith.constant dense<0.000000e+00> : vector<4xf32>
    %116 = vector.multi_reduction <add>, %115, %cst_46 [0] : vector<256x4xf32> to vector<4xf32>
    %117 = vector.shape_cast %116 : vector<4xf32> to vector<1x4xf32>
    %cst_47 = arith.constant 3.906250e-03 : f32
    %118 = vector.broadcast %cst_47 : f32 to vector<1x4xf32>
    %119 = arith.mulf %114, %118 : vector<1x4xf32>
    %cst_48 = arith.constant 3.906250e-03 : f32
    %120 = vector.broadcast %cst_48 : f32 to vector<1x4xf32>
    %121 = arith.mulf %117, %120 : vector<1x4xf32>
    %122 = arith.mulf %119, %119 : vector<1x4xf32>
    %123 = arith.subf %121, %122 : vector<1x4xf32>
    %cst_49 = arith.constant 0.000000e+00 : f32
    %124 = vector.broadcast %cst_49 : f32 to vector<1x4xf32>
    %125 = arith.maximumf %123, %124 : vector<1x4xf32>
    %cst_50 = arith.constant 9.99999974E-6 : f32
    %126 = vector.broadcast %cst_50 : f32 to vector<1x4xf32>
    %127 = arith.addf %125, %126 : vector<1x4xf32>
    %128 = math.rsqrt %127 : vector<1x4xf32>
    %129 = vector.broadcast %119 : vector<1x4xf32> to vector<256x4xf32>
    %130 = arith.subf %112, %129 : vector<256x4xf32>
    %131 = vector.broadcast %128 : vector<1x4xf32> to vector<256x4xf32>
    %132 = arith.mulf %130, %131 : vector<256x4xf32>
    %cst_51 = arith.constant 0.000000e+00 : f32
    %133 = vector.broadcast %cst_51 : f32 to vector<256x4xf32>
    %134 = arith.maximumf %132, %133 : vector<256x4xf32>
    %c0_52 = arith.constant 0 : index
    %c0_53 = arith.constant 0 : index
    %c0_54 = arith.constant 0 : index
    %135 = vector.load %arg1[%c0_52, %c0_53, %c0_54] : memref<1x256x4xbf16, #tpu.memory_space<vmem>>, vector<1x256x4xbf16>
    %136 = vector.shape_cast %135 : vector<1x256x4xbf16> to vector<256x4xbf16>
    %137 = arith.extf %136 : vector<256x4xbf16> to vector<256x4xf32>
    %138 = arith.addf %137, %134 : vector<256x4xf32>
    %139 = arith.truncf %138 : vector<256x4xf32> to vector<256x4xbf16>
    %c0_55 = arith.constant 0 : index
    %c0_56 = arith.constant 0 : index
    %c0_57 = arith.constant 0 : index
    %140 = vector.load %arg5[%c0_55, %c0_56, %c0_57] : memref<1x256x4xbf16, #tpu.memory_space<vmem>>, vector<1x256x4xbf16>
    %141 = vector.shape_cast %140 : vector<1x256x4xbf16> to vector<256x4xbf16>
    %142 = vector.shape_cast %139 : vector<256x4xbf16> to vector<1x256x4xbf16>
    tpu.vector_store %arg5[%c0_55, %c0_56, %c0_57], %142 {strides = array<i32>} : memref<1x256x4xbf16, #tpu.memory_space<vmem>>, vector<1x256x4xbf16>,
    return
  }
  func.func @transform_0(%arg0: i32) -> (i32, i32, i32) {
    %c0_i32 = arith.constant 0 : i32
    %c0_i32_0 = arith.constant 0 : i32
    %c0_i32_1 = arith.constant 0 : i32
    return %arg0, %c0_i32, %c0_i32_0 : i32, i32, i32
  }
  func.func @transform_1(%arg0: i32) -> (i32, i32) {
    %c0_i32 = arith.constant 0 : i32
    %c0_i32_0 = arith.constant 0 : i32
    %c0_i32_1 = arith.constant 0 : i32
    return %c0_i32, %c0_i32_0 : i32, i32
  }
  func.func @transform_2(%arg0: i32) -> (i32, i32, i32) {
    %c0_i32 = arith.constant 0 : i32
    %c0_i32_0 = arith.constant 0 : i32
    %c0_i32_1 = arith.constant 0 : i32
    %c0_i32_2 = arith.constant 0 : i32
    return %c0_i32, %c0_i32_0, %c0_i32_1 : i32, i32, i32
  }
  func.func @transform_3(%arg0: i32) -> (i32, i32) {
    %c0_i32 = arith.constant 0 : i32
    %c0_i32_0 = arith.constant 0 : i32
    %c0_i32_1 = arith.constant 0 : i32
    return %c0_i32, %c0_i32_0 : i32, i32
  }
  func.func @transform_4(%arg0: i32) -> (i32, i32, i32) {
    %c0_i32 = arith.constant 0 : i32
    %c0_i32_0 = arith.constant 0 : i32
    %c0_i32_1 = arith.constant 0 : i32
    return %arg0, %c0_i32, %c0_i32_0 : i32, i32, i32
  }
}

</mosaic_0001>

<bundles_post_ra>
// kernel: tpu_custom_call.1
= control target key start
LH: loop header
LB: loop body
LE: loop exit
PB: predicated region body
PF: predicated region fallthrough
CT: control target
= control target key end

     0   :  { %s4558_s15 = smov 0   ;;  %s6920_s0 = inlined_call_operand.vmem [shape: bf16[2,256,4], index: 0, kind: input, shape index: {}]   ;;  %s6921_s1 = inlined_call_operand.vmem [shape: bf16[4,32], index: 1, kind: input, shape index: {}]   ;;  %s6922_s2 = inlined_call_operand.vmem [shape: bf16[3,32,96], index: 2, kind: input, shape index: {}]   ;;  %s6923_s3 = inlined_call_operand.vmem [shape: bf16[4,32], index: 3, kind: input, shape index: {}]   ;;  %s6924_s4 = inlined_call_operand.vmem [shape: bf16[2,256,4], index: 4, kind: output, shape index: {}]  }
   0x1 LB: > { %s4012_s16 = sadd.s32 4294967295, %s4526_s15   ;;  %p4016_p0 = scmp.ge.s32.totalorder %s4526_s15, 1  ;;  %s4526_s15 = sphi %s4558_s15, %s14_s15  }
   0x2   : > { %p162_p1 = scmp.lt.s32.totalorder %s4526_s15, 3 }
   0x4   : > { %p163_p2 = pnand %p4016_p0, %p162_p1 }
   0x6   : > { %166 = sbr.rel (%p163_p2) target bundleno = 1403 (0x57b), region = 36 }
   0xb   : > { %v231_v0 = vld [vmem:[%s6921_s1] sm:$0x3]  ;;  %vm361_vm0 = vcmask 1041408   ;;  %p188_p3 = scmp.lt.s32.totalorder %s4012_s16, 1  ;;  %vm312_vm1 = vcmask 31744   ;;  %vm454_vm2 = vcmask 261120  }
   0xc   : > { %v363_v1 = vsel %vm361_vm0, %v231_v0, 0  ;;  %s4528_s23 = smov 32   ;;  %s4531_s24 = smov 64  }
   0xd   : > { %372 = vmatpush.bf16.msra.mxu0 %v363_v1  ;;  %s7100_s16 = smov (!%p188_p3, %s4012_s16), 1  ;;  %4498 = vmatpush.bf16.msra.mxu1 %v363_v1 }
   0xe   : > { %4499 = vmatpush.bf16.msra.mxu2 %v363_v1  ;;  %4500 = vmatpush.bf16.msra.mxu3 %v363_v1  ;;  %s4339_s19 = sshll.u32 %s7100_s16, 7 }
   0xf   : > { %s4577_s22 = scalar_lea.vmem %s6920_s0, %s4339_s19  ;;  %s6731_s17 = scalar_lea.vmem %s6924_s4, %s4339_s19 }
  0x10   : > { %v4341_v2 = vld [vmem:[%s4577_s22] sm:$0xff]  ;;  %v4342_v6 = vld [vmem:[%s4577_s22 + $0x8] sm:$0xff]  ;;  %v4343_v10 = vld [vmem:[%s4577_s22 + $0x10] sm:$0xff] }
  0x11   : > { %v4345_v3 = vld [vmem:[%s4577_s22 + $0x20] sm:$0xff]  ;;  %4085 = vmatmul.msk.bf16.vlgmr.msra.gmra.mxu0 %vm312_vm1, %v4341_v2  ;;  %v4346_v7 = vld [vmem:[%s4577_s22 + $0x28] sm:$0xff]  ;;  %v4347_v11 = vld [vmem:[%s4577_s22 + $0x30] sm:$0xff] }
  0x12   : > { %v4349_v4 = vld [vmem:[%s4577_s22 + $0x40] sm:$0xff]  ;;  %4089 = vmatmul.msk.bf16.vlgmr.msra.gmra.mxu1 %vm312_vm1, %v4345_v3  ;;  %v4350_v8 = vld [vmem:[%s4577_s22 + $0x48] sm:$0xff]  ;;  %v4351_v12 = vld [vmem:[%s4577_s22 + $0x50] sm:$0xff] }
  0x13   : > { %v4353_v5 = vld [vmem:[%s4577_s22 + $0x60] sm:$0xff]  ;;  %4093 = vmatmul.msk.bf16.vlgmr.msra.gmra.mxu2 %vm312_vm1, %v4349_v4  ;;  %v4354_v9 = vld [vmem:[%s4577_s22 + $0x68] sm:$0xff]  ;;  %v4355_v13 = vld [vmem:[%s4577_s22 + $0x70] sm:$0xff] }
  0x14   : > { %4097 = vmatmul.msk.bf16.vlgmr.msra.gmra.mxu3 %vm312_vm1, %v4353_v5  ;;  %v4344_v14 = vld [vmem:[%s4577_s22 + $0x18] sm:$0xff] }
  0x15   : > { %v4348_v15 = vld [vmem:[%s4577_s22 + $0x38] sm:$0xff] }
  0x16   : > { %v4352_v16 = vld [vmem:[%s4577_s22 + $0x58] sm:$0xff] }
  0x17   : > { %v4356_v17 = vld [vmem:[%s4577_s22 + $0x78] sm:$0xff] }
  0x21   : > { %4086 = vmatmul.msk.bf16.gmra.mxu0 %vm312_vm1, %v4342_v6 }
  0x22   : > { %4090 = vmatmul.msk.bf16.gmra.mxu1 %vm312_vm1, %v4346_v7 }
  0x23   : > { %4094 = vmatmul.msk.bf16.gmra.mxu2 %vm312_vm1, %v4350_v8 }
  0x24   : > { %4098 = vmatmul.msk.bf16.gmra.mxu3 %vm312_vm1, %v4354_v9 }
  0x31   : > { %4087 = vmatmul.msk.bf16.gmra.mxu0 %vm312_vm1, %v4343_v10 }
  0x32   : > { %4091 = vmatmul.msk.bf16.gmra.mxu1 %vm312_vm1, %v4347_v11 }
  0x33   : > { %4095 = vmatmul.msk.bf16.gmra.mxu2 %vm312_vm1, %v4351_v12 }
  0x34   : > { %4099 = vmatmul.msk.bf16.gmra.mxu3 %vm312_vm1, %v4355_v13 }
  0x41   : > { %4088 = vmatmul.msk.bf16.gmra.mxu0 %vm312_vm1, %v4344_v14 }
  0x42   : > { %4092 = vmatmul.msk.bf16.gmra.mxu1 %vm312_vm1, %v4348_v15 }
  0x43   : > { %4096 = vmatmul.msk.bf16.gmra.mxu2 %vm312_vm1, %v4352_v16 }
  0x44   : > { %4100 = vmatmul.msk.bf16.gmra.mxu3 %vm312_vm1, %v4356_v17 }
  0x8e   : > { %v4611_v18 = vpop.f32.mrf.mxu0 }
  0x8f   : > { %v4613_v19 = vpop.f32.mrf.mxu1  ;;  %v524_v35 = vmul.f32 %v4611_v18, %v4611_v18  ;;  %v455_v39 = vsel %vm454_vm2, %v4611_v18, 0.0 }
  0x90   : > { %v532_v8 = vmul.f32 %v4613_v19, %v4613_v19  ;;  %v470_v14 = vsel %vm454_vm2, %v4613_v19, 0.0 }
  0x91   : > { %v556_v44 = vsel %vm454_vm2, %v524_v35, 0.0 }
  0x96   : > { %v4615_v20 = vpop.f32.mrf.mxu0  ;;  %v4619_v22 = vpop.f32.mrf.mxu2 }
  0x97   : > { %v4617_v21 = vpop.f32.mrf.mxu1  ;;  %v4631_v28 = vpop.f32.mrf.mxu3  ;;  %v525_v34 = vmul.f32 %v4615_v20, %v4615_v20  ;;  %v456_v36 = vsel %vm454_vm2, %v4615_v20, 0.0 }
  0x98   : > { %v457_v43 = vadd.f32 %v456_v36, %v455_v39  ;;  %v533_v15 = vmul.f32 %v4617_v21, %v4617_v21  ;;  %v571_v36 = vsel %vm454_vm2, %v532_v8, 0.0 }
  0x99   : > { %v557_v40 = vsel %vm454_vm2, %v525_v34, 0.0 }
  0x9a   : > { %v558_v49 = vadd.f32 %v557_v40, %v556_v44 }
  0x9e   : > { %v4621_v23 = vpop.f32.mrf.mxu0  ;;  %v4627_v26 = vpop.f32.mrf.mxu2 }
  0x9f   : > { %v4623_v24 = vpop.f32.mrf.mxu1  ;;  %v4641_v33 = vpop.f32.mrf.mxu3  ;;  %v526_v37 = vmul.f32 %v4621_v23, %v4621_v23  ;;  %v458_v41 = vsel %vm454_vm2, %v4621_v23, 0.0 }
  0xa0   : > { %v459_v48 = vadd.f32 %v458_v41, %v457_v43  ;;  %v534_v39 = vmul.f32 %v4623_v24, %v4623_v24  ;;  %v474_v43 = vsel %vm454_vm2, %v4623_v24, 0.0 }
  0xa1   : > { %v559_v45 = vsel %vm454_vm2, %v526_v37, 0.0  ;;  %v472_v37 = vsel %vm454_vm2, %v4617_v21, 0.0 }
  0xa2   : > { %v560_v55 = vadd.f32 %v559_v45, %v558_v49 }
  0xa6   : > { %v4625_v25 = vpop.f32.mrf.mxu0  ;;  %v4635_v30 = vpop.f32.mrf.mxu2 }
  0xa7   : > { %v4629_v27 = vpop.f32.mrf.mxu1  ;;  %v527_v42 = vmul.f32 %v4625_v25, %v4625_v25  ;;  %v460_v46 = vsel %vm454_vm2, %v4625_v25, 0.0  ;;  %v4675_v57 = vpop.f32.mrf.mxu3 }
  0xa8   : > { %v461_v56 = vadd.f32 %v460_v46, %v459_v48  ;;  %v535_v44 = vmul.f32 %v4629_v27, %v4629_v27  ;;  %v575_v48 = vsel %vm454_vm2, %v534_v39, 0.0  ;;  %v476_v49 = vsel %vm454_vm2, %v4629_v27, 0.0 }
  0xa9   : > { %v561_v52 = vsel %vm454_vm2, %v527_v42, 0.0  ;;  %v573_v42 = vsel %vm454_vm2, %v533_v15, 0.0 }
  0xaa   : > { %v562_v62 = vadd.f32 %v561_v52, %v560_v55  ;;  %v577_v55 = vsel %vm454_vm2, %v535_v44, 0.0 }
  0xae   : > { %v4633_v29 = vpop.f32.mrf.mxu0  ;;  %v4651_v38 = vpop.f32.mrf.mxu2 }
  0xaf   : > { %v4637_v31 = vpop.f32.mrf.mxu1  ;;  %v528_v47 = vmul.f32 %v4633_v29, %v4633_v29  ;;  %v462_v53 = vsel %vm454_vm2, %v4633_v29, 0.0  ;;  %v4703_v35 = vpop.f32.mrf.mxu3 }
  0xb0   : > { %v463_v61 = vadd.f32 %v462_v53, %v461_v56  ;;  %v536_v52 = vmul.f32 %v4637_v31, %v4637_v31  ;;  %v478_v56 = vsel %vm454_vm2, %v4637_v31, 0.0 }
  0xb1   : > { %v563_v58 = vsel %vm454_vm2, %v528_v47, 0.0 }
  0xb2   : > { %v564_v1 = vadd.f32 %v563_v58, %v562_v62  ;;  %v579_v62 = vsel %vm454_vm2, %v536_v52, 0.0 }
  0xb6   : > { %v4639_v32 = vpop.f32.mrf.mxu0  ;;  %v4685_v3 = vpop.f32.mrf.mxu2 }
  0xb7   : > { %v4668_v51 = vpop.f32.mrf.mxu1  ;;  %v529_v54 = vmul.f32 %v4639_v32, %v4639_v32  ;;  %v464_v59 = vsel %vm454_vm2, %v4639_v32, 0.0 }
  0xb8   : > { %v465_v2 = vadd.f32 %v464_v59, %v463_v61  ;;  %v537_v58 = vmul.f32 %v4668_v51, %v4668_v51 }
  0xb9   : > { %v565_v63 = vsel %vm454_vm2, %v529_v54, 0.0 }
  0xba   : > { %v566_v6 = vadd.f32 %v565_v63, %v564_v1  ;;  %v480_v63 = vsel %vm454_vm2, %v4668_v51, 0.0 }
  0xbe   : > { %v4666_v50 = vpop.f32.mrf.mxu0  ;;  %v4715_v47 = vpop.f32.mrf.mxu2 }
  0xbf   : > { %v530_v60 = vmul.f32 %v4666_v50, %v4666_v50  ;;  %v466_v0 = vsel %vm454_vm2, %v4666_v50, 0.0  ;;  %v4696_v13 = vpop.f32.mrf.mxu1 }
  0xc0   : > { %v467_v5 = vadd.f32 %v466_v0, %v465_v2  ;;  %v538_v0 = vmul.f32 %v4696_v13, %v4696_v13 }
  0xc1   : > { %v567_v4 = vsel %vm454_vm2, %v530_v60, 0.0 }
  0xc2   : > { %v568_v11 = vadd.f32 %v567_v4, %v566_v6  ;;  %v4734_v4 = vpop.f32.mrf.mxu3  ;;  %v482_v6 = vsel %vm454_vm2, %v4696_v13, 0.0 }
  0xc6   : > { %v4688_v7 = vpop.f32.mrf.mxu0 }
  0xc7   : > { %v468_v9 = vsel %vm454_vm2, %v4688_v7, 0.0  ;;  %v531_v10 = vmul.f32 %v4688_v7, %v4688_v7  ;;  %v4727_v61 = vpop.f32.mrf.mxu1 }
  0xc8   : > { %v469_v12 = vadd.f32 %v468_v9, %v467_v5  ;;  %v581_v5 = vsel %vm454_vm2, %v537_v58, 0.0  ;;  %v539_v8 = vmul.f32 %v4727_v61, %v4727_v61  ;;  %v544_v58 = vmul.f32 %v4685_v3, %v4685_v3 }
  0xc9   : > { %v569_v16 = vsel %vm454_vm2, %v531_v10, 0.0 }
  0xca   : > { %v471_v17 = vadd.f32 %v470_v14, %v469_v12  ;;  %v570_v34 = vadd.f32 %v569_v16, %v568_v11  ;;  %v540_v11 = vmul.f32 %v4619_v22, %v4619_v22  ;;  %v583_v12 = vsel %vm454_vm2, %v538_v0, 0.0 }
  0xcb   : > { %v484_v14 = vsel %vm454_vm2, %v4727_v61, 0.0  ;;  %v545_v0 = vmul.f32 %v4715_v47, %v4715_v47 }
  0xcc   : > { %v473_v40 = vadd.f32 %v472_v37, %v471_v17  ;;  %v572_v41 = vadd.f32 %v571_v36, %v570_v34  ;;  %v4746_v17 = vpop.f32.mrf.mxu2  ;;  %v486_v34 = vsel %vm454_vm2, %v4619_v22, 0.0  ;;  %v541_v36 = vmul.f32 %v4627_v26, %v4627_v26 }
  0xcd   : > { %v585_v37 = vsel %vm454_vm2, %v539_v8, 0.0  ;;  %v496_v8 = vsel %vm454_vm2, %v4715_v47, 0.0 }
  0xce   : > { %v574_v45 = vadd.f32 %v573_v42, %v572_v41  ;;  %v475_v46 = vadd.f32 %v474_v43, %v473_v40  ;;  %v587_v41 = vsel %vm454_vm2, %v540_v11, 0.0  ;;  %v488_v42 = vsel %vm454_vm2, %v4627_v26, 0.0 }
  0xcf   : > { %v542_v43 = vmul.f32 %v4635_v30, %v4635_v30 }
  0xd0   : > { %v477_v53 = vadd.f32 %v476_v49, %v475_v46  ;;  %v576_v54 = vadd.f32 %v575_v48, %v574_v45  ;;  %v589_v46 = vsel %vm454_vm2, %v541_v36, 0.0  ;;  %v490_v48 = vsel %vm454_vm2, %v4635_v30, 0.0 }
  0xd1   : > { %v543_v49 = vmul.f32 %v4651_v38, %v4651_v38  ;;  %v548_v36 = vmul.f32 %v4631_v28, %v4631_v28 }
  0xd2   : > { %v479_v59 = vadd.f32 %v478_v56, %v477_v53  ;;  %v578_v60 = vadd.f32 %v577_v55, %v576_v54  ;;  %v4763_v54 = vpop.f32.mrf.mxu3  ;;  %v591_v55 = vsel %vm454_vm2, %v542_v43, 0.0  ;;  %v492_v56 = vsel %vm454_vm2, %v4651_v38, 0.0 }
  0xd3   : > { %v502_v43 = vsel %vm454_vm2, %v4631_v28, 0.0 }
  0xd4   : > { %v481_v1 = vadd.f32 %v480_v63, %v479_v59  ;;  %v580_v2 = vadd.f32 %v579_v62, %v578_v60  ;;  %v593_v62 = vsel %vm454_vm2, %v543_v49, 0.0  ;;  %v494_v63 = vsel %vm454_vm2, %v4685_v3, 0.0 }
  0xd5   : > { %v603_v49 = vsel %vm454_vm2, %v548_v36, 0.0 }
  0xd6   : > { %v483_v9 = vadd.f32 %v482_v6, %v481_v1  ;;  %v582_v10 = vadd.f32 %v581_v5, %v580_v2  ;;  %v4775_v5 = vpop.f32.mrf.mxu2  ;;  %v595_v6 = vsel %vm454_vm2, %v544_v58, 0.0 }
  0xd8   : > { %v584_v15 = vadd.f32 %v583_v12, %v582_v10  ;;  %v485_v16 = vadd.f32 %v484_v14, %v483_v9  ;;  %v546_v9 = vmul.f32 %v4746_v17, %v4746_v17  ;;  %v597_v12 = vsel %vm454_vm2, %v545_v0, 0.0 }
  0xd9   : > { %v498_v14 = vsel %vm454_vm2, %v4746_v17, 0.0 }
  0xda   : > { %v487_v39 = vadd.f32 %v486_v34, %v485_v16  ;;  %v586_v40 = vadd.f32 %v585_v37, %v584_v15  ;;  %v547_v15 = vmul.f32 %v4775_v5, %v4775_v5  ;;  %v599_v37 = vsel %vm454_vm2, %v546_v9, 0.0 }
  0xdc   : > { %v489_v44 = vadd.f32 %v488_v42, %v487_v39  ;;  %v588_v45 = vadd.f32 %v587_v41, %v586_v40  ;;  %v500_v39 = vsel %vm454_vm2, %v4775_v5, 0.0  ;;  %v4792_v42 = vpop.f32.mrf.mxu3 }
  0xdd   : > { %v554_v36 = vmul.f32 %v4792_v42, %v4792_v42 }
  0xde   : > { %v590_v52 = vadd.f32 %v589_v46, %v588_v45  ;;  %v491_v53 = vadd.f32 %v490_v48, %v489_v44  ;;  %v549_v44 = vmul.f32 %v4641_v33, %v4641_v33  ;;  %v601_v45 = vsel %vm454_vm2, %v547_v15, 0.0 }
  0xe0   : > { %v493_v59 = vadd.f32 %v492_v56, %v491_v53  ;;  %v592_v60 = vadd.f32 %v591_v55, %v590_v52  ;;  %v504_v52 = vsel %vm454_vm2, %v4641_v33, 0.0  ;;  %v550_v53 = vmul.f32 %v4675_v57, %v4675_v57 }
  0xe1   : > { %v605_v58 = vsel %vm454_vm2, %v549_v44, 0.0 }
  0xe2   : > { %v495_v1 = vadd.f32 %v494_v63, %v493_v59  ;;  %v594_v2 = vadd.f32 %v593_v62, %v592_v60  ;;  %v506_v59 = vsel %vm454_vm2, %v4675_v57, 0.0  ;;  %v551_v60 = vmul.f32 %v4703_v35, %v4703_v35 }
  0xe3   : > { %v607_v0 = vsel %vm454_vm2, %v550_v53, 0.0 }
  0xe4   : > { %v497_v10 = vadd.f32 %v496_v8, %v495_v1  ;;  %v596_v11 = vadd.f32 %v595_v6, %v594_v2  ;;  %v508_v1 = vsel %vm454_vm2, %v4703_v35, 0.0  ;;  %v552_v2 = vmul.f32 %v4734_v4, %v4734_v4  ;;  %v451_v15 = vpop.f32.mrf.mxu3 }
  0xe5   : > { %v609_v9 = vsel %vm454_vm2, %v551_v60, 0.0 }
  0xe6   : > { %v499_v16 = vadd.f32 %v498_v14, %v497_v10  ;;  %v598_v34 = vadd.f32 %v597_v12, %v596_v11  ;;  %v510_v10 = vsel %vm454_vm2, %v4734_v4, 0.0  ;;  %v553_v11 = vmul.f32 %v4763_v54, %v4763_v54 }
  0xe8   : > { %v600_v40 = vadd.f32 %v599_v37, %v598_v34  ;;  %v501_v41 = vadd.f32 %v500_v39, %v499_v16  ;;  %v611_v16 = vsel %vm454_vm2, %v552_v2, 0.0  ;;  %v512_v34 = vsel %vm454_vm2, %v4763_v54, 0.0 }
  0xea   : > { %v503_v46 = vadd.f32 %v502_v43, %v501_v41  ;;  %v602_v48 = vadd.f32 %v601_v45, %v600_v40  ;;  %v613_v40 = vsel %vm454_vm2, %v553_v11, 0.0  ;;  %v514_v41 = vsel %vm454_vm2, %v4792_v42, 0.0 }
  0xeb   : > { %v555_v43 = vmul.f32 %v451_v15, %v451_v15 }
  0xec   : > { %v505_v55 = vadd.f32 %v504_v52, %v503_v46  ;;  %v604_v56 = vadd.f32 %v603_v49, %v602_v48  ;;  %v615_v46 = vsel %vm454_vm2, %v554_v36, 0.0  ;;  %v516_v48 = vsel %vm454_vm2, %v451_v15, 0.0 }
  0xed   : > { %v617_v53 = vsel %vm454_vm2, %v555_v43, 0.0 }
  0xee   : > { %v606_v62 = vadd.f32 %v605_v58, %v604_v56  ;;  %v507_v63 = vadd.f32 %v506_v59, %v505_v55 }
  0xf0   : > { %v509_v6 = vadd.f32 %v508_v1, %v507_v63  ;;  %v608_v8 = vadd.f32 %v607_v0, %v606_v62 }
  0xf2   : > { %v511_v12 = vadd.f32 %v510_v10, %v509_v6  ;;  %v610_v14 = vadd.f32 %v609_v9, %v608_v8 }
  0xf4   : > { %v513_v37 = vadd.f32 %v512_v34, %v511_v12  ;;  %v612_v39 = vadd.f32 %v611_v16, %v610_v14  ;;  %v705_v34 = vlaneseq }
  0xf6   : > { %v515_v44 = vadd.f32 %v514_v41, %v513_v37  ;;  %v614_v45 = vadd.f32 %v613_v40, %v612_v39 }
  0xf8   : > { %v616_v49 = vadd.f32 %v615_v46, %v614_v45  ;;  %v517_v52 = vadd.f32 %v516_v48, %v515_v44 }
  0xfa   : > { %v518_v55 = vrot.slane %v517_v52, 4  ;;  %v618_v56 = vadd.f32 %v617_v53, %v616_v49 }
  0xfc   : > { %v519_v58 = vadd.f32 %v518_v55, %v517_v52  ;;  %v619_v59 = vrot.slane %v618_v56, 4 }
  0xfe   : > { %v520_v60 = vrot.slane %v519_v58, 2  ;;  %v620_v62 = vadd.f32 %v619_v59, %v618_v56 }
 0x100   : > { %v521_v63 = vadd.f32 %v520_v60, %v519_v58  ;;  %v621_v0 = vrot.slane %v620_v62, 2 }
 0x102   : > { %v522_v1 = vrot.slane %v521_v63, 1  ;;  %v622_v2 = vadd.f32 %v621_v0, %v620_v62 }
 0x104   : > { %v523_v6 = vadd.f32 %v522_v1, %v521_v63  ;;  %v623_v8 = vrot.slane %v622_v2, 1 }
 0x106   : > { %v4830_v9 = vmul.f32 0.00390625, %v523_v6  ;;  %v4833_v11 = vadd.f32 %v623_v8, %v622_v2 }
 0x108   : > { %v672_v10 = vsub.f32 %v451_v15, %v4830_v9  ;;  %v641_v14 = vsub.f32 %v4611_v18, %v4830_v9  ;;  %v642_v16 = vsub.f32 %v4615_v20, %v4830_v9  ;;  %v643_v36 = vsub.f32 %v4621_v23, %v4830_v9 }
 0x109   : > { %v644_v37 = vsub.f32 %v4625_v25, %v4830_v9  ;;  %v645_v15 = vsub.f32 %v4633_v29, %v4830_v9  ;;  %v646_v39 = vsub.f32 %v4639_v32, %v4830_v9  ;;  %v647_v40 = vsub.f32 %v4666_v50, %v4830_v9 }
 0x10a   : > { %v4835_v12 = vmax.f32 %v672_v10, 0.0  ;;  %v648_v18 = vsub.f32 %v4688_v7, %v4830_v9  ;;  %v649_v20 = vsub.f32 %v4613_v19, %v4830_v9  ;;  %v650_v23 = vsub.f32 %v4617_v21, %v4830_v9 }
 0x10b   : > { %v651_v25 = vsub.f32 %v4623_v24, %v4830_v9  ;;  %v652_v29 = vsub.f32 %v4629_v27, %v4830_v9  ;;  %v653_v32 = vsub.f32 %v4637_v31, %v4830_v9  ;;  %v654_v50 = vsub.f32 %v4668_v51, %v4830_v9 }
 0x10c   : > { %v655_v19 = vsub.f32 %v4696_v13, %v4830_v9  ;;  %v656_v21 = vsub.f32 %v4727_v61, %v4830_v9  ;;  %v657_v24 = vsub.f32 %v4619_v22, %v4830_v9  ;;  %v658_v27 = vsub.f32 %v4627_v26, %v4830_v9 }
 0x10d   : > { %v659_v31 = vsub.f32 %v4635_v30, %v4830_v9  ;;  %v4877_v51 = vmax.f32 %v643_v36, 0.0  ;;  %v660_v43 = vsub.f32 %v4651_v38, %v4830_v9  ;;  %v661_v13 = vsub.f32 %v4685_v3, %v4830_v9 }
 0x10e   : > { %v662_v61 = vsub.f32 %v4715_v47, %v4830_v9  ;;  %v4885_v44 = vmax.f32 %v644_v37, 0.0  ;;  %v663_v22 = vsub.f32 %v4746_v17, %v4830_v9  ;;  %v664_v26 = vsub.f32 %v4775_v5, %v4830_v9 }
 0x10f   : > { %v665_v30 = vsub.f32 %v4631_v28, %v4830_v9  ;;  %v1830_v38 = vpack.c.bf16 %v4877_v51, %v4877_v51  ;;  %v666_v3 = vsub.f32 %v4641_v33, %v4830_v9  ;;  %v667_v47 = vsub.f32 %v4675_v57, %v4830_v9 }
 0x110   : > { %v668_v45 = vsub.f32 %v4703_v35, %v4830_v9  ;;  %v1831_v17 = vpack.c.bf16 %v4885_v44, %v4885_v44  ;;  %v669_v5 = vsub.f32 %v4734_v4, %v4830_v9  ;;  %v670_v28 = vsub.f32 %v4763_v54, %v4830_v9 }
 0x111   : > { %v671_v46 = vsub.f32 %v4792_v42, %v4830_v9  ;;  %v1974_v48 = vunpack.c.l.b16 %v1830_v38  ;;  %v4909_v49 = vmax.f32 %v641_v14, 0.0  ;;  %v4911_v57 = vmax.f32 %v642_v16, 0.0 }
 0x112   : > { %v1975_v33 = vunpack.c.l.b16 %v1831_v17  ;;  %v4913_v52 = vmax.f32 %v645_v15, 0.0  ;;  %v4915_v35 = vmax.f32 %v646_v39, 0.0  ;;  %v4917_v53 = vmax.f32 %v647_v40, 0.0 }
 0x113   : > { %v4919_v55 = vmax.f32 %v648_v18, 0.0  ;;  %v4921_v4 = vmax.f32 %v649_v20, 0.0  ;;  %v4923_v56 = vmax.f32 %v650_v23, 0.0  ;;  %v4925_v42 = vmax.f32 %v651_v25, 0.0 }
 0x114   : > { %v2005_v54 = vpack.c.b16 %v1975_v33, %v1974_v48  ;;  %v4927_v58 = vmax.f32 %v652_v29, 0.0  ;;  %v4929_v59 = vmax.f32 %v653_v32, 0.0  ;;  %v4931_v60 = vmax.f32 %v654_v50, 0.0 }
 0x115   : > { %v4933_v62 = vmax.f32 %v655_v19, 0.0  ;;  %v4935_v63 = vmax.f32 %v656_v21, 0.0  ;;  %v4938_v0 = vmax.f32 %v657_v24, 0.0  ;;  %v4940_v1 = vmax.f32 %v658_v27, 0.0 }
 0x116   : > { %2022 = vrot.lane.b32.xlu2 %v2005_v54, %s4528_s23  ;;  %v4942_v2 = vmax.f32 %v659_v31, 0.0  ;;  %v4944_v6 = vmax.f32 %v660_v43, 0.0  ;;  %v4946_v8 = vmax.f32 %v661_v13, 0.0  ;;  %v4948_v10 = vmax.f32 %v662_v61, 0.0 }
 0x117   : > { %v4950_v14 = vmax.f32 %v663_v22, 0.0  ;;  %v1828_v16 = vpack.c.bf16 %v4909_v49, %v4909_v49  ;;  %v4954_v36 = vmax.f32 %v664_v26, 0.0  ;;  %v4956_v37 = vmax.f32 %v665_v30, 0.0 }
 0x118   : > { %v4958_v15 = vmax.f32 %v666_v3, 0.0  ;;  %v1829_v39 = vpack.c.bf16 %v4911_v57, %v4911_v57  ;;  %v4962_v40 = vmax.f32 %v667_v47, 0.0  ;;  %v4964_v18 = vmax.f32 %v668_v45, 0.0 }
 0x119   : > { %v4966_v20 = vmax.f32 %v669_v5, 0.0  ;;  %v1972_v23 = vunpack.c.l.b16 %v1828_v16  ;;  %v4968_v25 = vmax.f32 %v670_v28, 0.0  ;;  %v4970_v29 = vmax.f32 %v671_v46, 0.0 }
 0x11a   : > { %6935 = vst [vmem:[#allocation3_spill] sm:$0xff] %v4964_v18  ;;  %v1973_v50 = vunpack.c.l.b16 %v1829_v39  ;;  %v1605_v21 = vrot.slane %v4877_v51, 1  ;;  %v1606_v24 = vrot.slane %v4885_v44, 1  ;;  %v1604_v3 = vrot.slane %v4911_v57, 1 }
 0x11b   : > { %v1607_v5 = vrot.slane %v4913_v52, 1  ;;  %v1608_v28 = vrot.slane %v4915_v35, 1  ;;  %v6926_v13 = vrot.slane %v4917_v53, 1  ;;  %v5025_v32 = vshrl.u32 %v705_v34, 7 }
 0x11c   : > { %v2004_v31 = vpack.c.b16 %v1973_v50, %v1972_v23  ;;  %v1613_v23 = vrot.slane %v4925_v42, 1  ;;  %v1834_v19 = vpack.c.bf16 %v4917_v53, %v4917_v53  ;;  %v1835_v17 = vpack.c.bf16 %v4919_v55, %v4919_v55 }
 0x11d   : > { %v709_v38 = vadd.s32 24, %v5025_v32  ;;  %v4529_v7 = vmov 1.0|1.0   ;;  %vm1635_vm3 = vcmp.lt.s32.totalorder %v5025_v32, 7  ;;  %v707_v26 = vadd.s32 8, %v5025_v32 }
 0x11e   : > { %2020 = vrot.lane.b32.xlu1 %v2004_v31, %s4528_s23  ;;  %v6925_v31 = vrot.slane %v4909_v49, 1  ;;  %v5032_v27 = vunpack.c.l.bf16 %v4529_v7  ;;  %v1663_v43 = vsel %vm1635_vm3, %v1606_v24, %v1607_v5  ;;  %v1664_v34 = vsel %vm1635_vm3, %v1605_v21, %v1606_v24 }
 0x11f   : > { %v1665_v61 = vsel %vm1635_vm3, %v1604_v3, %v1605_v21  ;;  %v763_v7 = vand.u32 15, %v709_v38  ;;  %v1670_v41 = vpack.c.bf16 %v1664_v34, %v1664_v34  ;;  %v1671_v47 = vpack.c.bf16 %v1663_v43, %v1663_v43 }
 0x120   : > { %v1666_v22 = vsel %vm1635_vm3, %v6925_v31, %v1604_v3  ;;  %v749_v45 = vand.u32 15, %v707_v26  ;;  %v1669_v46 = vpack.c.bf16 %v1665_v61, %v1665_v61  ;;  %v5046_v48 = vunpack.c.l.b16 %v1834_v19 }
 0x121   : > { %v1668_v54 = vpack.c.bf16 %v1666_v22, %v1666_v22  ;;  %v626_v33 = vmul.f32 0.00390625, %v4833_v11  ;;  %vm1253_vm4 = vcmp.lt.s32.totalorder %v763_v7, 15  ;;  %v1702_v24 = vunpack.c.l.bf16 %v1670_v41 }
 0x122   : > { %v1703_v50 = vunpack.c.l.bf16 %v1671_v47  ;;  %vm1251_vm5 = vcmp.lt.s32.totalorder %v749_v45, 15  ;;  %v6931_v21 = vmov 0.0   ;;  %v1701_v38 = vunpack.c.l.bf16 %v1669_v46 }
 0x123   : > { %v4118_v30 = vsel %vm1253_vm4, 1.0, %v6931_v21  ;;  %v4117_v16 = vsel %vm1251_vm5, 1.0, %v6931_v21  ;;  %v1700_v3 = vunpack.c.l.bf16 %v1668_v54  ;;  %v1766_v43 = vmul.f32 %v1702_v24, %v5032_v27 }
 0x124   : > { %v1767_v26 = vmul.f32 %v4118_v30, %v1703_v50  ;;  %v5052_v22 = vunpack.c.l.b16 %v1835_v17  ;;  %v711_v19 = vadd.s32 40, %v5025_v32  ;;  %v1765_v61 = vmul.f32 %v4117_v16, %v1701_v38 }
 0x125   : > { %v1764_v11 = vmul.f32 %v1700_v3, %v5032_v27  ;;  %v1661_v41 = vsel %vm1635_vm3, %v1608_v28, %v6926_v13  ;;  %v1662_v47 = vsel %vm1635_vm3, %v1607_v5, %v1608_v28  ;;  %v1798_v45 = vpack.c.bf16 %v1766_v43, %v1766_v43 }
 0x126   : > { %v1799_v46 = vpack.c.bf16 %v1767_v26, %v1767_v26  ;;  %v777_v54 = vand.u32 15, %v711_v19  ;;  %v1672_v34 = vpack.c.bf16 %v1662_v47, %v1662_v47  ;;  %v1797_v17 = vpack.c.bf16 %v1765_v61, %v1765_v61 }
 0x127   : > { %v1796_v30 = vpack.c.bf16 %v1764_v11, %v1764_v11  ;;  %v1673_v50 = vpack.c.bf16 %v1661_v41, %v1661_v41  ;;  %v627_v7 = vmul.f32 %v4830_v9, %v4830_v9  ;;  %v2086_v24 = vunpack.c.l.b16 %v1798_v45 }
 0x128   : > { %v2087_v16 = vunpack.c.l.b16 %v1799_v46  ;;  %vm1255_vm6 = vcmp.lt.s32.totalorder %v777_v54, 15  ;;  %v1704_v3 = vunpack.c.l.bf16 %v1672_v34  ;;  %v2085_v31 = vunpack.c.l.b16 %v1797_v17 }
 0x129   : > { %v2084_v38 = vunpack.c.l.b16 %v1796_v30  ;;  %v4119_v13 = vsel %vm1255_vm6, 1.0, %v6931_v21  ;;  %v1705_v39 = vunpack.c.l.bf16 %v1673_v50  ;;  %v628_v43 = vsub.f32 %v626_v33, %v627_v7 }
 0x12a   : > { %v2117_v5 = vpack.c.b16 %v2087_v16, %v2086_v24  ;;  %v1768_v28 = vmul.f32 %v1704_v3, %v5032_v27  ;;  %v715_v26 = vadd.s32 72, %v5025_v32  ;;  %v6936_v9 = vrot.slane %v4923_v56, 1 }
 0x12b   : > { %v2116_v19 = vpack.c.b16 %v2085_v31, %v2084_v38  ;;  %v1769_v11 = vmul.f32 %v4119_v13, %v1705_v39  ;;  %v6938_v47 = vrot.slane %v4921_v4, 1  ;;  %v629_v31 = vmax.f32 %v628_v43, 0.0 }
 0x12c   : > { %v1657_v61 = vsel %vm1635_vm3, %v6936_v9, %v1613_v23  ;;  %v6937_v41 = vmov %v6936_v9  ;;  %2134 = vrot.lane.b32.xlu2 %v2117_v5, %s4531_s24  ;;  %v1800_v33 = vpack.c.bf16 %v1768_v28, %v1768_v28  ;;  %v805_v13 = vand.u32 15, %v715_v26 }
 0x12d   : > { %v1658_v45 = vsel %vm1635_vm3, %v6938_v47, %v6937_v41  ;;  %2132 = vrot.lane.b32.xlu1 %v2116_v19, %s4531_s24  ;;  %v1801_v46 = vpack.c.bf16 %v1769_v11, %v1769_v11  ;;  %v1677_v54 = vpack.c.bf16 %v1657_v61, %v1657_v61  ;;  %v1836_v34 = vpack.c.bf16 %v4921_v4, %v4921_v4 }
 0x12e   : > { %v1676_v39 = vpack.c.bf16 %v1658_v45, %v1658_v45  ;;  %v1837_v30 = vpack.c.bf16 %v4923_v56, %v4923_v56  ;;  %v2088_v17 = vunpack.c.l.b16 %v1800_v33  ;;  %v5085_v50 = vadd.f32 1e-05, %v629_v31 }
 0x12f   : > { %vm1259_vm7 = vcmp.lt.s32.totalorder %v805_v13, 15  ;;  %v2089_v16 = vunpack.c.l.b16 %v1801_v46  ;;  %v1709_v38 = vunpack.c.l.bf16 %v1677_v54  ;;  %v2007_v5 = vpack.c.b16 %v5052_v22, %v5046_v48 }
 0x130   : > { %v1708_v7 = vunpack.c.l.bf16 %v1676_v39  ;;  %v4121_v3 = vsel %vm1259_vm7, 1.0, %v6931_v21  ;;  %4514 = vrsqrt.f32 %v5085_v50  ;;  %v1980_v43 = vunpack.c.l.b16 %v1836_v34 }
 0x131   : > { %v1773_v26 = vmul.f32 %v4121_v3, %v1709_v38  ;;  %v1981_v19 = vunpack.c.l.b16 %v1837_v30  ;;  %v1840_v11 = vpack.c.bf16 %v4929_v59, %v4929_v59  ;;  %v1841_v9 = vpack.c.bf16 %v4931_v60, %v4931_v60 }
 0x132   : > { %v1772_v28 = vmul.f32 %v1708_v7, %v5032_v27  ;;  %v2118_v61 = vpack.c.b16 %v2089_v16, %v2088_v17  ;;  %v717_v47 = vadd.s32 88, %v5025_v32  ;;  %v6939_v45 = vrot.slane %v4929_v59, 1 }
 0x133   : > { %v6940_v48 = vrot.slane %v4927_v58, 1  ;;  %v1805_v33 = vpack.c.bf16 %v1773_v26, %v1773_v26  ;;  %v5104_v31 = vunpack.c.l.b16 %v1840_v11  ;;  %v5106_v13 = vunpack.c.l.b16 %v1841_v9 }
 0x134   : > { %v1804_v41 = vpack.c.bf16 %v1772_v28, %v1772_v28  ;;  %2026 = vrot.lane.b32.xlu2 %v2007_v5, %s4528_s23  ;;  %v819_v34 = vand.u32 15, %v717_v47  ;;  %v2008_v38 = vpack.c.b16 %v1981_v19, %v1980_v43  ;;  %vm637_vm9 = vweird.f32 %v5085_v50 }
 0x135   : > { %v1655_v22 = vsel %vm1635_vm3, %v6940_v48, %v6939_v45  ;;  %v6941_v39 = vmov %v6940_v48  ;;  %2136 = vrot.lane.b32.xlu1 %v2118_v61, %s4531_s24  ;;  %v2093_v3 = vunpack.c.l.b16 %v1805_v33  ;;  %v2010_v5 = vpack.c.b16 %v5106_v13, %v5104_v31 }
 0x136   : > { %v1656_v46 = vsel %vm1635_vm3, %v1613_v23, %v6941_v39  ;;  %v1679_v17 = vpack.c.bf16 %v1655_v22, %v1655_v22  ;;  %v2092_v16 = vunpack.c.l.b16 %v1804_v41  ;;  %v4515_v28 = vpop.eup %4514  ;;  %vm1261_vm8 = vcmp.lt.s32.totalorder %v819_v34, 15 }
 0x137   : > { %v1678_v30 = vpack.c.bf16 %v1656_v46, %v1656_v46  ;;  %v721_v23 = vadd.s32 120, %v5025_v32  ;;  %v632_v9 = vmul.f32 %v4515_v28, %v5085_v50  ;;  %v4122_v47 = vsel %vm1261_vm8, 1.0, %v6931_v21 }
 0x138   : > { %v1711_v11 = vunpack.c.l.bf16 %v1679_v17  ;;  %v1832_v61 = vpack.c.bf16 %v4913_v52, %v4913_v52  ;;  %vm638_vm10 = vweird.f32 %v4515_v28  ;;  %v1833_v41 = vpack.c.bf16 %v4915_v35, %v4915_v35 }
 0x139   : > { %v1710_v26 = vunpack.c.l.bf16 %v1678_v30  ;;  %v633_v45 = vmul.f32 %v4515_v28, %v632_v9  ;;  %v847_v48 = vand.u32 15, %v721_v23  ;;  %v6942_v22 = vrot.slane %v4938_v0, 1  ;;  %vm639_vm12 = vmor %vm637_vm9, %vm638_vm10 }
 0x13a   : > { %v1775_v19 = vmul.f32 %v4122_v47, %v1711_v11  ;;  %v6943_v33 = vrot.slane %v4935_v63, 1  ;;  %v6945_v39 = vrot.slane %v4933_v62, 1  ;;  %v2120_v34 = vpack.c.b16 %v2093_v3, %v2092_v16 }
 0x13b   : > { %v1774_v43 = vmul.f32 %v1710_v26, %v5032_v27  ;;  %v634_v11 = vmul.f32 0.5, %v633_v45  ;;  %vm1265_vm11 = vcmp.lt.s32.totalorder %v847_v48, 15  ;;  %v1842_v9 = vpack.c.bf16 %v4933_v62, %v4933_v62 }
 0x13c   : > { %v1651_v31 = vsel %vm1635_vm3, %v6943_v33, %v6942_v22  ;;  %v6944_v13 = vmov %v6943_v33  ;;  %v1807_v17 = vpack.c.bf16 %v1775_v19, %v1775_v19  ;;  %2140 = vrot.lane.b32.xlu2 %v2120_v34, %s4531_s24  ;;  %v5144_v47 = vunpack.c.l.b16 %v1832_v61 }
 0x13d   : > { %v1652_v46 = vsel %vm1635_vm3, %v6945_v39, %v6944_v13  ;;  %v1806_v30 = vpack.c.bf16 %v1774_v43, %v1774_v43  ;;  %v1683_v23 = vpack.c.bf16 %v1651_v31, %v1651_v31  ;;  %v5146_v22 = vunpack.c.l.b16 %v1833_v41  ;;  %2028 = vrot.lane.b32.xlu1 %v2008_v38, %s4528_s23 }
 0x13e   : > { %v1682_v26 = vpack.c.bf16 %v1652_v46, %v1652_v46  ;;  %v4124_v33 = vsel %vm1265_vm11, 1.0, %v6931_v21  ;;  %v635_v13 = vsub.f32 1.5, %v634_v11  ;;  %v2095_v3 = vunpack.c.l.b16 %v1807_v17 }
 0x13f   : > { %v2094_v16 = vunpack.c.l.b16 %v1806_v30  ;;  %v1715_v43 = vunpack.c.l.bf16 %v1683_v23  ;;  %v1843_v45 = vpack.c.bf16 %v4935_v63, %v4935_v63  ;;  %v713_v48 = vadd.s32 56, %v5025_v32 }
 0x140   : > { %v1714_v54 = vunpack.c.l.bf16 %v1682_v26  ;;  %v6946_v61 = vrot.slane %v4921_v4, 1  ;;  %v6947_v41 = vrot.slane %v4919_v55, 1  ;;  %v636_v39 = vmul.f32 %v4515_v28, %v635_v13 }
 0x141   : > { %v1779_v46 = vmul.f32 %v4124_v33, %v1715_v43  ;;  %v1986_v38 = vunpack.c.l.b16 %v1842_v9  ;;  %v6949_v30 = vrot.slane %v4917_v53, 1  ;;  %v791_v26 = vand.u32 15, %v713_v48 }
 0x142   : > { %v1778_v19 = vmul.f32 %v1714_v54, %v5032_v27  ;;  %v1659_v31 = vsel %vm1635_vm3, %v6947_v41, %v6946_v61  ;;  %v6948_v34 = vmov %v6947_v41  ;;  %v640_v7 = vsel %vm639_vm12, %v4515_v28, %v636_v39 }
 0x143   : > { %v1660_v54 = vsel %vm1635_vm3, %v6949_v30, %v6948_v34  ;;  %v1675_v23 = vpack.c.bf16 %v1659_v31, %v1659_v31  ;;  %v2121_v61 = vpack.c.b16 %v2095_v3, %v2094_v16  ;;  %v1811_v13 = vpack.c.bf16 %v1779_v46, %v1779_v46 }
 0x144   : > { %v1810_v17 = vpack.c.bf16 %v1778_v19, %v1778_v19  ;;  %v1674_v11 = vpack.c.bf16 %v1660_v54, %v1660_v54  ;;  %v1846_v9 = vpack.c.bf16 %v4942_v2, %v4942_v2  ;;  %v5171_v33 = vpack.c.bf16 %v640_v7, %v640_v7  ;;  %2032 = vrot.lane.b32.xlu2 %v2010_v5, %s4528_s23 }
 0x145   : > { %v1987_v43 = vunpack.c.l.b16 %v1843_v45  ;;  %vm1257_vm13 = vcmp.lt.s32.totalorder %v791_v26, 15  ;;  %v1707_v50 = vunpack.c.l.bf16 %v1675_v23  ;;  %v1847_v19 = vpack.c.bf16 %v4944_v6, %v4944_v6  ;;  %2142 = vrot.lane.b32.xlu1 %v2121_v61, %s4531_s24 }
 0x146   : > { %6950 = vst [vmem:[#allocation4_spill] sm:$0xff] %v5171_v33  ;;  %v1706_v41 = vunpack.c.l.bf16 %v1674_v11  ;;  %v2098_v34 = vunpack.c.l.b16 %v1810_v17  ;;  %v4120_v30 = vsel %vm1257_vm13, 1.0, %v6931_v21  ;;  %v2396_v48 = vperm.slane %v5171_v33, 0 }
 0x147   : > { %v2099_v28 = vunpack.c.l.b16 %v1811_v13  ;;  %v723_v7 = vadd.s32 136, %v5025_v32  ;;  %v1771_v3 = vmul.f32 %v4120_v30, %v1707_v50  ;;  %v5181_v45 = vunpack.c.l.b16 %v1846_v9 }
 0x148   : > { %v1770_v16 = vmul.f32 %v1706_v41, %v5032_v27  ;;  %v1991_v31 = vunpack.c.l.b16 %v1847_v19  ;;  %v6951_v39 = vrot.slane %v4942_v2, 1  ;;  %v6952_v46 = vrot.slane %v4940_v1, 1  ;;  %2397 = vrot.lane.b32.xlu0 %v2396_v48, %s4528_s23 }
 0x149   : > { %v861_v17 = vand.u32 15, %v723_v7  ;;  %v6954_v11 = vrot.slane %v4938_v0, 1  ;;  %v2011_v9 = vpack.c.b16 %v1987_v43, %v1986_v38  ;;  %v1803_v41 = vpack.c.bf16 %v1771_v3, %v1771_v3 }
 0x14a   : > { %v1649_v54 = vsel %vm1635_vm3, %v6952_v46, %v6951_v39  ;;  %v1802_v5 = vpack.c.bf16 %v1770_v16, %v1770_v16  ;;  %v6953_v26 = vmov %v6952_v46  ;;  %v2123_v50 = vpack.c.b16 %v2099_v28, %v2098_v34 }
 0x14b   : > { %v1650_v23 = vsel %vm1635_vm3, %v6954_v11, %v6953_v26  ;;  %v1685_v61 = vpack.c.bf16 %v1649_v54, %v1649_v54  ;;  %vm1267_vm14 = vcmp.lt.s32.totalorder %v861_v17, 15  ;;  %v1838_v16 = vpack.c.bf16 %v4925_v42, %v4925_v42 }
 0x14c   : > { %v1684_v30 = vpack.c.bf16 %v1650_v23, %v1650_v23  ;;  %v2013_v7 = vpack.c.b16 %v1991_v31, %v5181_v45  ;;  %v4125_v39 = vsel %vm1267_vm14, 1.0, %v6931_v21  ;;  %v1839_v54 = vpack.c.bf16 %v4927_v58, %v4927_v58  ;;  %2146 = vrot.lane.b32.xlu2 %v2123_v50, %s4531_s24 }
 0x14d   : > { %v1717_v19 = vunpack.c.l.bf16 %v1685_v61  ;;  %v5204_v26 = vunpack.c.l.b16 %v1802_v5  ;;  %v727_v38 = vadd.s32 168, %v5025_v32  ;;  %v6955_v43 = vrot.slane %v4950_v14, 1  ;;  %2034 = vrot.lane.b32.xlu1 %v2011_v9, %s4528_s23 }
 0x14e   : > { %v1716_v46 = vunpack.c.l.bf16 %v1684_v30  ;;  %v6956_v34 = vrot.slane %v4948_v10, 1  ;;  %v5213_v3 = vunpack.c.l.b16 %v1803_v41  ;;  %v6958_v17 = vrot.slane %v4946_v8, 1 }
 0x14f   : > { %v1781_v11 = vmul.f32 %v4125_v39, %v1717_v19  ;;  %v5223_v30 = vunpack.c.l.b16 %v1838_v16  ;;  %v889_v19 = vand.u32 15, %v727_v38  ;;  %v719_v50 = vadd.s32 104, %v5025_v32 }
 0x150   : > { %v1645_v28 = vsel %vm1635_vm3, %v6956_v34, %v6955_v43  ;;  %v1780_v45 = vmul.f32 %v1716_v46, %v5032_v27  ;;  %v6957_v31 = vmov %v6956_v34  ;;  %v5226_v43 = vunpack.c.l.b16 %v1839_v54  ;;  %2399 = vrot.lane.b32.xlu0 %v2396_v48, %s4531_s24 }
 0x151   : > { %v1646_v5 = vsel %vm1635_vm3, %v6958_v17, %v6957_v31  ;;  %v1689_v23 = vpack.c.bf16 %v1645_v28, %v1645_v28  ;;  %v1813_v61 = vpack.c.bf16 %v1781_v11, %v1781_v11  ;;  %v1848_v34 = vpack.c.bf16 %v4946_v8, %v4946_v8 }
 0x152   : > { %v1688_v39 = vpack.c.bf16 %v1646_v5, %v1646_v5  ;;  %v1812_v41 = vpack.c.bf16 %v1780_v45, %v1780_v45  ;;  %vm1271_vm15 = vcmp.lt.s32.totalorder %v889_v19, 15  ;;  %v1849_v54 = vpack.c.bf16 %v4948_v10, %v4948_v10 }
 0x153   : > { %v1721_v46 = vunpack.c.l.bf16 %v1689_v23  ;;  %v2101_v31 = vunpack.c.l.b16 %v1813_v61  ;;  %v4127_v9 = vsel %vm1271_vm15, 1.0, %v6931_v21  ;;  %v833_v17 = vand.u32 15, %v719_v50 }
 0x154   : > { %v1720_v28 = vunpack.c.l.bf16 %v1688_v39  ;;  %v2100_v11 = vunpack.c.l.b16 %v1812_v41  ;;  %v6959_v48 = vrot.slane %v4933_v62, 1  ;;  %v6960_v5 = vrot.slane %v4931_v60, 1  ;;  %2038 = vrot.lane.b32.xlu2 %v2013_v7, %s4528_s23 }
 0x155   : > { %v1785_v45 = vmul.f32 %v4127_v9, %v1721_v46  ;;  %v1992_v19 = vunpack.c.l.b16 %v1848_v34  ;;  %v6962_v41 = vrot.slane %v4929_v59, 1  ;;  %vm1263_vm0 = vcmp.lt.s32.totalorder %v833_v17, 15 }
 0x156   : > { %v1784_v38 = vmul.f32 %v1720_v28, %v5032_v27  ;;  %v1653_v23 = vsel %vm1635_vm3, %v6960_v5, %v6959_v48  ;;  %v2124_v61 = vpack.c.b16 %v2101_v31, %v2100_v11  ;;  %v6961_v39 = vmov %v6960_v5 }
 0x157   : > { %v1654_v16 = vsel %vm1635_vm3, %v6962_v41, %v6961_v39  ;;  %v1681_v24 = vpack.c.bf16 %v1653_v23, %v1653_v23  ;;  %v1817_v46 = vpack.c.bf16 %v1785_v45, %v1785_v45  ;;  %v4123_v9 = vsel %vm1263_vm0, 1.0, %v6931_v21 }
 0x158   : > { %v1816_v28 = vpack.c.bf16 %v1784_v38, %v1784_v38  ;;  %v1680_v50 = vpack.c.bf16 %v1654_v16, %v1654_v16  ;;  %v1852_v48 = vpack.c.bf16 %v4956_v37, %v4956_v37  ;;  %v1853_v34 = vpack.c.bf16 %v4958_v15, %v4958_v15  ;;  %2148 = vrot.lane.b32.xlu1 %v2124_v61, %s4531_s24 }
 0x159   : > { %v1713_v13 = vunpack.c.l.bf16 %v1681_v24  ;;  %v1993_v11 = vunpack.c.l.b16 %v1849_v54  ;;  %v729_v23 = vadd.s32 184, %v5025_v32  ;;  %v2105_v38 = vunpack.c.l.b16 %v1817_v46 }
 0x15a   : > { %v2104_v31 = vunpack.c.l.b16 %v1816_v28  ;;  %v1712_v5 = vunpack.c.l.bf16 %v1680_v50  ;;  %v1996_v45 = vunpack.c.l.b16 %v1852_v48  ;;  %v6963_v24 = vrot.slane %v4956_v37, 1 }
 0x15b   : > { %v1777_v16 = vmul.f32 %v4123_v9, %v1713_v13  ;;  %v6964_v17 = vrot.slane %v4954_v36, 1  ;;  %v6965_v7 = vpack.c.b16 %v5146_v22, %v5144_v47  ;;  %v1997_v41 = vunpack.c.l.b16 %v1853_v34 }
 0x15c   : > { %v1776_v54 = vmul.f32 %v1712_v5, %v5032_v27  ;;  %v903_v28 = vand.u32 15, %v729_v23  ;;  %v6967_v13 = vrot.slane %v4950_v14, 1  ;;  %v2009_v50 = vpack.c.b16 %v5226_v43, %v5223_v30 }
 0x15d   : > { %v1643_v39 = vsel %vm1635_vm3, %v6964_v17, %v6963_v24  ;;  %2024 = vrot.lane.b32.xlu0 %v6965_v7, %s4528_s23  ;;  %v6966_v61 = vmov %v6964_v17  ;;  %v1809_v9 = vpack.c.bf16 %v1777_v16, %v1777_v16  ;;  %v2014_v17 = vpack.c.b16 %v1993_v11, %v1992_v19 }
 0x15e   : > { %v1644_v46 = vsel %vm1635_vm3, %v6967_v13, %v6966_v61  ;;  %v1691_v24 = vpack.c.bf16 %v1643_v39, %v1643_v39  ;;  %v1808_v47 = vpack.c.bf16 %v1776_v54, %v1776_v54  ;;  %vm1273_vm4 = vcmp.lt.s32.totalorder %v903_v28, 15 }
 0x15f   : > { %v1690_v48 = vpack.c.bf16 %v1644_v46, %v1644_v46  ;;  %v1844_v22 = vpack.c.bf16 %v4938_v0, %v4938_v0  ;;  %v2126_v34 = vpack.c.b16 %v2105_v38, %v2104_v31  ;;  %v4128_v5 = vsel %vm1273_vm4, 1.0, %v6931_v21 }
 0x160   : > { %v1723_v7 = vunpack.c.l.bf16 %v1691_v24  ;;  %v5280_v33 = vunpack.c.l.b16 %v1809_v9  ;;  %v2016_v61 = vpack.c.b16 %v1997_v41, %v1996_v45  ;;  %v1845_v13 = vpack.c.bf16 %v4940_v1, %v4940_v1  ;;  %2040 = vrot.lane.b32.xlu1 %v2014_v17, %s4528_s23 }
 0x161   : > { %v1722_v23 = vunpack.c.l.bf16 %v1690_v48  ;;  %v733_v16 = vadd.s32 216, %v5025_v32  ;;  %v6968_v39 = vrot.slane %v4966_v20, 1  ;;  %v6969_v54 = vrot.slane %v4964_v18, 1  ;;  %2152 = vrot.lane.b32.xlu2 %v2126_v34, %s4531_s24 }
 0x162   : > { %v1787_v11 = vmul.f32 %v4128_v5, %v1723_v7  ;;  %v6971_v28 = vrot.slane %v4962_v40, 1  ;;  %v5299_v41 = vunpack.c.l.b16 %v1808_v47  ;;  %v5301_v46 = vunpack.c.l.b16 %v1844_v22 }
 0x163   : > { %v1786_v19 = vmul.f32 %v1722_v23, %v5032_v27  ;;  %v1639_v31 = vsel %vm1635_vm3, %v6969_v54, %v6968_v39  ;;  %v6970_v38 = vmov %v6969_v54  ;;  %v931_v9 = vand.u32 15, %v733_v16 }
 0x164   : > { %v1640_v45 = vsel %vm1635_vm3, %v6971_v28, %v6970_v38  ;;  %v1819_v5 = vpack.c.bf16 %v1787_v11, %v1787_v11  ;;  %v1695_v23 = vpack.c.bf16 %v1639_v31, %v1639_v31  ;;  %v1854_v7 = vpack.c.bf16 %v4962_v40, %v4962_v40 }
 0x165   : > { %v1694_v48 = vpack.c.bf16 %v1640_v45, %v1640_v45  ;;  %v1818_v24 = vpack.c.bf16 %v1786_v19, %v1786_v19  ;;  %v6972_v39 = vpack.c.b16 %v5213_v3, %v5204_v26  ;;  %vm1277_vm5 = vcmp.lt.s32.totalorder %v931_v9, 15 }
 0x166   : > { %v1855_v22 = vpack.c.bf16 %v4964_v18, %v4964_v18  ;;  %v725_v34 = vadd.s32 152, %v5025_v32  ;;  %v2107_v17 = vunpack.c.l.b16 %v1819_v5  ;;  %v4130_v19 = vsel %vm1277_vm5, 1.0, %v6931_v21 }
 0x167   : > { %2138 = vrot.lane.b32.xlu0 %v6972_v39, %s4531_s24  ;;  %v1726_v47 = vunpack.c.l.bf16 %v1694_v48  ;;  %v2106_v16 = vunpack.c.l.b16 %v1818_v24  ;;  %v1727_v11 = vunpack.c.l.bf16 %v1695_v23  ;;  %v5314_v54 = vunpack.c.l.b16 %v1845_v13 }
 0x168   : > { %v1998_v38 = vunpack.c.l.b16 %v1854_v7  ;;  %v875_v28 = vand.u32 15, %v725_v34  ;;  %v1999_v3 = vunpack.c.l.b16 %v1855_v22  ;;  %v6973_v45 = vrot.slane %v4946_v8, 1 }
 0x169   : > { %v1790_v31 = vmul.f32 %v1726_v47, %v5032_v27  ;;  %v1791_v26 = vmul.f32 %v4130_v19, %v1727_v11  ;;  %v6974_v9 = vrot.slane %v4944_v6, 1  ;;  %v6976_v5 = vrot.slane %v4942_v2, 1  ;;  %2044 = vrot.lane.b32.xlu2 %v2016_v61, %s4528_s23 }
 0x16a   : > { %v2127_v23 = vpack.c.b16 %v2107_v17, %v2106_v16  ;;  %vm1269_vm6 = vcmp.lt.s32.totalorder %v875_v28, 15  ;;  %v1858_v19 = vpack.c.bf16 %v4970_v29, %v4970_v29  ;;  %v6977_v28 = vrot.slane %v4970_v29, 1 }
 0x16b   : > { %v1647_v48 = vsel %vm1635_vm3, %v6974_v9, %v6973_v45  ;;  %v6975_v24 = vmov %v6974_v9  ;;  %v1822_v39 = vpack.c.bf16 %v1790_v31, %v1790_v31  ;;  %v1823_v47 = vpack.c.bf16 %v1791_v26, %v1791_v26 }
 0x16c   : > { %v1648_v13 = vsel %vm1635_vm3, %v6976_v5, %v6975_v24  ;;  %v4126_v22 = vsel %vm1269_vm6, 1.0, %v6931_v21  ;;  %v1687_v34 = vpack.c.bf16 %v1647_v48, %v1647_v48  ;;  %v1859_v9 = vpack.c.bf16 %v4835_v12, %v4835_v12  ;;  %2154 = vrot.lane.b32.xlu1 %v2127_v23, %s4531_s24 }
 0x16d   : > { %v1686_v7 = vpack.c.bf16 %v1648_v13, %v1648_v13  ;;  %v2110_v11 = vunpack.c.l.b16 %v1822_v39  ;;  %v735_v24 = vadd.s32 232, %v5025_v32  ;;  %v2111_v16 = vunpack.c.l.b16 %v1823_v47 }
 0x16e   : > { %v1719_v17 = vunpack.c.l.bf16 %v1687_v34  ;;  %v2002_v31 = vunpack.c.l.b16 %v1858_v19  ;;  %v6978_v26 = vrot.slane %v4968_v25, 1  ;;  %v2003_v5 = vunpack.c.l.b16 %v1859_v9 }
 0x16f   : > { %v1718_v45 = vunpack.c.l.bf16 %v1686_v7  ;;  %2030 = vrot.lane.b32.xlu0 %v2009_v50, %s4528_s23  ;;  %v945_v13 = vand.u32 15, %v735_v24  ;;  %v6980_v39 = vrot.slane %v4966_v20, 1  ;;  %v1628_v47 = vrot.slane %v4958_v15, 1 }
 0x170   : > { %v1637_v48 = vsel %vm1635_vm3, %v6978_v26, %v6977_v28  ;;  %v6979_v23 = vmov %v6978_v26  ;;  %v1783_v34 = vmul.f32 %v4126_v22, %v1719_v17  ;;  %v2122_v30 = vpack.c.b16 %v5280_v33, %v5299_v41 }
 0x171   : > { %v1782_v61 = vmul.f32 %v1718_v45, %v5032_v27  ;;  %v1638_v7 = vsel %vm1635_vm3, %v6980_v39, %v6979_v23  ;;  %v1697_v28 = vpack.c.bf16 %v1637_v48, %v1637_v48  ;;  %v2012_v43 = vpack.c.b16 %v5314_v54, %v5301_v46 }
 0x172   : > { %v1696_v19 = vpack.c.bf16 %v1638_v7, %v1638_v7  ;;  %vm1279_vm7 = vcmp.lt.s32.totalorder %v945_v13, 15  ;;  %v2017_v45 = vpack.c.b16 %v1999_v3, %v1998_v38  ;;  %v2129_v18 = vpack.c.b16 %v2111_v16, %v2110_v11 }
 0x173   : > { %v1814_v50 = vpack.c.bf16 %v1782_v61, %v1782_v61  ;;  %v4131_v9 = vsel %vm1279_vm7, 1.0, %v6931_v21  ;;  %v1729_v26 = vunpack.c.l.bf16 %v1697_v28  ;;  %v2019_v23 = vpack.c.b16 %v2003_v5, %v2002_v31 }
 0x174   : > { %v1728_v24 = vunpack.c.l.bf16 %v1696_v19  ;;  %v1850_v22 = vpack.c.bf16 %v4950_v14, %v4950_v14  ;;  %v708_v17 = vadd.s32 16, %v5025_v32  ;;  %v1815_v48 = vpack.c.bf16 %v1783_v34, %v1783_v34  ;;  %2158 = vrot.lane.b32.xlu2 %v2129_v18, %s4531_s24  ;;  %2046 = vrot.lane.b32.xlu1 %v2017_v45, %s4528_s23 }
 0x175   : > { %v1793_v41 = vmul.f32 %v4131_v9, %v1729_v26  ;;  %vm1410_vm8 = vcmp.lt.s32.totalorder %v5025_v32, 1  ;;  %v5366_v46 = vunpack.c.l.b16 %v1814_v50  ;;  %v6981_v38 = vrot.slane %v4885_v44, 7 }
 0x176   : > { %v1792_v33 = vmul.f32 %v1728_v24, %v5032_v27  ;;  %v756_v54 = vand.u32 15, %v708_v17  ;;  %v6982_v3 = vrot.slane %v4877_v51, 7  ;;  %v6984_v31 = vrot.slane %v4911_v57, 7 }
 0x177   : > { %v1825_v5 = vpack.c.bf16 %v1793_v41, %v1793_v41  ;;  %v1851_v13 = vpack.c.bf16 %v4954_v36, %v4954_v36  ;;  %2144 = vrot.lane.b32.xlu0 %v2122_v30, %s4531_s24  ;;  %v5384_v7 = vunpack.c.l.b16 %v1850_v22  ;;  %v731_v51 = vadd.s32 200, %v5025_v32 }
 0x178   : > { %v1439_v11 = vsel %vm1410_vm8, %v6982_v3, %v6981_v38  ;;  %v6983_v16 = vmov %v6982_v3  ;;  %v1824_v18 = vpack.c.bf16 %v1792_v33, %v1792_v33  ;;  %vm1124_vm9 = vcmp.gt.s32.totalorder %v756_v54, 0 }
 0x179   : > { %v1440_v61 = vsel %vm1410_vm8, %v6984_v31, %v6983_v16  ;;  %v1446_v34 = vpack.c.bf16 %v1439_v11, %v1439_v11  ;;  %v2113_v28 = vunpack.c.l.b16 %v1825_v5  ;;  %v4102_v50 = vsel %vm1124_vm9, 1.0, %v6931_v21 }
 0x17a   : > { %v1445_v39 = vpack.c.bf16 %v1440_v61, %v1440_v61  ;;  %v2112_v19 = vunpack.c.l.b16 %v1824_v18  ;;  %v917_v24 = vand.u32 15, %v731_v51  ;;  %v6985_v26 = vrot.slane %v4962_v40, 1 }
 0x17b   : > { %v1478_v45 = vunpack.c.l.bf16 %v1446_v34  ;;  %v6986_v30 = vrot.slane %v4956_v37, 1  ;;  %v2103_v33 = vunpack.c.l.b16 %v1815_v48  ;;  %v5396_v11 = vunpack.c.l.b16 %v1851_v13 }
 0x17c   : > { %v1477_v9 = vunpack.c.l.bf16 %v1445_v39  ;;  %v1641_v17 = vsel %vm1635_vm3, %v1628_v47, %v6985_v26  ;;  %v2130_v3 = vpack.c.b16 %v2113_v28, %v2112_v19  ;;  %vm1275_vm10 = vcmp.lt.s32.totalorder %v917_v24, 15  ;;  %2050 = vrot.lane.b32.xlu2 %v2019_v23, %s4528_s23 }
 0x17d   : > { %v1642_v22 = vsel %vm1635_vm3, %v6986_v30, %v1628_v47  ;;  %v1693_v38 = vpack.c.bf16 %v1641_v17, %v1641_v17  ;;  %v1542_v16 = vmul.f32 %v5032_v27, %v1478_v45  ;;  %v4129_v61 = vsel %vm1275_vm10, 1.0, %v6931_v21 }
 0x17e   : > { %v1541_v41 = vmul.f32 %v4102_v50, %v1477_v9  ;;  %v1692_v54 = vpack.c.bf16 %v1642_v22, %v1642_v22  ;;  %v1856_v47 = vpack.c.bf16 %v4966_v20, %v4966_v20  ;;  %v1857_v48 = vpack.c.bf16 %v4968_v25, %v4968_v25  ;;  %2160 = vrot.lane.b32.xlu1 %v2130_v3, %s4531_s24 }
 0x17f   : > { %v1725_v5 = vunpack.c.l.bf16 %v1693_v38  ;;  %v1574_v39 = vpack.c.bf16 %v1542_v16, %v1542_v16  ;;  %v712_v13 = vadd.s32 48, %v5025_v32  ;;  %v6987_v28 = vrot.slane %v4919_v55, 7  ;;  %2036 = vrot.lane.b32.xlu0 %v2012_v43, %s4528_s23 }
 0x180   : > { %v1573_v31 = vpack.c.bf16 %v1541_v41, %v1541_v41  ;;  %v1724_v18 = vunpack.c.l.bf16 %v1692_v54  ;;  %v6988_v50 = vrot.slane %v4917_v53, 7  ;;  %v5415_v45 = vunpack.c.l.b16 %v1856_v47 }
 0x181   : > { %v1789_v19 = vmul.f32 %v4129_v61, %v1725_v5  ;;  %v1895_v9 = vunpack.c.l.b16 %v1574_v39  ;;  %v5417_v24 = vunpack.c.l.b16 %v1857_v48  ;;  %v784_v26 = vand.u32 15, %v712_v13 }
 0x182   : > { %v1894_v34 = vunpack.c.l.b16 %v1573_v31  ;;  %v1788_v51 = vmul.f32 %v1724_v18, %v5032_v27  ;;  %v1435_v23 = vsel %vm1410_vm8, %v6988_v50, %v6987_v28  ;;  %v6989_v22 = vmov %v6988_v50  ;;  %v2023_v28 = vpop.permute.xlu2 %2022 }
 0x183   : > { %v1821_v30 = vpack.c.bf16 %v1789_v19, %v1789_v19  ;;  %v6990_v41 = vrot.slane %v4915_v35, 7  ;;  %v1450_v38 = vpack.c.bf16 %v1435_v23, %v1435_v23  ;;  %v2125_v3 = vpack.c.b16 %v2103_v33, %v5366_v46 }
 0x184   : > { %v1820_v17 = vpack.c.bf16 %v1788_v51, %v1788_v51  ;;  %v1925_v16 = vpack.c.b16 %v1895_v9, %v1894_v34  ;;  %vm1128_vm11 = vcmp.gt.s32.totalorder %v784_v26, 0  ;;  %v2015_v31 = vpack.c.b16 %v5396_v11, %v5384_v7 }
 0x185   : > { %v1436_v54 = vsel %vm1410_vm8, %v6990_v41, %v6989_v22  ;;  %v2018_v61 = vpack.c.b16 %v5417_v24, %v5415_v45  ;;  %v4104_v18 = vsel %vm1128_vm11, 1.0, %v6931_v21  ;;  %v1482_v53 = vunpack.c.l.bf16 %v1450_v38 }
 0x186   : > { %v1449_v43 = vpack.c.bf16 %v1436_v54, %v1436_v54  ;;  %v5431_v5 = vunpack.c.l.b16 %v1820_v17  ;;  %v737_v47 = vadd.s32 248, %v5025_v32  ;;  %v6991_v48 = vrot.slane %v4835_v12, 1 }
 0x187   : > { %v6992_v46 = vrot.slane %v4970_v29, 1  ;;  %v5440_v13 = vunpack.c.l.b16 %v1821_v30  ;;  %v1546_v7 = vmul.f32 %v5032_v27, %v1482_v53  ;;  %v6993_v11 = vrot.slane %v4909_v49, 1  ;;  %2150 = vrot.lane.b32.xlu0 %v2125_v3, %s4531_s24 }
 0x188   : > { %v1481_v39 = vunpack.c.l.bf16 %v1449_v43  ;;  %v6994_v34 = vmov %v6991_v48  ;;  %vm2212_vm12 = vcmask 523264   ;;  %v959_v23 = vand.u32 15, %v737_v47 }
 0x189   : > { %v1636_v33 = vsel %vm1635_vm3, %v6992_v46, %v6991_v48  ;;  %v1667_v51 = vsel %vm1635_vm3, %v6994_v34, %v6993_v11  ;;  %v742_v26 = vand.u32 15, %v5025_v32  ;;  %v1578_v17 = vpack.c.bf16 %v1546_v7, %v1546_v7 }
 0x18a   : > { %v1698_v19 = vpack.c.bf16 %v1636_v33, %v1636_v33  ;;  %v1545_v50 = vmul.f32 %v4104_v18, %v1481_v39  ;;  %v1699_v9 = vpack.c.bf16 %v1667_v51, %v1667_v51  ;;  %v6995_v22 = vrot.slane %v4911_v57, 7 }
 0x18b   : > { %v6996_v41 = vrot.slane %v4909_v49, 7  ;;  %v6998_v43 = vrot.slane %v4835_v12, 7  ;;  %vm1281_vm3 = vcmp.lt.s32.totalorder %v959_v23, 15  ;;  %vm1122_vm13 = vcmp.gt.s32.totalorder %v742_v26, 0 }
 0x18c   : > { %v1730_v30 = vunpack.c.l.bf16 %v1698_v19  ;;  %v1577_v53 = vpack.c.bf16 %v1545_v50, %v1545_v50  ;;  %v1731_v39 = vunpack.c.l.bf16 %v1699_v9  ;;  %v2169_v57 = vsel %vm454_vm2, %v1925_v16, %v2023_v28 }
 0x18d   : > { %v1441_v54 = vsel %vm1410_vm8, %v6996_v41, %v6995_v22  ;;  %v6997_v38 = vmov %v6996_v41  ;;  %v5464_v47 = vunpack.c.l.b16 %v1578_v17  ;;  %v4132_v48 = vsel %vm1281_vm3, 1.0, %v6931_v21 }
 0x18e   : > { %v1442_v18 = vsel %vm1410_vm8, %v6998_v43, %v6997_v38  ;;  %v1794_v46 = vmul.f32 %v1730_v30, %v5032_v27  ;;  %v5468_v49 = vunpack.c.l.b16 %v1577_v53  ;;  %v1795_v33 = vmul.f32 %v4132_v48, %v1731_v39 }
 0x18f   : > { %v1443_v7 = vpack.c.bf16 %v1442_v18, %v1442_v18  ;;  %v1444_v11 = vpack.c.bf16 %v1441_v54, %v1441_v54  ;;  %vm2357_vm14 = vcmask 781312   ;;  %v4101_v3 = vsel %vm1122_vm13, 1.0, %v6931_v21  ;;  %2042 = vrot.lane.b32.xlu0 %v2015_v31, %s4528_s23 }
 0x190   : > { %v718_v34 = vadd.s32 96, %v5025_v32  ;;  %v6999_v51 = vrot.slane %v4931_v60, 7  ;;  %v7000_v16 = vrot.slane %v4929_v59, 7  ;;  %v7002_v50 = vrot.slane %v4927_v58, 7 }
 0x191   : > { %v1826_v26 = vpack.c.bf16 %v1794_v46, %v1794_v46  ;;  %v1475_v17 = vunpack.c.l.bf16 %v1443_v7  ;;  %v1476_v30 = vunpack.c.l.bf16 %v1444_v11  ;;  %v2128_v22 = vpack.c.b16 %v5440_v13, %v5431_v5  ;;  %v2135_v5 = vpop.permute.xlu2 %2134 }
 0x192   : > { %v1429_v19 = vsel %vm1410_vm8, %v7000_v16, %v6999_v51  ;;  %v7001_v28 = vmov %v7000_v16  ;;  %v826_v41 = vand.u32 15, %v718_v34  ;;  %v1827_v43 = vpack.c.bf16 %v1795_v33, %v1795_v33 }
 0x193   : > { %v1430_v23 = vsel %vm1410_vm8, %v7002_v50, %v7001_v28  ;;  %v1456_v38 = vpack.c.bf16 %v1429_v19, %v1429_v19  ;;  %v1539_v18 = vmul.f32 %v4101_v3, %v1475_v17  ;;  %v1540_v59 = vmul.f32 %v5032_v27, %v1476_v30 }
 0x194   : > { %v1455_v54 = vpack.c.bf16 %v1430_v23, %v1430_v23  ;;  %v724_v53 = vadd.s32 144, %v5025_v32  ;;  %vm1134_vm15 = vcmp.gt.s32.totalorder %v826_v41, 0  ;;  %v7003_v51 = vrot.slane %v4944_v6, 7 }
 0x195   : > { %v1488_v48 = vunpack.c.l.bf16 %v1456_v38  ;;  %v7004_v46 = vrot.slane %v4942_v2, 7  ;;  %v5497_v13 = vunpack.c.l.b16 %v1826_v26  ;;  %v1571_v33 = vpack.c.bf16 %v1539_v18, %v1539_v18 }
 0x196   : > { %v1487_v39 = vunpack.c.l.bf16 %v1455_v54  ;;  %v1572_v11 = vpack.c.bf16 %v1540_v59, %v1540_v59  ;;  %v4107_v3 = vsel %vm1134_vm15, 1.0, %v6931_v21  ;;  %v2216_v34 = vsel %vm2212_vm12, %v2169_v57, %v2135_v5 }
 0x197   : > { %v1423_v7 = vsel %vm1410_vm8, %v7004_v46, %v7003_v51  ;;  %v1552_v19 = vmul.f32 %v5032_v27, %v1488_v48  ;;  %v868_v28 = vand.u32 15, %v724_v53  ;;  %v2263_v50 = vunpack.c.l.b16 %v2216_v34  ;;  %2156 = vrot.lane.b32.xlu0 %v2128_v22, %s4531_s24 }
 0x198   : > { %v1551_v16 = vmul.f32 %v4107_v3, %v1487_v39  ;;  %v2264_v23 = vunpack.c.h.b16 %v2216_v34  ;;  %v5502_v17 = vunpack.c.l.b16 %v1571_v33  ;;  %v5504_v30 = vunpack.c.l.b16 %v1572_v11 }
 0x199   : > { %v1584_v41 = vpack.c.bf16 %v1552_v19, %v1552_v19  ;;  %vm1140_vm0 = vcmp.gt.s32.totalorder %v868_v28, 0  ;;  %v7005_v26 = vmov %v7004_v46  ;;  %v7006_v54 = vrot.slane %v4940_v1, 7 }
 0x19a   : > { %v1583_v31 = vpack.c.bf16 %v1551_v16, %v1551_v16  ;;  %v2295_v38 = vpack.c.b16 %v2263_v50, %v2263_v50  ;;  %v2296_v18 = vpack.c.b16 %v2264_v23, %v2264_v23  ;;  %v5512_v59 = vunpack.c.l.b16 %v1827_v43 }
 0x19b   : > { %v1424_v57 = vsel %vm1410_vm8, %v7006_v54, %v7005_v26  ;;  %v1924_v53 = vpack.c.b16 %v5504_v30, %v5502_v17  ;;  %v5518_v48 = vunpack.c.l.b16 %v1584_v41  ;;  %v1462_v46 = vpack.c.bf16 %v1423_v7, %v1423_v7 }
 0x19c   : > { %v5516_v39 = vunpack.c.l.b16 %v1583_v31  ;;  %v1461_v51 = vpack.c.bf16 %v1424_v57, %v1424_v57  ;;  %2360 = vst.msk [vmem:[#allocation2 + $0x18] sm:$0xf] %vm2357_vm14, %v2295_v38  ;;  %v4110_v2 = vsel %vm1140_vm0, 1.0, %v6931_v21  ;;  %v714_v5 = vadd.s32 64, %v5025_v32 }
 0x19d   : > { %v7007_v33 = vrot.slane %v4923_v56, 7  ;;  %v7008_v43 = vrot.slane %v4921_v4, 7  ;;  %v7010_v34 = vrot.slane %v4919_v55, 7  ;;  %2361 = vst.msk [vmem:[#allocation2 + $0x1c] sm:$0xf] %vm2357_vm14, %v2296_v18  ;;  %v1494_v28 = vunpack.c.l.bf16 %v1462_v46 }
 0x19e   : > { %v1493_v19 = vunpack.c.l.bf16 %v1461_v51  ;;  %v798_v23 = vand.u32 15, %v714_v5  ;;  %v710_v41 = vadd.s32 32, %v5025_v32  ;;  %v7011_v4 = vrot.slane %v4915_v35, 7 }
 0x19f   : > { %v1433_v11 = vsel %vm1410_vm8, %v7008_v43, %v7007_v33  ;;  %v7009_v3 = vmov %v7008_v43  ;;  %v7012_v55 = vrot.slane %v4913_v52, 7  ;;  %v2131_v54 = vpack.c.b16 %v5512_v59, %v5497_v13  ;;  %2048 = vrot.lane.b32.xlu0 %v2018_v61, %s4528_s23 }
 0x1a0   : > { %v1434_v7 = vsel %vm1410_vm8, %v7010_v34, %v7009_v3  ;;  %v1452_v31 = vpack.c.bf16 %v1433_v11, %v1433_v11  ;;  %v1557_v57 = vmul.f32 %v4110_v2, %v1493_v19  ;;  %v1558_v38 = vmul.f32 %v5032_v27, %v1494_v28 }
 0x1a1   : > { %v1451_v50 = vpack.c.bf16 %v1434_v7, %v1434_v7  ;;  %v1437_v26 = vsel %vm1410_vm8, %v7012_v55, %v7011_v4  ;;  %vm1130_vm4 = vcmp.gt.s32.totalorder %v798_v23, 0  ;;  %v770_v51 = vand.u32 15, %v710_v41 }
 0x1a2   : > { %v1484_v22 = vunpack.c.l.bf16 %v1452_v31  ;;  %v7013_v46 = vmov %v7012_v55  ;;  %v7014_v5 = vrot.slane %v4885_v44, 7  ;;  %v1589_v33 = vpack.c.bf16 %v1557_v57, %v1557_v57  ;;  %v2021_v31 = vpop.permute.xlu1 %2020 }
 0x1a3   : > { %v1483_v18 = vunpack.c.l.bf16 %v1451_v50  ;;  %v1590_v43 = vpack.c.bf16 %v1558_v38, %v1558_v38  ;;  %v4105_v11 = vsel %vm1130_vm4, 1.0, %v6931_v21  ;;  %vm1126_vm5 = vcmp.gt.s32.totalorder %v770_v51, 0 }
 0x1a4   : > { %v1438_v35 = vsel %vm1410_vm8, %v7014_v5, %v7013_v46  ;;  %v1548_v59 = vmul.f32 %v5032_v27, %v1484_v22  ;;  %v1448_v2 = vpack.c.bf16 %v1437_v26, %v1437_v26  ;;  %v5557_v34 = vunpack.c.l.b16 %v1589_v33 }
 0x1a5   : > { %v1447_v3 = vpack.c.bf16 %v1438_v35, %v1438_v35  ;;  %v1547_v13 = vmul.f32 %v4105_v11, %v1483_v18  ;;  %v5559_v7 = vunpack.c.l.b16 %v1590_v43  ;;  %v4103_v52 = vsel %vm1126_vm5, 1.0, %v6931_v21 }
 0x1a6   : > { %v1580_v28 = vpack.c.bf16 %v1548_v59, %v1548_v59  ;;  %v1480_v50 = vunpack.c.l.bf16 %v1448_v2  ;;  %v730_v23 = vadd.s32 192, %v5025_v32  ;;  %v7015_v55 = vrot.slane %v4958_v15, 7 }
 0x1a7   : > { %v1479_v44 = vunpack.c.l.bf16 %v1447_v3  ;;  %v1579_v19 = vpack.c.bf16 %v1547_v13, %v1547_v13  ;;  %v7016_v26 = vrot.slane %v4956_v37, 7  ;;  %v7018_v18 = vrot.slane %v4954_v36, 7  ;;  %2162 = vrot.lane.b32.xlu0 %v2131_v54, %s4531_s24 }
 0x1a8   : > { %v5583_v46 = vunpack.c.l.b16 %v1580_v28  ;;  %v1544_v5 = vmul.f32 %v5032_v27, %v1480_v50  ;;  %v910_v35 = vand.u32 15, %v730_v23  ;;  %v720_v11 = vadd.s32 112, %v5025_v32 }
 0x1a9   : > { %v1543_v4 = vmul.f32 %v4103_v52, %v1479_v44  ;;  %v1417_v57 = vsel %vm1410_vm8, %v7016_v26, %v7015_v55  ;;  %v7017_v38 = vmov %v7016_v26  ;;  %v5581_v51 = vunpack.c.l.b16 %v1579_v19  ;;  %v5598_v19 = vpop.permute.xlu2 %2026 }
 0x1aa   : > { %v1418_v22 = vsel %vm1410_vm8, %v7018_v18, %v7017_v38  ;;  %v1468_v37 = vpack.c.bf16 %v1417_v57, %v1417_v57  ;;  %v1576_v13 = vpack.c.bf16 %v1544_v5, %v1544_v5  ;;  %vm1146_vm6 = vcmp.gt.s32.totalorder %v910_v35, 0 }
 0x1ab   : > { %v1575_v33 = vpack.c.bf16 %v1543_v4, %v1543_v4  ;;  %v1467_v43 = vpack.c.bf16 %v1418_v22, %v1418_v22  ;;  %v1928_v3 = vpack.c.b16 %v5583_v46, %v5581_v51  ;;  %v7019_v45 = vrot.slane %v4935_v63, 7 }
 0x1ac   : > { %v7020_v24 = vrot.slane %v4933_v62, 7  ;;  %v4113_v2 = vsel %vm1146_vm6, 1.0, %v6931_v21  ;;  %v1500_v44 = vunpack.c.l.bf16 %v1468_v37  ;;  %v5600_v28 = vunpack.c.l.b16 %v1576_v13 }
 0x1ad   : > { %v5595_v59 = vunpack.c.l.b16 %v1575_v33  ;;  %v1499_v52 = vunpack.c.l.bf16 %v1467_v43  ;;  %v840_v50 = vand.u32 15, %v720_v11  ;;  %v7022_v4 = vrot.slane %v4931_v60, 7 }
 0x1ae   : > { %v1427_v61 = vsel %vm1410_vm8, %v7020_v24, %v7019_v45  ;;  %v7021_v23 = vmov %v7020_v24  ;;  %v1564_v38 = vmul.f32 %v5032_v27, %v1500_v44  ;;  %v716_v22 = vadd.s32 80, %v5025_v32 }
 0x1af   : > { %v1428_v55 = vsel %vm1410_vm8, %v7022_v4, %v7021_v23  ;;  %v1458_v26 = vpack.c.bf16 %v1427_v61, %v1427_v61  ;;  %v1563_v57 = vmul.f32 %v4113_v2, %v1499_v52  ;;  %v1926_v5 = vpack.c.b16 %v5600_v28, %v5595_v59 }
 0x1b0   : > { %v1457_v18 = vpack.c.bf16 %v1428_v55, %v1428_v55  ;;  %vm1136_vm7 = vcmp.gt.s32.totalorder %v840_v50, 0  ;;  %v7023_v33 = vrot.slane %v4927_v58, 7  ;;  %v7024_v62 = vrot.slane %v4925_v42, 7  ;;  %v2133_v50 = vpop.permute.xlu1 %2132 }
 0x1b1   : > { %v1490_v35 = vunpack.c.l.bf16 %v1458_v26  ;;  %v1595_v43 = vpack.c.bf16 %v1563_v57, %v1563_v57  ;;  %v1596_v37 = vpack.c.bf16 %v1564_v38, %v1564_v38  ;;  %v4108_v11 = vsel %vm1136_vm7, 1.0, %v6931_v21 }
 0x1b2   : > { %v1431_v60 = vsel %vm1410_vm8, %v7024_v62, %v7023_v33  ;;  %v1489_v13 = vunpack.c.l.bf16 %v1457_v18  ;;  %v812_v24 = vand.u32 15, %v716_v22  ;;  %v7025_v61 = vmov %v7024_v62  ;;  %v2141_v62 = vpop.permute.xlu2 %2140 }
 0x1b3   : > { %v1554_v45 = vmul.f32 %v5032_v27, %v1490_v35  ;;  %v7026_v2 = vrot.slane %v4923_v56, 7  ;;  %v1454_v52 = vpack.c.bf16 %v1431_v60, %v1431_v60  ;;  %v2166_v44 = vsel %vm454_vm2, %v1924_v53, %v2021_v31 }
 0x1b4   : > { %v5631_v23 = vunpack.c.l.b16 %v1595_v43  ;;  %v5633_v54 = vunpack.c.l.b16 %v1596_v37  ;;  %v1553_v4 = vmul.f32 %v4108_v11, %v1489_v13  ;;  %v2214_v55 = vsel %vm2212_vm12, %v2166_v44, %v2133_v50 }
 0x1b5   : > { %v1432_v58 = vsel %vm1410_vm8, %v7026_v2, %v7025_v61  ;;  %v1586_v42 = vpack.c.bf16 %v1554_v45, %v1554_v45  ;;  %vm1132_vm9 = vcmp.gt.s32.totalorder %v812_v24, 0  ;;  %v2261_v26 = vunpack.c.l.b16 %v2214_v55 }
 0x1b6   : > { %7027 = vst [vmem:[#allocation5_spill] sm:$0xff] %v5631_v23  ;;  %v1453_v56 = vpack.c.bf16 %v1432_v58, %v1432_v58  ;;  %v2262_v57 = vunpack.c.h.b16 %v2214_v55  ;;  %v1585_v18 = vpack.c.bf16 %v1553_v4, %v1553_v4  ;;  %v4106_v30 = vsel %vm1132_vm9, 1.0, %v6931_v21 }
 0x1b7   : > { %7028 = vst [vmem:[#allocation6_spill] sm:$0xff] %v5633_v54  ;;  %v1907_v17 = vunpack.c.l.b16 %v1586_v42  ;;  %v1486_v31 = vunpack.c.l.bf16 %v1454_v52  ;;  %v2293_v22 = vpack.c.b16 %v2261_v26, %v2261_v26  ;;  %v726_v45 = vadd.s32 160, %v5025_v32 }
 0x1b8   : > { %v1485_v53 = vunpack.c.l.bf16 %v1453_v56  ;;  %v2294_v35 = vpack.c.b16 %v2262_v57, %v2262_v57  ;;  %v1906_v33 = vunpack.c.l.b16 %v1585_v18  ;;  %v7029_v24 = vrot.slane %v4948_v10, 7  ;;  %v5649_v58 = vpop.permute.xlu1 %2136 }
 0x1b9   : > { %v1550_v43 = vmul.f32 %v5032_v27, %v1486_v31  ;;  %2358 = vst.msk [vmem:[#allocation2 + $0x10] sm:$0xf] %vm2357_vm14, %v2293_v22  ;;  %v7030_v61 = vrot.slane %v4946_v8, 7  ;;  %v7032_v44 = vrot.slane %v4944_v6, 7  ;;  %v882_v42 = vand.u32 15, %v726_v45 }
 0x1ba   : > { %v1549_v60 = vmul.f32 %v4106_v30, %v1485_v53  ;;  %v1931_v37 = vpack.c.b16 %v1907_v17, %v1906_v33  ;;  %2359 = vst.msk [vmem:[#allocation2 + $0x14] sm:$0xf] %vm2357_vm14, %v2294_v35  ;;  %v5664_v6 = vpop.permute.xlu2 %2032  ;;  %vm2553_vm11 = vcmask 785408   ;;  %vm3924_vm6 = vcmask 27648  }
 0x1bb   : > { %v1582_v13 = vpack.c.bf16 %v1550_v43, %v1550_v43  ;;  %v1421_v2 = vsel %vm1410_vm8, %v7030_v61, %v7029_v24  ;;  %v7031_v52 = vmov %v7030_v61  ;;  %vm1142_vm10 = vcmp.gt.s32.totalorder %v882_v42, 0 }
 0x1bc   : > { %v1581_v11 = vpack.c.bf16 %v1549_v60, %v1549_v60  ;;  %v1422_v50 = vsel %vm1410_vm8, %v7032_v44, %v7031_v52  ;;  %v1464_v26 = vpack.c.bf16 %v1421_v2, %v1421_v2  ;;  %v4111_v18 = vsel %vm1142_vm10, 1.0, %v6931_v21 }
 0x1bd   : > { %v5659_v55 = vunpack.c.l.b16 %v1582_v13  ;;  %v1463_v56 = vpack.c.bf16 %v1422_v50, %v1422_v50  ;;  %v1404_v52 = vrot.slane %v4962_v40, 7  ;;  %v7033_v50 = vld [vmem:[#allocation3_spill] sm:$0xff]  ;;  %v5696_v40 = vadd.s32 128, %v5025_v32 }
 0x1be   : > { %v5657_v4 = vunpack.c.l.b16 %v1581_v11  ;;  %v1496_v8 = vunpack.c.l.bf16 %v1464_v26  ;;  %v6930_v42 = vrot.slane %v7033_v50, 7  ;;  %v7034_v26 = vld [vmem:[#allocation4_spill] sm:$0xff] }
 0x1bf   : > { %v1495_v17 = vunpack.c.l.bf16 %v1463_v56 }
 0x1c0   : > { %v1560_v53 = vmul.f32 %v5032_v27, %v1496_v8  ;;  %v2029_v31 = vpop.permute.xlu1 %2028 }
 0x1c1   : > { %v1559_v30 = vmul.f32 %v4111_v18, %v1495_v17  ;;  %v2178_v35 = vsel %vm454_vm2, %v1928_v3, %v2029_v31  ;;  %v2398_v3 = vpop.permute.xlu0 %2397 }
 0x1c2   : > { %v1592_v33 = vpack.c.bf16 %v1560_v53, %v1560_v53  ;;  %v2222_v60 = vsel %vm2212_vm12, %v2178_v35, %v2141_v62  ;;  %v2147_v46 = vpop.permute.xlu2 %2146  ;;  %v732_v62 = vadd.s32 208, %v5025_v32  ;;  %v2403_v18 = vsel %vm454_vm2, %v7034_v26, %v2398_v3  ;;  %v4479_v53 = vld [vmem:[%s6922_s2 + $0x18] sm:$0xff]  }
 0x1c3   : > { %v1591_v22 = vpack.c.bf16 %v1559_v30, %v1559_v30  ;;  %v2269_v43 = vunpack.c.l.b16 %v2222_v60  ;;  %v2270_v11 = vunpack.c.h.b16 %v2222_v60  ;;  %v4480_v30 = vld [vmem:[%s6922_s2 + $0x8] sm:$0xff]   ;;  %v4532_v35 = vmov 0  }
 0x1c4   : > { %v5674_v45 = vunpack.c.l.b16 %v1592_v33  ;;  %2390 = vst.msk [vmem:[#allocation2 + $0x8] sm:$0xf] %vm2357_vm14, %v4532_v35  ;;  %v4404_v3 = vunpack.c.l.bf16 %v4480_v30  ;;  %v4396_v26 = vunpack.c.l.bf16 %v4479_v53 }
 0x1c5   : > { %v5672_v13 = vunpack.c.l.b16 %v1591_v22  ;;  %v2301_v24 = vpack.c.b16 %v2269_v43, %v2269_v43  ;;  %v2302_v61 = vpack.c.b16 %v2270_v11, %v2270_v11  ;;  %2391 = vst.msk [vmem:[#allocation2 + $0xc] sm:$0xf] %vm2357_vm14, %v4532_v35 }
 0x1c6   : > { %2392 = vst.msk [vmem:[#allocation2 + $0x90] sm:$0xf] %vm2357_vm14, %v4532_v35 }
 0x1c7   : > { %2366 = vst.msk [vmem:[#allocation2 + $0x30] sm:$0xf] %vm2357_vm14, %v2301_v24  ;;  %v4482_v24 = vld [vmem:[%s6922_s2 + $0x28] sm:$0xff]  }
 0x1c8   : > { %2367 = vst.msk [vmem:[#allocation2 + $0x34] sm:$0xf] %vm2357_vm14, %v2302_v61  ;;  %v5680_v51 = vpop.permute.xlu1 %2142  ;;  %v7035_v61 = vrot.slane %v4958_v15, 7  ;;  %v4413_v38 = vunpack.c.h.bf16 %v4482_v24 }
 0x1c9   : > { %v2400_v17 = vpop.permute.xlu0 %2399  ;;  %2393 = vst.msk [vmem:[#allocation2 + $0x94] sm:$0xf] %vm2357_vm14, %v4532_v35 }
 0x1ca   : > { %v2405_v31 = vsel %vm2212_vm12, %v2403_v18, %v2400_v17  ;;  %v5701_v33 = vpop.permute.xlu2 %2038  ;;  %v1415_v18 = vsel %vm1410_vm8, %v1404_v52, %v6930_v42 }
 0x1cb   : > { %v2443_v60 = vpack.i.b16 %v2405_v31, %v2405_v31  ;;  %v4397_v31 = vunpack.c.h.bf16 %v4479_v53 }
 0x1cd   : > { %v2445_v17 = vperm.slane %v2443_v60, 0 }
 0x1cf   : > { %v2450_v60 = vunpack.c.l.bf16 %v2445_v17 }
 0x1d0   : > { %v2035_v56 = vpop.permute.xlu1 %2034 }
 0x1d1   : > { %v2187_v8 = vsel %vm454_vm2, %v1931_v37, %v2035_v56  ;;  %v924_v37 = vand.u32 15, %v732_v62  ;;  %v4405_v56 = vunpack.c.h.bf16 %v4480_v30  ;;  %v4399_v62 = vld [vmem:[%s6922_s2] sm:$0xff]   ;;  %v4478_v30 = vld [vmem:[%s6922_s2 + $0x10] sm:$0xff]   ;;  %v2453_v9 = vmul.f32 %v4396_v26, %v2450_v60 }
 0x1d2   : > { %v2228_v22 = vsel %vm2212_vm12, %v2187_v8, %v2147_v46  ;;  %v1416_v46 = vsel %vm1410_vm8, %v7035_v61, %v1404_v52  ;;  %v4412_v61 = vunpack.c.l.bf16 %v4482_v24  ;;  %v4400_v53 = vunpack.c.l.bf16 %v4399_v62  ;;  %v2025_v24 = vpop.permute.xlu0 %2024  ;;  %v2153_v26 = vpop.permute.xlu2 %2152 }
 0x1d3   : > { %v2275_v43 = vunpack.c.l.b16 %v2228_v22  ;;  %v2276_v11 = vunpack.c.h.b16 %v2228_v22  ;;  %v4481_v22 = vld [vmem:[%s6922_s2 + $0x20] sm:$0xff]   ;;  %vm5726_vm3 = vcmp.gt.s32.totalorder %v924_v37, 0  ;;  %v1469_v52 = vpack.c.bf16 %v1416_v46, %v1416_v46 }
 0x1d4   : > { %v4392_v16 = vunpack.c.l.bf16 %v4478_v30  ;;  %v4393_v57 = vunpack.c.h.bf16 %v4478_v30  ;;  %v4408_v35 = vunpack.c.l.bf16 %v4481_v22  ;;  %v4409_v2 = vunpack.c.h.bf16 %v4481_v22 }
 0x1d5   : > { %v2307_v8 = vpack.c.b16 %v2275_v43, %v2275_v43  ;;  %v2308_v15 = vpack.c.b16 %v2276_v11, %v2276_v11  ;;  %v4401_v43 = vunpack.c.h.bf16 %v4399_v62  ;;  %v1470_v11 = vpack.c.bf16 %v1415_v18, %v1415_v18 }
 0x1d6   : > { %v2469_v37 = vmul.f32 %v4404_v3, %v2450_v60  ;;  %v2470_v44 = vmul.f32 %v4405_v56, %v2450_v60  ;;  %v2454_v21 = vmul.f32 %v4397_v31, %v2450_v60  ;;  %v2172_v46 = vsel %vm454_vm2, %v1926_v5, %v2025_v24 }
 0x1d7   : > { %2372 = vst.msk [vmem:[#allocation2 + $0x48] sm:$0xf] %vm2357_vm14, %v2307_v8  ;;  %v2843_v62 = vmul.f32 %v4412_v61, %v2450_v60  ;;  %v2844_v18 = vmul.f32 %v4413_v38, %v2450_v60  ;;  %v1501_v17 = vunpack.c.l.bf16 %v1469_v52  ;;  %v2218_v8 = vsel %vm2212_vm12, %v2172_v46, %v5649_v58 }
 0x1d8   : > { %2373 = vst.msk [vmem:[#allocation2 + $0x4c] sm:$0xf] %vm2357_vm14, %v2308_v15  ;;  %v5732_v42 = vpop.permute.xlu1 %2148  ;;  %v2472_v15 = vpack.c.bf16 %v2470_v44, %v2469_v37  ;;  %v2456_v30 = vpack.c.bf16 %v2454_v21, %v2453_v9  ;;  %v2467_v23 = vmul.f32 %v4400_v53, %v2450_v60  ;;  %v2265_v22 = vunpack.c.l.b16 %v2218_v8 }
 0x1d9   : > { %v2266_v54 = vunpack.c.h.b16 %v2218_v8  ;;  %v2846_v3 = vpack.c.bf16 %v2844_v18, %v2843_v62  ;;  %v2468_v56 = vmul.f32 %v4401_v43, %v2450_v60  ;;  %v2451_v28 = vmul.f32 %v4392_v16, %v2450_v60 }
 0x1da   : > { %v2606_v31 = vsel %vm2553_vm11, %v2472_v15, 0  ;;  %v2709_v59 = vsel %vm2553_vm11, %v2456_v30, 0  ;;  %v2452_v5 = vmul.f32 %v4393_v57, %v2450_v60  ;;  %v2297_v61 = vpack.c.b16 %v2265_v22, %v2265_v22  ;;  %v2139_v41 = vpop.permute.xlu0 %2138 }
 0x1db   : > { %v2298_v38 = vpack.c.b16 %v2266_v54, %v2266_v54  ;;  %2614 = vmatpush.bf16.xpose.msrb.mxu1 %v2606_v31  ;;  %2717 = vmatpush.bf16.xpose.msrb.mxu2 %v2709_v59  ;;  %v2979_v58 = vsel %vm2553_vm11, %v2846_v3, 0  ;;  %v2841_v44 = vmul.f32 %v4408_v35, %v2450_v60  ;;  %v2842_v21 = vmul.f32 %v4409_v2, %v2450_v60  ;;  %v5776_v59 = vpop.permute.xlu2 %2044 }
 0x1dc   : > { %2987 = vmatpush.bf16.xpose.msrb.mxu3 %v2979_v58  ;;  %v7038_v9 = vmov 0.0   ;;  %v1502_v53 = vunpack.c.l.bf16 %v1470_v11  ;;  %v7039_v43 = vpack.c.b16 %v5464_v47, %v5468_v49  ;;  %2362 = vst.msk [vmem:[#allocation2 + $0x20] sm:$0xf] %vm2357_vm14, %v2297_v61  ;;  %v2471_v54 = vpack.c.bf16 %v2468_v56, %v2467_v23 }
 0x1dd   : > { %v4114_v52 = vsel %vm5726_vm3, 1.0, %v7038_v9  ;;  %v7040_v24 = vrot.slane %v4940_v1, 7  ;;  %v7041_v35 = vrot.slane %v4938_v0, 7  ;;  %2363 = vst.msk [vmem:[#allocation2 + $0x24] sm:$0xf] %vm2357_vm14, %v2298_v38  ;;  %v2455_v60 = vpack.c.bf16 %v2452_v5, %v2451_v28 }
 0x1de   : > { %v2175_v16 = vsel %vm454_vm2, %v7039_v43, %v5598_v19  ;;  %v7042_v47 = vpack.c.b16 %v5674_v45, %v5672_v13  ;;  %v854_v19 = vand.u32 15, %v5696_v40  ;;  %v7044_v1 = vrot.slane %v4935_v63, 7 }
 0x1df   : > { %v1425_v2 = vsel %vm1410_vm8, %v7041_v35, %v7040_v24  ;;  %v7043_v23 = vmov %v7041_v35  ;;  %v2220_v37 = vsel %vm2212_vm12, %v2175_v16, %v2139_v41  ;;  %v2845_v46 = vpack.c.bf16 %v2842_v21, %v2841_v44  ;;  %v4373_v21 = vld [vmem:[#allocation2 + $0x8] sm:$0xff]  ;;  %v4374_v41 = vld [vmem:[#allocation2 + $0x18] sm:$0xff] }
 0x1e0   : > { %v2041_v57 = vpop.permute.xlu1 %2040  ;;  %v1426_v11 = vsel %vm1410_vm8, %v7044_v1, %v7043_v23  ;;  %v1565_v18 = vmul.f32 %v4114_v52, %v1501_v17  ;;  %v2267_v8 = vunpack.c.l.b16 %v2220_v37  ;;  %v2268_v15 = vunpack.c.h.b16 %v2220_v37 }
 0x1e1   : > { %v2196_v49 = vsel %vm454_vm2, %v7042_v47, %v2041_v57  ;;  %v1566_v45 = vmul.f32 %v5032_v27, %v1502_v53  ;;  %v2603_v40 = vsel %vm2553_vm11, %v2471_v54, 0  ;;  %v1459_v0 = vpack.c.bf16 %v1426_v11, %v1426_v11  ;;  %v4357_v54 = vld [vmem:[#allocation2 + $0x10] sm:$0xff] }
 0x1e2   : > { %v2234_v62 = vsel %vm2212_vm12, %v2196_v49, %v2153_v26  ;;  %v1460_v22 = vpack.c.bf16 %v1425_v2, %v1425_v2  ;;  %v2299_v63 = vpack.c.b16 %v2267_v8, %v2267_v8  ;;  %v2300_v3 = vpack.c.b16 %v2268_v15, %v2268_v15  ;;  %v2031_v44 = vpop.permute.xlu0 %2030 }
 0x1e3   : > { %v2281_v13 = vunpack.c.l.b16 %v2234_v62  ;;  %v2282_v30 = vunpack.c.h.b16 %v2234_v62  ;;  %v2706_v56 = vsel %vm2553_vm11, %v2455_v60, 0  ;;  %2615 = vmatpush.bf16.xpose.msrb.mxu1 %v2603_v40  ;;  %v2976_v26 = vsel %vm2553_vm11, %v2845_v46, 0  ;;  %v2159_v46 = vpop.permute.xlu2 %2158 }
 0x1e4   : > { %2718 = vmatpush.bf16.xpose.msrb.mxu2 %v2706_v56  ;;  %vm1138_vm13 = vcmp.gt.s32.totalorder %v854_v19, 0  ;;  %2364 = vst.msk [vmem:[#allocation2 + $0x28] sm:$0xf] %vm2357_vm14, %v2299_v63  ;;  %2988 = vmatpush.bf16.xpose.msrb.mxu3 %v2976_v26  ;;  %v1597_v28 = vpack.c.bf16 %v1565_v18, %v1565_v18  ;;  %v1598_v5 = vpack.c.bf16 %v1566_v45, %v1566_v45  ;;  %v1491_v38 = vunpack.c.l.bf16 %v1459_v0 }
 0x1e5   : > { %v2313_v31 = vpack.c.b16 %v2281_v13, %v2281_v13  ;;  %v2314_v17 = vpack.c.b16 %v2282_v30, %v2282_v30  ;;  %2365 = vst.msk [vmem:[#allocation2 + $0x2c] sm:$0xf] %vm2357_vm14, %v2300_v3  ;;  %v1492_v58 = vunpack.c.l.bf16 %v1460_v22  ;;  %v4109_v52 = vsel %vm1138_vm13, 1.0, %v7038_v9 }
 0x1e6   : > { %v7045_v53 = vpack.c.b16 %v5659_v55, %v5657_v4  ;;  %v1918_v57 = vunpack.c.l.b16 %v1597_v28  ;;  %v1919_v24 = vunpack.c.l.b16 %v1598_v5  ;;  %v1555_v60 = vmul.f32 %v4109_v52, %v1491_v38 }
 0x1e7   : > { %2378 = vst.msk [vmem:[#allocation2 + $0x60] sm:$0xf] %vm2357_vm14, %v2313_v31  ;;  %v1556_v47 = vmul.f32 %v5032_v27, %v1492_v58  ;;  %v1400_v49 = vrot.slane %v4950_v14, 7  ;;  %v7046_v14 = vpack.c.b16 %v5518_v48, %v5516_v39  ;;  %v7047_v8 = vrot.slane %v4954_v36, 7 }
 0x1e8   : > { %v5780_v61 = vpop.permute.xlu1 %2154  ;;  %v2181_v43 = vsel %vm454_vm2, %v7045_v53, %v2031_v44  ;;  %2379 = vst.msk [vmem:[#allocation2 + $0x64] sm:$0xf] %vm2357_vm14, %v2314_v17  ;;  %v1937_v19 = vpack.c.b16 %v1919_v24, %v1918_v57  ;;  %v1587_v23 = vpack.c.bf16 %v1555_v60, %v1555_v60  ;;  %v7048_v13 = vrot.slane %v4948_v10, 7  ;;  %v4358_v53 = vld [vmem:[#allocation2 + $0x18] sm:$0xff]  ;;  %v4375_v57 = vld [vmem:[#allocation2 + $0x20] sm:$0xff] }
 0x1e9   : > { %v2224_v16 = vsel %vm2212_vm12, %v2181_v43, %v5680_v51  ;;  %v728_v51 = vadd.s32 176, %v5025_v32  ;;  %v1588_v1 = vpack.c.bf16 %v1556_v47, %v1556_v47  ;;  %v2184_v37 = vsel %vm454_vm2, %v7046_v14, %v5664_v6 }
 0x1ea   : > { %v2271_v35 = vunpack.c.l.b16 %v2224_v16  ;;  %v2272_v2 = vunpack.c.h.b16 %v2224_v16  ;;  %4201 = vmatmul.msk.bf16.vlgmr.msrb.gmra.mxu1 %vm2553_vm11, %v4373_v21  ;;  %v2145_v62 = vpop.permute.xlu0 %2144  ;;  %v1419_v15 = vsel %vm1410_vm8, %v1400_v49, %v7047_v8  ;;  %v1420_v45 = vsel %vm1410_vm8, %v7048_v13, %v1400_v49 }
 0x1eb   : > { %4221 = vmatmul.msk.bf16.vlgmr.msrb.gmra.mxu2 %vm2553_vm11, %v4357_v54  ;;  %4305 = vmatmul.msk.bf16.vlgmr.msrb.gmra.mxu3 %vm2553_vm11, %v4374_v41  ;;  %v2226_v39 = vsel %vm2212_vm12, %v2184_v37, %v2145_v62  ;;  %v896_v6 = vand.u32 15, %v728_v51  ;;  %v1908_v63 = vunpack.c.l.b16 %v1587_v23  ;;  %v1909_v3 = vunpack.c.l.b16 %v1588_v1 }
 0x1ec   : > { %v2303_v4 = vpack.c.b16 %v2271_v35, %v2271_v35  ;;  %v2304_v55 = vpack.c.b16 %v2272_v2, %v2272_v2  ;;  %v2273_v40 = vunpack.c.l.b16 %v2226_v39  ;;  %v2274_v30 = vunpack.c.h.b16 %v2226_v39 }
 0x1ed   : > { %v1465_v36 = vpack.c.bf16 %v1420_v45, %v1420_v45  ;;  %v1466_v56 = vpack.c.bf16 %v1419_v15, %v1419_v15  ;;  %vm1144_vm15 = vcmp.gt.s32.totalorder %v896_v6, 0  ;;  %v1932_v28 = vpack.c.b16 %v1909_v3, %v1908_v63  ;;  %v4359_v63 = vld [vmem:[#allocation2 + $0x20] sm:$0xff] }
 0x1ee   : > { %2368 = vst.msk [vmem:[#allocation2 + $0x38] sm:$0xf] %vm2357_vm14, %v2303_v4  ;;  %v2305_v31 = vpack.c.b16 %v2273_v40, %v2273_v40  ;;  %v2306_v26 = vpack.c.b16 %v2274_v30, %v2274_v30  ;;  %v4112_v44 = vsel %vm1144_vm15, 1.0, %v7038_v9  ;;  %v1406_v2 = vrot.slane %v4966_v20, 7 }
 0x1ef   : > { %2369 = vst.msk [vmem:[#allocation2 + $0x3c] sm:$0xf] %vm2357_vm14, %v2304_v55  ;;  %v1497_v5 = vunpack.c.l.bf16 %v1465_v36  ;;  %v1498_v38 = vunpack.c.l.bf16 %v1466_v56  ;;  %v1407_v41 = vrot.slane %v4968_v25, 7  ;;  %v7049_v20 = vpack.c.b16 %v5559_v7, %v5557_v34  ;;  %v4376_v36 = vld [vmem:[#allocation2 + $0x28] sm:$0xff] }
 0x1f0   : > { %v2047_v11 = vpop.permute.xlu1 %2046  ;;  %2370 = vst.msk [vmem:[#allocation2 + $0x40] sm:$0xf] %vm2357_vm14, %v2305_v31  ;;  %v7050_v51 = vrot.slane %v7033_v50, 7  ;;  %v736_v62 = vadd.s32 240, %v5025_v32  ;;  %v7051_v50 = vrot.slane %v4835_v12, 7 }
 0x1f1   : > { %v2205_v18 = vsel %vm454_vm2, %v1937_v19, %v2047_v11  ;;  %2371 = vst.msk [vmem:[#allocation2 + $0x44] sm:$0xf] %vm2357_vm14, %v2306_v26  ;;  %v1561_v24 = vmul.f32 %v4112_v44, %v1497_v5  ;;  %v1562_v35 = vmul.f32 %v5032_v27, %v1498_v38  ;;  %v2193_v25 = vsel %vm454_vm2, %v7049_v20, %v5701_v33  ;;  %v7053_v44 = vld [vmem:[#allocation5_spill] sm:$0xff] }
 0x1f2   : > { %v2240_v48 = vsel %vm2212_vm12, %v2205_v18, %v2159_v46  ;;  %v2037_v58 = vpop.permute.xlu0 %2036  ;;  %v1413_v55 = vsel %vm1410_vm8, %v1406_v2, %v1407_v41  ;;  %v1414_v19 = vsel %vm1410_vm8, %v7050_v51, %v1406_v2  ;;  %v1408_v11 = vrot.slane %v4970_v29, 7 }
 0x1f3   : > { %v2287_v0 = vunpack.c.l.b16 %v2240_v48  ;;  %v2288_v22 = vunpack.c.h.b16 %v2240_v48  ;;  %v2190_v21 = vsel %vm454_vm2, %v1932_v28, %v2037_v58  ;;  %v1593_v49 = vpack.c.bf16 %v1561_v24, %v1561_v24  ;;  %v7052_v58 = vld [vmem:[#allocation6_spill] sm:$0xff] }
 0x1f4   : > { %v2230_v52 = vsel %vm2212_vm12, %v2190_v21, %v5732_v42  ;;  %v734_v42 = vadd.s32 224, %v5025_v32  ;;  %v1594_v4 = vpack.c.bf16 %v1562_v35, %v1562_v35  ;;  %v1471_v37 = vpack.c.bf16 %v1414_v19, %v1414_v19 }
 0x1f5   : > { %v2319_v17 = vpack.c.b16 %v2287_v0, %v2287_v0  ;;  %v2320_v10 = vpack.c.b16 %v2288_v22, %v2288_v22  ;;  %v2277_v43 = vunpack.c.l.b16 %v2230_v52  ;;  %v2278_v16 = vunpack.c.h.b16 %v2230_v52 }
 0x1f6   : > { %v938_v1 = vand.u32 15, %v734_v42  ;;  %v1914_v7 = vunpack.c.l.b16 %v1593_v49  ;;  %v1915_v33 = vunpack.c.l.b16 %v1594_v4  ;;  %v1472_v46 = vpack.c.bf16 %v1413_v55, %v1413_v55  ;;  %v4360_v55 = vld [vmem:[#allocation2 + $0x28] sm:$0xff] }
 0x1f7   : > { %2384 = vst.msk [vmem:[#allocation2 + $0x78] sm:$0xf] %vm2357_vm14, %v2319_v17  ;;  %v2309_v60 = vpack.c.b16 %v2277_v43, %v2277_v43  ;;  %v2310_v47 = vpack.c.b16 %v2278_v16, %v2278_v16  ;;  %v1411_v15 = vsel %vm1410_vm8, %v1408_v11, %v7051_v50  ;;  %v1412_v29 = vsel %vm1410_vm8, %v1407_v41, %v1408_v11  ;;  %v4361_v50 = vld [vmem:[#allocation2 + $0x30] sm:$0xff] }
 0x1f8   : > { %2385 = vst.msk [vmem:[#allocation2 + $0x7c] sm:$0xf] %vm2357_vm14, %v2320_v10  ;;  %vm1150_vm0 = vcmp.gt.s32.totalorder %v938_v1, 0  ;;  %v1935_v13 = vpack.c.b16 %v1915_v33, %v1914_v7  ;;  %v1503_v45 = vunpack.c.l.bf16 %v1471_v37  ;;  %v1504_v39 = vunpack.c.l.bf16 %v1472_v46  ;;  %v2161_v4 = vpop.permute.xlu1 %2160  ;;  %v2051_v1 = vpop.permute.xlu2 %2050 }
 0x1f9   : > { %2374 = vst.msk [vmem:[#allocation2 + $0x50] sm:$0xf] %vm2357_vm14, %v2309_v60  ;;  %v952_v48 = vand.u32 15, %v736_v62  ;;  %v4115_v40 = vsel %vm1150_vm0, 1.0, %v7038_v9  ;;  %v1473_v12 = vpack.c.bf16 %v1412_v29, %v1412_v29  ;;  %v1474_v0 = vpack.c.bf16 %v1411_v15, %v1411_v15  ;;  %v4378_v15 = vld [vmem:[#allocation2 + $0x38] sm:$0xff] }
 0x1fa   : > { %4202 = vmatmul.msk.bf16.gmra.mxu1 %vm2553_vm11, %v4357_v54  ;;  %2375 = vst.msk [vmem:[#allocation2 + $0x54] sm:$0xf] %vm2357_vm14, %v2310_v47  ;;  %v2151_v54 = vpop.permute.xlu0 %2150  ;;  %v1567_v56 = vmul.f32 %v4115_v40, %v1503_v45  ;;  %v1568_v31 = vmul.f32 %v5032_v27, %v1504_v39  ;;  %v7054_v21 = vpack.c.b16 %v7052_v58, %v7053_v44  ;;  %v4362_v29 = vld [vmem:[#allocation2 + $0x38] sm:$0xff]  ;;  %v4363_v45 = vld [vmem:[#allocation2 + $0x40] sm:$0xff]  ;;  %v4380_v39 = vld [vmem:[#allocation2 + $0x48] sm:$0xff] }
 0x1fb   : > { %4222 = vmatmul.msk.bf16.gmra.mxu2 %vm2553_vm11, %v4358_v53  ;;  %4306 = vmatmul.msk.bf16.gmra.mxu3 %vm2553_vm11, %v4375_v57  ;;  %v2232_v23 = vsel %vm2212_vm12, %v2193_v25, %v2151_v54  ;;  %vm1152_vm8 = vcmp.gt.s32.totalorder %v952_v48, 0  ;;  %v1505_v10 = vunpack.c.l.bf16 %v1473_v12  ;;  %v1506_v28 = vunpack.c.l.bf16 %v1474_v0  ;;  %v4364_v48 = vld [vmem:[#allocation2 + $0x48] sm:$0xff] }
 0x1fc   : > { %v2279_v14 = vunpack.c.l.b16 %v2232_v23  ;;  %v2280_v34 = vunpack.c.h.b16 %v2232_v23  ;;  %v1599_v5 = vpack.c.bf16 %v1567_v56, %v1567_v56  ;;  %v1600_v38 = vpack.c.bf16 %v1568_v31, %v1568_v31  ;;  %v4377_v23 = vld [vmem:[#allocation2 + $0x30] sm:$0xff] }
 0x1fd   : > { %v2202_v52 = vsel %vm454_vm2, %v7054_v21, %v5776_v59  ;;  %v1570_v57 = vmul.f32 %v5032_v27, %v1506_v28  ;;  %v4383_v28 = vld [vmem:[#allocation2 + $0x60] sm:$0xff] }
 0x1fe   : > { %v2311_v18 = vpack.c.b16 %v2279_v14, %v2279_v14  ;;  %v2312_v8 = vpack.c.b16 %v2280_v34, %v2280_v34  ;;  %v1920_v35 = vunpack.c.l.b16 %v1599_v5  ;;  %v1921_v2 = vunpack.c.l.b16 %v1600_v38 }
 0x1ff   : > { %v1602_v42 = vpack.c.bf16 %v1570_v57, %v1570_v57  ;;  %v4367_v57 = vld [vmem:[#allocation2 + $0x60] sm:$0xff] }
 0x200   : > { %2376 = vst.msk [vmem:[#allocation2 + $0x58] sm:$0xf] %vm2357_vm14, %v2311_v18  ;;  %v1938_v59 = vpack.c.b16 %v1921_v2, %v1920_v35 }
 0x201   : > { %2377 = vst.msk [vmem:[#allocation2 + $0x5c] sm:$0xf] %vm2357_vm14, %v2312_v8  ;;  %v1923_v54 = vunpack.c.l.b16 %v1602_v42 }
 0x202   : > { %v2043_v6 = vpop.permute.xlu0 %2042 }
 0x203   : > { %v2199_v30 = vsel %vm454_vm2, %v1935_v13, %v2043_v6  ;;  %v4379_v13 = vld [vmem:[#allocation2 + $0x40] sm:$0xff]  ;;  %v4381_v6 = vld [vmem:[#allocation2 + $0x50] sm:$0xff] }
 0x204   : > { %v2236_v22 = vsel %vm2212_vm12, %v2199_v30, %v5780_v61  ;;  %v4116_v61 = vsel %vm1152_vm8, 1.0, %v7038_v9  ;;  %v4365_v30 = vld [vmem:[#allocation2 + $0x50] sm:$0xff] }
 0x205   : > { %v2283_v3 = vunpack.c.l.b16 %v2236_v22  ;;  %v2284_v32 = vunpack.c.h.b16 %v2236_v22  ;;  %v1569_v16 = vmul.f32 %v4116_v61, %v1505_v10 }
 0x207   : > { %v2315_v26 = vpack.c.b16 %v2283_v3, %v2283_v3  ;;  %v2316_v17 = vpack.c.b16 %v2284_v32, %v2284_v32  ;;  %v1601_v47 = vpack.c.bf16 %v1569_v16, %v1569_v16 }
 0x208   : > { %v4382_v12 = vld [vmem:[#allocation2 + $0x58] sm:$0xff] }
 0x209   : > { %2380 = vst.msk [vmem:[#allocation2 + $0x68] sm:$0xf] %vm2357_vm14, %v2315_v26  ;;  %v1922_v25 = vunpack.c.l.b16 %v1601_v47  ;;  %v4366_v10 = vld [vmem:[#allocation2 + $0x58] sm:$0xff] }
 0x20a   : > { %4203 = vmatmul.msk.bf16.gmra.mxu1 %vm2553_vm11, %v4358_v53  ;;  %2381 = vst.msk [vmem:[#allocation2 + $0x6c] sm:$0xf] %vm2357_vm14, %v2316_v17  ;;  %v2157_v53 = vpop.permute.xlu0 %2156 }
 0x20b   : > { %4223 = vmatmul.msk.bf16.gmra.mxu2 %vm2553_vm11, %v4359_v63  ;;  %4307 = vmatmul.msk.bf16.gmra.mxu3 %vm2553_vm11, %v4376_v36  ;;  %v2238_v43 = vsel %vm2212_vm12, %v2202_v52, %v2157_v53  ;;  %v1939_v34 = vpack.c.b16 %v1923_v54, %v1922_v25 }
 0x20c   : > { %v2285_v24 = vunpack.c.l.b16 %v2238_v43  ;;  %v2286_v9 = vunpack.c.h.b16 %v2238_v43 }
 0x20d   : > { %v2211_v7 = vsel %vm454_vm2, %v1939_v34, %v2051_v1 }
 0x20e   : > { %v2317_v41 = vpack.c.b16 %v2285_v24, %v2285_v24  ;;  %v2318_v60 = vpack.c.b16 %v2286_v9, %v2286_v9 }
 0x210   : > { %2382 = vst.msk [vmem:[#allocation2 + $0x70] sm:$0xf] %vm2357_vm14, %v2317_v41 }
 0x211   : > { %2383 = vst.msk [vmem:[#allocation2 + $0x74] sm:$0xf] %vm2357_vm14, %v2318_v60  ;;  %v4384_v24 = vld [vmem:[#allocation2 + $0x68] sm:$0xff] }
 0x212   : > { %v2049_v49 = vpop.permute.xlu0 %2048 }
 0x213   : > { %v2208_v20 = vsel %vm454_vm2, %v1938_v59, %v2049_v49 }
 0x214   : > { %v2242_v27 = vsel %vm2212_vm12, %v2208_v20, %v2161_v4  ;;  %v4368_v20 = vld [vmem:[#allocation2 + $0x68] sm:$0xff] }
 0x215   : > { %v2289_v51 = vunpack.c.l.b16 %v2242_v27  ;;  %v2290_v19 = vunpack.c.h.b16 %v2242_v27 }
 0x217   : > { %v2321_v11 = vpack.c.b16 %v2289_v51, %v2289_v51  ;;  %v2322_v14 = vpack.c.b16 %v2290_v19, %v2290_v19 }
 0x218   : > { %v4385_v25 = vld [vmem:[#allocation2 + $0x70] sm:$0xff] }
 0x219   : > { %2386 = vst.msk [vmem:[#allocation2 + $0x80] sm:$0xf] %vm2357_vm14, %v2321_v11 }
 0x21a   : > { %4204 = vmatmul.msk.bf16.gmra.mxu1 %vm2553_vm11, %v4359_v63  ;;  %2387 = vst.msk [vmem:[#allocation2 + $0x84] sm:$0xf] %vm2357_vm14, %v2322_v14  ;;  %v2163_v33 = vpop.permute.xlu0 %2162 }
 0x21b   : > { %4224 = vmatmul.msk.bf16.gmra.mxu2 %vm2553_vm11, %v4360_v55  ;;  %4308 = vmatmul.msk.bf16.gmra.mxu3 %vm2553_vm11, %v4377_v23  ;;  %v2244_v37 = vsel %vm2212_vm12, %v2211_v7, %v2163_v33  ;;  %v4369_v7 = vld [vmem:[#allocation2 + $0x70] sm:$0xff]  ;;  %v4386_v33 = vld [vmem:[#allocation2 + $0x78] sm:$0xff] }
 0x21c   : > { %v2291_v46 = vunpack.c.l.b16 %v2244_v37  ;;  %v2292_v62 = vunpack.c.h.b16 %v2244_v37 }
 0x21e   : > { %v2323_v18 = vpack.c.b16 %v2291_v46, %v2291_v46  ;;  %v2324_v8 = vpack.c.b16 %v2292_v62, %v2292_v62 }
 0x220   : > { %2388 = vst.msk [vmem:[#allocation2 + $0x88] sm:$0xf] %vm2357_vm14, %v2323_v18 }
 0x221   : > { %2389 = vst.msk [vmem:[#allocation2 + $0x8c] sm:$0xf] %vm2357_vm14, %v2324_v8 }
 0x22a   : > { %4205 = vmatmul.msk.bf16.gmra.mxu1 %vm2553_vm11, %v4360_v55 }
 0x22b   : > { %4225 = vmatmul.msk.bf16.gmra.mxu2 %vm2553_vm11, %v4361_v50  ;;  %4309 = vmatmul.msk.bf16.gmra.mxu3 %vm2553_vm11, %v4378_v15 }
 0x23a   : > { %4206 = vmatmul.msk.bf16.gmra.mxu1 %vm2553_vm11, %v4361_v50 }
 0x23b   : > { %4226 = vmatmul.msk.bf16.gmra.mxu2 %vm2553_vm11, %v4362_v29  ;;  %4310 = vmatmul.msk.bf16.gmra.mxu3 %vm2553_vm11, %v4379_v13 }
 0x24a   : > { %4207 = vmatmul.msk.bf16.gmra.mxu1 %vm2553_vm11, %v4362_v29 }
 0x24b   : > { %4227 = vmatmul.msk.bf16.gmra.mxu2 %vm2553_vm11, %v4363_v45  ;;  %4311 = vmatmul.msk.bf16.gmra.mxu3 %vm2553_vm11, %v4380_v39  ;;  %v4370_v39 = vld [vmem:[#allocation2 + $0x78] sm:$0xff] }
 0x25a   : > { %4208 = vmatmul.msk.bf16.gmra.mxu1 %vm2553_vm11, %v4363_v45 }
 0x25b   : > { %4228 = vmatmul.msk.bf16.gmra.mxu2 %vm2553_vm11, %v4364_v48  ;;  %4312 = vmatmul.msk.bf16.gmra.mxu3 %vm2553_vm11, %v4381_v6 }
 0x267   : > { %v2617_v40 = vpop.f32.mrf.mxu1 }
 0x26a   : > { %4209 = vmatmul.msk.bf16.gmra.mxu1 %vm2553_vm11, %v4364_v48  ;;  %v4387_v48 = vld [vmem:[#allocation2 + $0x80] sm:$0xff] }
 0x26b   : > { %4229 = vmatmul.msk.bf16.gmra.mxu2 %vm2553_vm11, %v4365_v30  ;;  %4313 = vmatmul.msk.bf16.gmra.mxu3 %vm2553_vm11, %v4382_v12 }
 0x26e   : > { %v2720_v0 = vpop.f32.mrf.mxu2  ;;  %v2990_v63 = vpop.f32.mrf.mxu3 }
 0x26f   : > { %v2721_v22 = vadd.f32 %v2720_v0, %v2617_v40  ;;  %v2619_v3 = vpop.f32.mrf.mxu1 }
 0x271   : > { %v5900_v32 = vadd.f32 %v2990_v63, %v2721_v22 }
 0x276   : > { %v2722_v36 = vpop.f32.mrf.mxu2  ;;  %v2992_v31 = vpop.f32.mrf.mxu3 }
 0x277   : > { %v2723_v56 = vadd.f32 %v2722_v36, %v2619_v3  ;;  %v2622_v26 = vpop.f32.mrf.mxu1 }
 0x279   : > { %v5902_v17 = vadd.f32 %v2992_v31, %v2723_v56  ;;  %v4371_v31 = vld [vmem:[#allocation2 + $0x80] sm:$0xff] }
 0x27a   : > { %4210 = vmatmul.msk.bf16.gmra.mxu1 %vm2553_vm11, %v4365_v30 }
 0x27b   : > { %4230 = vmatmul.msk.bf16.gmra.mxu2 %vm2553_vm11, %v4366_v10  ;;  %4314 = vmatmul.msk.bf16.gmra.mxu3 %vm2553_vm11, %v4383_v28 }
 0x27e   : > { %v2725_v61 = vpop.f32.mrf.mxu2  ;;  %v2995_v38 = vpop.f32.mrf.mxu3 }
 0x27f   : > { %v2726_v5 = vadd.f32 %v2725_v61, %v2622_v26  ;;  %v2624_v58 = vpop.f32.mrf.mxu1  ;;  %v4388_v26 = vld [vmem:[#allocation2 + $0x88] sm:$0xff] }
 0x281   : > { %v5907_v44 = vadd.f32 %v2995_v38, %v2726_v5 }
 0x286   : > { %v2727_v21 = vpop.f32.mrf.mxu2  ;;  %v2997_v53 = vpop.f32.mrf.mxu3 }
 0x287   : > { %v2728_v52 = vadd.f32 %v2727_v21, %v2624_v58  ;;  %v2627_v43 = vpop.f32.mrf.mxu1 }
 0x289   : > { %v5909_v16 = vadd.f32 %v2997_v53, %v2728_v52 }
 0x28a   : > { %4211 = vmatmul.msk.bf16.gmra.mxu1 %vm2553_vm11, %v4366_v10 }
 0x28b   : > { %4231 = vmatmul.msk.bf16.gmra.mxu2 %vm2553_vm11, %v4367_v57  ;;  %4315 = vmatmul.msk.bf16.gmra.mxu3 %vm2553_vm11, %v4384_v24  ;;  %v4372_v24 = vld [vmem:[#allocation2 + $0x88] sm:$0xff] }
 0x28e   : > { %v2730_v9 = vpop.f32.mrf.mxu2  ;;  %v3000_v2 = vpop.f32.mrf.mxu3 }
 0x28f   : > { %v2731_v35 = vadd.f32 %v2730_v9, %v2627_v43  ;;  %v2629_v41 = vpop.f32.mrf.mxu1  ;;  %v4389_v43 = vld [vmem:[#allocation2 + $0x90] sm:$0xff] }
 0x291   : > { %v5914_v60 = vadd.f32 %v3000_v2, %v2731_v35 }
 0x296   : > { %v2732_v47 = vpop.f32.mrf.mxu2  ;;  %v3002_v59 = vpop.f32.mrf.mxu3 }
 0x297   : > { %v2733_v42 = vadd.f32 %v2732_v47, %v2629_v41  ;;  %v2632_v49 = vpop.f32.mrf.mxu1 }
 0x299   : > { %v5916_v4 = vadd.f32 %v3002_v59, %v2733_v42 }
 0x29a   : > { %4212 = vmatmul.msk.bf16.gmra.mxu1 %vm2553_vm11, %v4367_v57 }
 0x29b   : > { %4232 = vmatmul.msk.bf16.gmra.mxu2 %vm2553_vm11, %v4368_v20  ;;  %4316 = vmatmul.msk.bf16.gmra.mxu3 %vm2553_vm11, %v4385_v25 }
 0x29e   : > { %v2735_v54 = vpop.f32.mrf.mxu2  ;;  %v3005_v55 = vpop.f32.mrf.mxu3 }
 0x29f   : > { %v2736_v27 = vadd.f32 %v2735_v54, %v2632_v49  ;;  %v2634_v51 = vpop.f32.mrf.mxu1 }
 0x2a1   : > { %v5921_v19 = vadd.f32 %v3005_v55, %v2736_v27 }
 0x2a6   : > { %v2737_v23 = vpop.f32.mrf.mxu2  ;;  %v3007_v11 = vpop.f32.mrf.mxu3 }
 0x2a7   : > { %v2738_v1 = vadd.f32 %v2737_v23, %v2634_v51  ;;  %v2637_v14 = vpop.f32.mrf.mxu1 }
 0x2a9   : > { %v5923_v34 = vadd.f32 %v3007_v11, %v2738_v1 }
 0x2aa   : > { %4213 = vmatmul.msk.bf16.gmra.mxu1 %vm2553_vm11, %v4368_v20 }
 0x2ab   : > { %4233 = vmatmul.msk.bf16.gmra.mxu2 %vm2553_vm11, %v4369_v7  ;;  %4317 = vmatmul.msk.bf16.gmra.mxu3 %vm2553_vm11, %v4386_v33 }
 0x2ae   : > { %v2740_v37 = vpop.f32.mrf.mxu2  ;;  %v3010_v62 = vpop.f32.mrf.mxu3 }
 0x2af   : > { %v2741_v46 = vadd.f32 %v2740_v37, %v2637_v14  ;;  %v2639_v18 = vpop.f32.mrf.mxu1 }
 0x2b1   : > { %v5928_v8 = vadd.f32 %v3010_v62, %v2741_v46 }
 0x2b6   : > { %v2742_v50 = vpop.f32.mrf.mxu2  ;;  %v3012_v29 = vpop.f32.mrf.mxu3 }
 0x2b7   : > { %v2743_v15 = vadd.f32 %v2742_v50, %v2639_v18  ;;  %v2642_v13 = vpop.f32.mrf.mxu1 }
 0x2b9   : > { %v5930_v45 = vadd.f32 %v3012_v29, %v2743_v15 }
 0x2ba   : > { %4214 = vmatmul.msk.bf16.gmra.mxu1 %vm2553_vm11, %v4369_v7 }
 0x2bb   : > { %4234 = vmatmul.msk.bf16.gmra.mxu2 %vm2553_vm11, %v4370_v39  ;;  %4318 = vmatmul.msk.bf16.gmra.mxu3 %vm2553_vm11, %v4387_v48 }
 0x2be   : > { %v2745_v6 = vpop.f32.mrf.mxu2  ;;  %v3015_v30 = vpop.f32.mrf.mxu3 }
 0x2bf   : > { %v2746_v40 = vadd.f32 %v2745_v6, %v2642_v13  ;;  %v2644_v12 = vpop.f32.mrf.mxu1 }
 0x2c1   : > { %v5935_v0 = vadd.f32 %v3015_v30, %v2746_v40 }
 0x2c6   : > { %v2747_v22 = vpop.f32.mrf.mxu2  ;;  %v3017_v3 = vpop.f32.mrf.mxu3 }
 0x2c7   : > { %v2748_v63 = vadd.f32 %v2747_v22, %v2644_v12  ;;  %v2647_v36 = vpop.f32.mrf.mxu1 }
 0x2c9   : > { %v5937_v56 = vadd.f32 %v3017_v3, %v2748_v63 }
 0x2ca   : > { %4215 = vmatmul.msk.bf16.gmra.mxu1 %vm2553_vm11, %v4370_v39 }
 0x2cb   : > { %4235 = vmatmul.msk.bf16.gmra.mxu2 %vm2553_vm11, %v4371_v31  ;;  %4319 = vmatmul.msk.bf16.gmra.mxu3 %vm2553_vm11, %v4388_v26 }
 0x2ce   : > { %v2750_v10 = vpop.f32.mrf.mxu2  ;;  %v3020_v61 = vpop.f32.mrf.mxu3 }
 0x2cf   : > { %v2751_v28 = vadd.f32 %v2750_v10, %v2647_v36  ;;  %v2649_v5 = vpop.f32.mrf.mxu1 }
 0x2d1   : > { %v5942_v38 = vadd.f32 %v3020_v61, %v2751_v28 }
 0x2d6   : > { %v2752_v58 = vpop.f32.mrf.mxu2  ;;  %v3022_v52 = vpop.f32.mrf.mxu3 }
 0x2d7   : > { %v2753_v21 = vadd.f32 %v2752_v58, %v2649_v5  ;;  %v2652_v53 = vpop.f32.mrf.mxu1  ;;  %v3172_v58 = vmul.f32 %v5902_v17, %v5902_v17 }
 0x2d9   : > { %v5944_v57 = vadd.f32 %v3022_v52, %v2753_v21  ;;  %v3171_v21 = vmul.f32 %v5900_v32, %v5900_v32  ;;  %v3103_v52 = vsel %vm454_vm2, %v5902_v17, 0.0 }
 0x2da   : > { %4216 = vmatmul.msk.bf16.gmra.mxu1 %vm2553_vm11, %v4371_v31 }
 0x2db   : > { %4236 = vmatmul.msk.bf16.gmra.mxu2 %vm2553_vm11, %v4372_v24  ;;  %4320 = vmatmul.msk.bf16.gmra.mxu3 %vm2553_vm11, %v4389_v43  ;;  %v3102_v24 = vsel %vm454_vm2, %v5900_v32, 0.0 }
 0x2de   : > { %v2755_v9 = vpop.f32.mrf.mxu2  ;;  %v3025_v2 = vpop.f32.mrf.mxu3 }
 0x2df   : > { %v2756_v35 = vadd.f32 %v2755_v9, %v2652_v53  ;;  %v2654_v41 = vpop.f32.mrf.mxu1  ;;  %v3173_v53 = vmul.f32 %v5907_v44, %v5907_v44  ;;  %v3204_v9 = vsel %vm454_vm2, %v3172_v58, 0.0 }
 0x2e1   : > { %v5949_v47 = vadd.f32 %v3025_v2, %v2756_v35  ;;  %v3105_v35 = vsel %vm454_vm2, %v5907_v44, 0.0  ;;  %v3174_v2 = vmul.f32 %v5909_v16, %v5909_v16 }
 0x2e6   : > { %v2757_v42 = vpop.f32.mrf.mxu2  ;;  %v3027_v49 = vpop.f32.mrf.mxu3 }
 0x2e7   : > { %v2758_v59 = vadd.f32 %v2757_v42, %v2654_v41  ;;  %v2657_v20 = vpop.f32.mrf.mxu1  ;;  %v3104_v42 = vadd.f32 %v3103_v52, %v3102_v24  ;;  %v3115_v24 = vsel %vm454_vm2, %v5923_v34, 0.0 }
 0x2e9   : > { %v5951_v25 = vadd.f32 %v3027_v49, %v2758_v59  ;;  %v3203_v49 = vsel %vm454_vm2, %v3171_v21, 0.0 }
 0x2ee   : > { %v2760_v54 = vpop.f32.mrf.mxu2  ;;  %v3030_v55 = vpop.f32.mrf.mxu3 }
 0x2ef   : > { %v2761_v27 = vadd.f32 %v2760_v54, %v2657_v20  ;;  %v2659_v51 = vpop.f32.mrf.mxu1  ;;  %v3206_v20 = vsel %vm454_vm2, %v3173_v53, 0.0  ;;  %v3107_v54 = vsel %vm454_vm2, %v5909_v16, 0.0 }
 0x2f1   : > { %v5953_v23 = vadd.f32 %v3030_v55, %v2761_v27  ;;  %v3175_v27 = vmul.f32 %v5914_v60, %v5914_v60  ;;  %v3205_v55 = vadd.f32 %v3204_v9, %v3203_v49  ;;  %v3179_v9 = vmul.f32 %v5928_v8, %v5928_v8 }
 0x2f2   : > { %v3117_v49 = vsel %vm454_vm2, %v5928_v8, 0.0 }
 0x2f6   : > { %v2762_v1 = vpop.f32.mrf.mxu2  ;;  %v3032_v14 = vpop.f32.mrf.mxu3 }
 0x2f7   : > { %v2763_v11 = vadd.f32 %v2762_v1, %v2659_v51  ;;  %v2662_v7 = vpop.f32.mrf.mxu1  ;;  %v3106_v51 = vadd.f32 %v3105_v35, %v3104_v42  ;;  %v3208_v1 = vsel %vm454_vm2, %v3174_v2, 0.0 }
 0x2f9   : > { %v5955_v33 = vadd.f32 %v3032_v14, %v2763_v11  ;;  %v3109_v11 = vsel %vm454_vm2, %v5914_v60, 0.0  ;;  %v3176_v14 = vmul.f32 %v5916_v4, %v5916_v4 }
 0x2fe   : > { %v2765_v37 = vpop.f32.mrf.mxu2  ;;  %v3035_v62 = vpop.f32.mrf.mxu3 }
 0x2ff   : > { %v2766_v46 = vadd.f32 %v2765_v37, %v2662_v7  ;;  %v2664_v18 = vpop.f32.mrf.mxu1  ;;  %v3207_v7 = vadd.f32 %v3206_v20, %v3205_v55  ;;  %v3108_v37 = vadd.f32 %v3107_v54, %v3106_v51  ;;  %v3180_v20 = vmul.f32 %v5930_v45, %v5930_v45 }
 0x300   : > { %v3218_v55 = vsel %vm454_vm2, %v3179_v9, 0.0  ;;  %v3119_v51 = vsel %vm454_vm2, %v5930_v45, 0.0  ;;  %v3125_v9 = vsel %vm454_vm2, %v5942_v38, 0.0 }
 0x301   : > { %v5957_v50 = vadd.f32 %v3035_v62, %v2766_v46  ;;  %v3210_v46 = vsel %vm454_vm2, %v3175_v27, 0.0  ;;  %v3111_v62 = vsel %vm454_vm2, %v5916_v4, 0.0 }
 0x306   : > { %v2767_v15 = vpop.f32.mrf.mxu2  ;;  %v3037_v13 = vpop.f32.mrf.mxu3 }
 0x307   : > { %v2768_v29 = vadd.f32 %v2767_v15, %v2664_v18  ;;  %v2667_v39 = vpop.f32.mrf.mxu1  ;;  %v3177_v18 = vmul.f32 %v5921_v19, %v5921_v19  ;;  %v3209_v15 = vadd.f32 %v3208_v1, %v3207_v7  ;;  %v3181_v1 = vmul.f32 %v5935_v0, %v5935_v0 }
 0x309   : > { %v5959_v48 = vadd.f32 %v3037_v13, %v2768_v29  ;;  %v3110_v29 = vadd.f32 %v3109_v11, %v3108_v37  ;;  %v3211_v58 = vadd.f32 %v3210_v46, %v3209_v15  ;;  %v3214_v53 = vsel %vm454_vm2, %v3177_v18, 0.0 }
 0x30a   : > { %v3220_v37 = vsel %vm454_vm2, %v3180_v20, 0.0  ;;  %v3121_v46 = vsel %vm454_vm2, %v5935_v0, 0.0  ;;  %v3127_v20 = vsel %vm454_vm2, %v5944_v57, 0.0 }
 0x30b   : > { %v3112_v21 = vadd.f32 %v3111_v62, %v3110_v29  ;;  %v3182_v62 = vmul.f32 %v5937_v56, %v5937_v56 }
 0x30e   : > { %v2770_v6 = vpop.f32.mrf.mxu2  ;;  %v3040_v30 = vpop.f32.mrf.mxu3 }
 0x30f   : > { %v2771_v40 = vadd.f32 %v2770_v6, %v2667_v39  ;;  %v5961_v12 = vpop.f32.mrf.mxu1  ;;  %v3212_v39 = vsel %vm454_vm2, %v3176_v14, 0.0  ;;  %v3113_v6 = vsel %vm454_vm2, %v5921_v19, 0.0 }
 0x310   : > { %v3213_v35 = vadd.f32 %v3212_v39, %v3211_v58  ;;  %v3114_v2 = vadd.f32 %v3113_v6, %v3112_v21  ;;  %v3222_v6 = vsel %vm454_vm2, %v3181_v1, 0.0  ;;  %v3183_v58 = vmul.f32 %v5942_v38, %v5942_v38 }
 0x311   : > { %v5963_v22 = vadd.f32 %v3040_v30, %v2771_v40  ;;  %v3178_v40 = vmul.f32 %v5923_v34, %v5923_v34 }
 0x312   : > { %v3215_v54 = vadd.f32 %v3214_v53, %v3213_v35  ;;  %v3116_v27 = vadd.f32 %v3115_v24, %v3114_v2  ;;  %v3224_v24 = vsel %vm454_vm2, %v3182_v62, 0.0  ;;  %v3184_v35 = vmul.f32 %v5944_v57, %v5944_v57 }
 0x313   : > { %v3216_v42 = vsel %vm454_vm2, %v3178_v40, 0.0  ;;  %v3123_v40 = vsel %vm454_vm2, %v5937_v56, 0.0 }
 0x314   : > { %v3217_v11 = vadd.f32 %v3216_v42, %v3215_v54  ;;  %v3118_v14 = vadd.f32 %v3117_v49, %v3116_v27  ;;  %v3226_v49 = vsel %vm454_vm2, %v3183_v58, 0.0  ;;  %v3185_v54 = vmul.f32 %v5949_v47, %v5949_v47 }
 0x315   : > { %v3228_v1 = vsel %vm454_vm2, %v3184_v35, 0.0 }
 0x316   : > { %v5965_v63 = vpop.f32.mrf.mxu2  ;;  %v5967_v3 = vpop.f32.mrf.mxu3  ;;  %v3219_v15 = vadd.f32 %v3218_v55, %v3217_v11  ;;  %v3120_v29 = vadd.f32 %v3119_v51, %v3118_v14  ;;  %v3129_v11 = vsel %vm454_vm2, %v5949_v47, 0.0  ;;  %v3186_v14 = vmul.f32 %v5951_v25, %v5951_v25 }
 0x317   : > { %v5969_v36 = vpop.f32.mrf.mxu1  ;;  %v2773_v35 = vadd.f32 %v5965_v63, %v5961_v12  ;;  %v3137_v12 = vsel %vm454_vm2, %v5957_v50, 0.0  ;;  %v3190_v63 = vmul.f32 %v5959_v48, %v5959_v48 }
 0x318   : > { %v3221_v21 = vadd.f32 %v3220_v37, %v3219_v15  ;;  %v3122_v53 = vadd.f32 %v3121_v46, %v3120_v29  ;;  %v3230_v29 = vsel %vm454_vm2, %v3185_v54, 0.0  ;;  %v3135_v54 = vsel %vm454_vm2, %v5955_v33, 0.0 }
 0x31a   : > { %v3223_v2 = vadd.f32 %v3222_v6, %v3221_v21  ;;  %v3124_v42 = vadd.f32 %v3123_v40, %v3122_v53  ;;  %v3131_v6 = vsel %vm454_vm2, %v5951_v25, 0.0  ;;  %v3187_v40 = vmul.f32 %v5953_v23, %v5953_v23 }
 0x31b   : > { %v3188_v53 = vmul.f32 %v5955_v33, %v5955_v33 }
 0x31c   : > { %v3225_v27 = vadd.f32 %v3224_v24, %v3223_v2  ;;  %v3126_v55 = vadd.f32 %v3125_v9, %v3124_v42  ;;  %v3232_v24 = vsel %vm454_vm2, %v3186_v14, 0.0  ;;  %v3133_v9 = vsel %vm454_vm2, %v5953_v23, 0.0 }
 0x31e   : > { %v5971_v31 = vpop.f32.mrf.mxu2  ;;  %v5973_v26 = vpop.f32.mrf.mxu3  ;;  %v3227_v46 = vadd.f32 %v3226_v49, %v3225_v27  ;;  %v3128_v62 = vadd.f32 %v3127_v20, %v3126_v55  ;;  %v3234_v20 = vsel %vm454_vm2, %v3187_v40, 0.0  ;;  %v3189_v27 = vmul.f32 %v5957_v50, %v5957_v50 }
 0x31f   : > { %v5975_v10 = vpop.f32.mrf.mxu1  ;;  %v2776_v49 = vadd.f32 %v5971_v31, %v5969_v36  ;;  %v6104_v36 = vadd.f32 %v5967_v3, %v2773_v35 }
 0x320   : > { %v3229_v58 = vadd.f32 %v3228_v1, %v3227_v46  ;;  %v3130_v21 = vadd.f32 %v3129_v11, %v3128_v62  ;;  %v3236_v11 = vsel %vm454_vm2, %v3188_v53, 0.0  ;;  %v3238_v40 = vsel %vm454_vm2, %v3189_v27, 0.0 }
 0x321   : > { %v3192_v35 = vmul.f32 %v6104_v36, %v6104_v36 }
 0x322   : > { %v3231_v2 = vadd.f32 %v3230_v29, %v3229_v58  ;;  %v3132_v42 = vadd.f32 %v3131_v6, %v3130_v21  ;;  %v6109_v6 = vadd.f32 %v5973_v26, %v2776_v49  ;;  %v3139_v58 = vsel %vm454_vm2, %v5959_v48, 0.0 }
 0x323   : > { %v3191_v21 = vmul.f32 %v5963_v22, %v5963_v22  ;;  %v3240_v26 = vsel %vm454_vm2, %v3190_v63, 0.0 }
 0x324   : > { %v3233_v55 = vadd.f32 %v3232_v24, %v3231_v2  ;;  %v3134_v1 = vadd.f32 %v3133_v9, %v3132_v42  ;;  %v3141_v9 = vsel %vm454_vm2, %v5963_v22, 0.0 }
 0x326   : > { %v5977_v28 = vpop.f32.mrf.mxu2  ;;  %v5979_v61 = vpop.f32.mrf.mxu3  ;;  %v3235_v62 = vadd.f32 %v3234_v20, %v3233_v55  ;;  %v3136_v29 = vadd.f32 %v3135_v54, %v3134_v1  ;;  %v3244_v1 = vsel %vm454_vm2, %v3192_v35, 0.0 }
 0x327   : > { %v5981_v5 = vpop.f32.mrf.mxu1  ;;  %v2778_v31 = vadd.f32 %v5977_v28, %v5975_v10 }
 0x328   : > { %v3237_v53 = vadd.f32 %v3236_v11, %v3235_v62  ;;  %v3138_v24 = vadd.f32 %v3137_v12, %v3136_v29  ;;  %v3145_v11 = vsel %vm454_vm2, %v6109_v6, 0.0 }
 0x329   : > { %v6126_v2 = vadd.f32 %v5979_v61, %v2778_v31 }
 0x32a   : > { %v3239_v42 = vadd.f32 %v3238_v40, %v3237_v53  ;;  %v3140_v49 = vadd.f32 %v3139_v58, %v3138_v24 }
 0x32b   : > { %v3194_v12 = vmul.f32 %v6126_v2, %v6126_v2 }
 0x32c   : > { %v3241_v54 = vadd.f32 %v3240_v26, %v3239_v42  ;;  %v3142_v27 = vadd.f32 %v3141_v9, %v3140_v49 }
 0x32e   : > { %v5991_v43 = vpop.f32.mrf.mxu2  ;;  %v6000_v41 = vpop.f32.mrf.mxu3 }
 0x32f   : > { %v6002_v59 = vpop.f32.mrf.mxu1  ;;  %v2781_v3 = vadd.f32 %v5991_v43, %v5981_v5  ;;  %v3193_v5 = vmul.f32 %v6109_v6, %v6109_v6  ;;  %v3242_v43 = vsel %vm454_vm2, %v3191_v21, 0.0 }
 0x330   : > { %v3243_v31 = vadd.f32 %v3242_v43, %v3241_v54 }
 0x332   : > { %v3245_v58 = vadd.f32 %v3244_v1, %v3243_v31 }
 0x336   : > { %v6020_v13 = vpop.f32.mrf.mxu2  ;;  %v6027_v30 = vpop.f32.mrf.mxu3 }
 0x337   : > { %v6029_v52 = vpop.f32.mrf.mxu1  ;;  %v2783_v10 = vadd.f32 %v6020_v13, %v6002_v59  ;;  %v3143_v59 = vsel %vm454_vm2, %v6104_v36, 0.0  ;;  %v6134_v13 = vadd.f32 %v6000_v41, %v2781_v3 }
 0x338   : > { %v3144_v62 = vadd.f32 %v3143_v59, %v3142_v27 }
 0x339   : > { %v6139_v61 = vadd.f32 %v6027_v30, %v2783_v10  ;;  %v3147_v30 = vsel %vm454_vm2, %v6126_v2, 0.0  ;;  %v3149_v3 = vsel %vm454_vm2, %v6134_v13, 0.0 }
 0x33a   : > { %v3146_v21 = vadd.f32 %v3145_v11, %v3144_v62 }
 0x33c   : > { %v3148_v26 = vadd.f32 %v3147_v30, %v3146_v21 }
 0x33e   : > { %v6046_v7 = vpop.f32.mrf.mxu2  ;;  %v6053_v18 = vpop.f32.mrf.mxu3  ;;  %v3150_v49 = vadd.f32 %v3149_v3, %v3148_v26 }
 0x33f   : > { %v6055_v39 = vpop.f32.mrf.mxu1  ;;  %v2786_v20 = vadd.f32 %v6046_v7, %v6029_v52  ;;  %v3246_v52 = vsel %vm454_vm2, %v3193_v5, 0.0  ;;  %v3195_v7 = vmul.f32 %v6134_v13, %v6134_v13 }
 0x340   : > { %v3247_v10 = vadd.f32 %v3246_v52, %v3245_v58 }
 0x341   : > { %v6153_v29 = vadd.f32 %v6053_v18, %v2786_v20  ;;  %v3250_v18 = vsel %vm454_vm2, %v3195_v7, 0.0 }
 0x346   : > { %v2787_v51 = vpop.f32.mrf.mxu2  ;;  %v6077_v37 = vpop.f32.mrf.mxu3 }
 0x347   : > { %v2687_v15 = vpop.f32.mrf.mxu1  ;;  %v2788_v41 = vadd.f32 %v2787_v51, %v6055_v39  ;;  %v3196_v39 = vmul.f32 %v6139_v61, %v6139_v61  ;;  %v3248_v51 = vsel %vm454_vm2, %v3194_v12, 0.0 }
 0x348   : > { %v3249_v42 = vadd.f32 %v3248_v51, %v3247_v10 }
 0x349   : > { %v6161_v53 = vadd.f32 %v6077_v37, %v2788_v41  ;;  %v3252_v5 = vsel %vm454_vm2, %v3196_v39, 0.0 }
 0x34a   : > { %v3251_v27 = vadd.f32 %v3250_v18, %v3249_v42 }
 0x34b   : > { %v3198_v43 = vmul.f32 %v6161_v53, %v6161_v53  ;;  %v3155_v1 = vsel %vm454_vm2, %v6161_v53, 0.0 }
 0x34c   : > { %v3253_v41 = vadd.f32 %v3252_v5, %v3251_v27 }
 0x34d   : > { %v3256_v62 = vsel %vm454_vm2, %v3198_v43, 0.0 }
 0x34e   : > { %v2790_v14 = vpop.f32.mrf.mxu2  ;;  %v3060_v46 = vpop.f32.mrf.mxu3 }
 0x34f   : > { %v2689_v28 = vpop.f32.mrf.mxu1  ;;  %v2791_v40 = vadd.f32 %v2790_v14, %v2687_v15  ;;  %v3151_v15 = vsel %vm454_vm2, %v6139_v61, 0.0  ;;  %v3197_v14 = vmul.f32 %v6153_v29, %v6153_v29 }
 0x351   : > { %v6168_v35 = vadd.f32 %v3060_v46, %v2791_v40  ;;  %v3254_v46 = vsel %vm454_vm2, %v3197_v14, 0.0 }
 0x352   : > { %v3255_v30 = vadd.f32 %v3254_v46, %v3253_v41 }
 0x353   : > { %v3199_v11 = vmul.f32 %v6168_v35, %v6168_v35 }
 0x354   : > { %v3257_v39 = vadd.f32 %v3256_v62, %v3255_v30 }
 0x355   : > { %v3258_v40 = vsel %vm454_vm2, %v3199_v11, 0.0 }
 0x356   : > { %v2792_v55 = vpop.f32.mrf.mxu2  ;;  %v3062_v63 = vpop.f32.mrf.mxu3  ;;  %v3259_v18 = vadd.f32 %v3258_v40, %v3257_v39 }
 0x357   : > { %v2793_v24 = vadd.f32 %v2792_v55, %v2689_v28  ;;  %v2692_v9 = vpop.f32.mrf.mxu1  ;;  %v3153_v28 = vsel %vm454_vm2, %v6153_v29, 0.0  ;;  %v3152_v55 = vadd.f32 %v3151_v15, %v3150_v49 }
 0x359   : > { %v6175_v59 = vadd.f32 %v3062_v63, %v2793_v24  ;;  %v3154_v31 = vadd.f32 %v3153_v28, %v3152_v55  ;;  %v3157_v63 = vsel %vm454_vm2, %v6168_v35, 0.0 }
 0x35b   : > { %v3200_v52 = vmul.f32 %v6175_v59, %v6175_v59  ;;  %v3156_v7 = vadd.f32 %v3155_v1, %v3154_v31  ;;  %v3159_v58 = vsel %vm454_vm2, %v6175_v59, 0.0 }
 0x35d   : > { %v3158_v51 = vadd.f32 %v3157_v63, %v3156_v7  ;;  %v3260_v10 = vsel %vm454_vm2, %v3200_v52, 0.0 }
 0x35e   : > { %v2795_v37 = vpop.f32.mrf.mxu2  ;;  %v3065_v54 = vpop.f32.mrf.mxu3  ;;  %v3261_v5 = vadd.f32 %v3260_v10, %v3259_v18 }
 0x35f   : > { %v2796_v20 = vadd.f32 %v2795_v37, %v2692_v9  ;;  %v2694_v3 = vpop.f32.mrf.mxu1  ;;  %v3160_v15 = vadd.f32 %v3159_v58, %v3158_v51 }
 0x361   : > { %v6182_v12 = vadd.f32 %v3065_v54, %v2796_v20 }
 0x363   : > { %v3201_v21 = vmul.f32 %v6182_v12, %v6182_v12  ;;  %v3161_v26 = vsel %vm454_vm2, %v6182_v12, 0.0 }
 0x364   : > { %v3162_v37 = vadd.f32 %v3161_v26, %v3160_v15 }
 0x365   : > { %v3262_v42 = vsel %vm454_vm2, %v3201_v21, 0.0 }
 0x366   : > { %v2797_v24 = vpop.f32.mrf.mxu2  ;;  %v3067_v14 = vpop.f32.mrf.mxu3  ;;  %v3263_v20 = vadd.f32 %v3262_v42, %v3261_v5 }
 0x367   : > { %v2798_v9 = vadd.f32 %v2797_v24, %v2694_v3 }
 0x369   : > { %v6198_v49 = vadd.f32 %v3067_v14, %v2798_v9 }
 0x36b   : > { %v3163_v28 = vsel %vm454_vm2, %v6198_v49, 0.0  ;;  %v3202_v43 = vmul.f32 %v6198_v49, %v6198_v49 }
 0x36c   : > { %v3164_v54 = vadd.f32 %v3163_v28, %v3162_v37 }
 0x36d   : > { %v3264_v27 = vsel %vm454_vm2, %v3202_v43, 0.0 }
 0x36e   : > { %v3165_v55 = vrot.slane %v3164_v54, 4  ;;  %v3265_v46 = vadd.f32 %v3264_v27, %v3263_v20 }
 0x370   : > { %v3166_v1 = vadd.f32 %v3165_v55, %v3164_v54  ;;  %v3266_v11 = vrot.slane %v3265_v46, 4 }
 0x372   : > { %v3167_v41 = vrot.slane %v3166_v1, 2  ;;  %v3267_v31 = vadd.f32 %v3266_v11, %v3265_v46 }
 0x374   : > { %v3168_v62 = vadd.f32 %v3167_v41, %v3166_v1  ;;  %v3268_v63 = vrot.slane %v3267_v31, 2 }
 0x376   : > { %v3169_v52 = vrot.slane %v3168_v62, 1  ;;  %v3269_v30 = vadd.f32 %v3268_v63, %v3267_v31 }
 0x378   : > { %v3170_v7 = vadd.f32 %v3169_v52, %v3168_v62  ;;  %v3270_v40 = vrot.slane %v3269_v30, 1 }
 0x37a   : > { %v6205_v58 = vmul.f32 0.00390625, %v3170_v7  ;;  %v3271_v39 = vadd.f32 %v3270_v40, %v3269_v30 }
 0x37c   : > { %v3319_v21 = vsub.f32 %v6198_v49, %v6205_v58  ;;  %v3273_v51 = vmul.f32 0.00390625, %v3271_v39  ;;  %v3314_v3 = vsub.f32 %v6153_v29, %v6205_v58  ;;  %v3315_v24 = vsub.f32 %v6161_v53, %v6205_v58 }
 0x37d   : > { %v3316_v10 = vsub.f32 %v6168_v35, %v6205_v58  ;;  %v3317_v26 = vsub.f32 %v6175_v59, %v6205_v58  ;;  %v3318_v9 = vsub.f32 %v6182_v12, %v6205_v58  ;;  %v3274_v18 = vmul.f32 %v6205_v58, %v6205_v58  ;;  %v3368_v59 = vld [vmem:[%s6923_s3] sm:$0x3] }
 0x37e   : > { %v3370_v20 = vunpack.c.l.bf16 %v3368_v59  ;;  %v3288_v55 = vsub.f32 %v5900_v32, %v6205_v58  ;;  %v3289_v46 = vsub.f32 %v5902_v17, %v6205_v58  ;;  %v3290_v63 = vsub.f32 %v5907_v44, %v6205_v58 }
 0x37f   : > { %v3275_v15 = vsub.f32 %v3273_v51, %v3274_v18  ;;  %v3291_v52 = vsub.f32 %v5909_v16, %v6205_v58  ;;  %v3292_v17 = vsub.f32 %v5914_v60, %v6205_v58  ;;  %v3293_v40 = vsub.f32 %v5916_v4, %v6205_v58 }
 0x380   : > { %v3320_v41 = vmax.f32 %v3288_v55, 0.0  ;;  %v3321_v31 = vmax.f32 %v3289_v46, 0.0  ;;  %v3322_v30 = vmax.f32 %v3290_v63, 0.0  ;;  %v3294_v44 = vsub.f32 %v5921_v19, %v6205_v58 }
 0x381   : > { %v3276_v14 = vmax.f32 %v3275_v15, 0.0  ;;  %v3323_v32 = vmax.f32 %v3291_v52, 0.0  ;;  %v3324_v39 = vmax.f32 %v3292_v17, 0.0  ;;  %v3325_v51 = vmax.f32 %v3293_v40, 0.0 }
 0x382   : > { %v3352_v62 = vpack.c.bf16 %v3321_v31, %v3320_v41  ;;  %v3295_v16 = vsub.f32 %v5923_v34, %v6205_v58  ;;  %v3326_v15 = vmax.f32 %v3294_v44, 0.0  ;;  %v3296_v60 = vsub.f32 %v5928_v8, %v6205_v58 }
 0x383   : > { %v3277_v42 = vadd.f32 1e-05, %v3276_v14  ;;  %v3353_v7 = vpack.c.bf16 %v3323_v32, %v3322_v30  ;;  %v3354_v18 = vpack.c.bf16 %v3325_v51, %v3324_v39  ;;  %v3297_v4 = vsub.f32 %v5930_v45, %v6205_v58 }
 0x384   : > { %v3327_v14 = vmax.f32 %v3295_v16, 0.0  ;;  %v3298_v19 = vsub.f32 %v5935_v0, %v6205_v58  ;;  %v3299_v34 = vsub.f32 %v5937_v56, %v6205_v58  ;;  %v6259_v8 = vmax.f32 %v3314_v3, 0.0 }
 0x385   : > { %4516 = vrsqrt.f32 %v3277_v42  ;;  %vm3284_vm14 = vweird.f32 %v3277_v42  ;;  %v6263_v45 = vmax.f32 %v3316_v10, 0.0  ;;  %v6267_v59 = vmax.f32 %v3318_v9, 0.0 }
 0x386   : > { %v3331_v0 = vmax.f32 %v3299_v34, 0.0  ;;  %v3301_v10 = vsub.f32 %v5944_v57, %v6205_v58  ;;  %v3305_v57 = vsub.f32 %v5955_v33, %v6205_v58  ;;  %v3308_v32 = vsub.f32 %v5963_v22, %v6205_v58 }
 0x387   : > { %v3310_v51 = vsub.f32 %v6109_v6, %v6205_v58 }
 0x388   : > { %v3333_v9 = vmax.f32 %v3301_v10, 0.0  ;;  %v3340_v17 = vmax.f32 %v3308_v32, 0.0 }
 0x389   : > { %v3342_v44 = vmax.f32 %v3310_v51, 0.0 }
 0x38b   : > { %v4517_v29 = vpop.eup %4516 }
 0x38c   : > { %v3279_v5 = vmul.f32 %v4517_v29, %v3277_v42  ;;  %vm3285_vm12 = vweird.f32 %v4517_v29  ;;  %v3355_v42 = vpack.c.bf16 %v3327_v14, %v3326_v15  ;;  %v3312_v14 = vsub.f32 %v6134_v13, %v6205_v58 }
 0x38d   : > { %vm3286_vm4 = vmor %vm3284_vm14, %vm3285_vm12 }
 0x38e   : > { %v3280_v37 = vmul.f32 %v4517_v29, %v3279_v5  ;;  %v3329_v5 = vmax.f32 %v3297_v4, 0.0 }
 0x390   : > { %v3281_v53 = vmul.f32 0.5, %v3280_v37 }
 0x392   : > { %v3282_v28 = vsub.f32 1.5, %v3281_v53  ;;  %v6257_v53 = vmax.f32 %v3319_v21, 0.0 }
 0x394   : > { %v3283_v35 = vmul.f32 %v4517_v29, %v3282_v28  ;;  %v6261_v28 = vmax.f32 %v3315_v24, 0.0  ;;  %v3367_v21 = vpack.c.bf16 %v6257_v53, %v6267_v59  ;;  %v3300_v24 = vsub.f32 %v5942_v38, %v6205_v58 }
 0x395   : > { %v3304_v38 = vsub.f32 %v5953_v23, %v6205_v58 }
 0x396   : > { %v3287_v12 = vsel %vm3286_vm4, %v4517_v29, %v3283_v35  ;;  %v3328_v29 = vmax.f32 %v3296_v60, 0.0  ;;  %v6265_v35 = vmax.f32 %v3317_v26, 0.0  ;;  %v3365_v56 = vpack.c.bf16 %v6261_v28, %v6259_v8 }
 0x397   : > { %v3369_v43 = vpack.c.bf16 %v3287_v12, %v3287_v12  ;;  %v3330_v12 = vmax.f32 %v3298_v19, 0.0  ;;  %v3332_v26 = vmax.f32 %v3300_v24, 0.0  ;;  %v3344_v60 = vmax.f32 %v3312_v14, 0.0 }
 0x398   : > { %v3356_v37 = vpack.c.bf16 %v3329_v5, %v3328_v29  ;;  %v3366_v49 = vpack.c.bf16 %v6265_v35, %v6263_v45 }
 0x399   : > { %v3371_v54 = vunpack.c.l.bf16 %v3369_v43  ;;  %v3357_v3 = vpack.c.bf16 %v3331_v0, %v3330_v12  ;;  %v3358_v43 = vpack.c.bf16 %v3333_v9, %v3332_v26 }
 0x39b   : > { %v3372_v27 = vmul.f32 %v3371_v54, %v3370_v20  ;;  %v3302_v20 = vsub.f32 %v5949_v47, %v6205_v58  ;;  %v3303_v54 = vsub.f32 %v5951_v25, %v6205_v58  ;;  %v3306_v25 = vsub.f32 %v5957_v50, %v6205_v58 }
 0x39d   : > { %v3373_v1 = vpack.c.bf16 %v3372_v27, %v3372_v27  ;;  %v3334_v27 = vmax.f32 %v3302_v20, 0.0  ;;  %v3335_v55 = vmax.f32 %v3303_v54, 0.0  ;;  %v3338_v63 = vmax.f32 %v3306_v25, 0.0 }
 0x39f   : > { %v3423_v11 = vsel %vm454_vm2, %v3373_v1, 0  ;;  %v3359_v46 = vpack.c.bf16 %v3335_v55, %v3334_v27  ;;  %v3336_v1 = vmax.f32 %v3304_v38, 0.0 }
 0x3a0   : > { %3432 = vmatpush.bf16.xpose.msrb.mxu0 %v3423_v11  ;;  %v3337_v11 = vmax.f32 %v3305_v57, 0.0 }
 0x3a2   : > { %v3360_v31 = vpack.c.bf16 %v3337_v11, %v3336_v1 }
 0x3a7   : > { %4321 = vmatmul.msk.bf16.vlgmr.msrb.gmra.mxu0 %vm454_vm2, %v3352_v62  ;;  %v3307_v62 = vsub.f32 %v5959_v48, %v6205_v58 }
 0x3a9   : > { %v3339_v23 = vmax.f32 %v3307_v62, 0.0 }
 0x3ab   : > { %v3361_v33 = vpack.c.bf16 %v3339_v23, %v3338_v63 }
 0x3b7   : > { %4322 = vmatmul.msk.bf16.gmra.mxu0 %vm454_vm2, %v3353_v7  ;;  %v3309_v7 = vsub.f32 %v6104_v36, %v6205_v58 }
 0x3b9   : > { %v3341_v50 = vmax.f32 %v3309_v7, 0.0 }
 0x3bb   : > { %v3362_v48 = vpack.c.bf16 %v3341_v50, %v3340_v17 }
 0x3c7   : > { %4323 = vmatmul.msk.bf16.gmra.mxu0 %vm454_vm2, %v3354_v18  ;;  %v3311_v18 = vsub.f32 %v6126_v2, %v6205_v58 }
 0x3c9   : > { %v3343_v22 = vmax.f32 %v3311_v18, 0.0 }
 0x3cb   : > { %v3363_v36 = vpack.c.bf16 %v3343_v22, %v3342_v44 }
 0x3d7   : > { %4324 = vmatmul.msk.bf16.gmra.mxu0 %vm454_vm2, %v3355_v42  ;;  %v3313_v42 = vsub.f32 %v6139_v61, %v6205_v58 }
 0x3d9   : > { %v3345_v6 = vmax.f32 %v3313_v42, 0.0 }
 0x3db   : > { %v3364_v2 = vpack.c.bf16 %v3345_v6, %v3344_v60 }
 0x3e7   : > { %4325 = vmatmul.msk.bf16.gmra.mxu0 %vm454_vm2, %v3356_v37 }
 0x3f7   : > { %4326 = vmatmul.msk.bf16.gmra.mxu0 %vm454_vm2, %v3357_v3 }
 0x407   : > { %4327 = vmatmul.msk.bf16.gmra.mxu0 %vm454_vm2, %v3358_v43 }
 0x417   : > { %4328 = vmatmul.msk.bf16.gmra.mxu0 %vm454_vm2, %v3359_v46 }
 0x424   : > { %v6290_v41 = vpop.f32.mrf.mxu0 }
 0x425   : > { %v3514_v3 = vsel %vm312_vm1, %v6290_v41, 0.0 }
 0x427   : > { %4329 = vmatmul.msk.bf16.gmra.mxu0 %vm454_vm2, %v3360_v31 }
 0x42c   : > { %v6293_v47 = vpop.f32.mrf.mxu0 }
 0x42d   : > { %v3584_v0 = vmul.f32 %v6293_v47, %v6293_v47 }
 0x42f   : > { %v3616_v24 = vsel %vm312_vm1, %v3584_v0, 0.0 }
 0x434   : > { %v6299_v52 = vpop.f32.mrf.mxu0 }
 0x435   : > { %v3517_v10 = vsel %vm312_vm1, %v6299_v52, 0.0 }
 0x437   : > { %4330 = vmatmul.msk.bf16.gmra.mxu0 %vm454_vm2, %v3361_v33 }
 0x43c   : > { %v6302_v30 = vpop.f32.mrf.mxu0 }
 0x43d   : > { %v3586_v26 = vmul.f32 %v6302_v30, %v6302_v30  ;;  %v3519_v54 = vsel %vm312_vm1, %v6302_v30, 0.0 }
 0x43f   : > { %v3620_v57 = vsel %vm312_vm1, %v3586_v26, 0.0 }
 0x444   : > { %v6308_v40 = vpop.f32.mrf.mxu0 }
 0x445   : > { %v3587_v27 = vmul.f32 %v6308_v40, %v6308_v40  ;;  %v3521_v1 = vsel %vm312_vm1, %v6308_v40, 0.0 }
 0x447   : > { %4331 = vmatmul.msk.bf16.gmra.mxu0 %vm454_vm2, %v3362_v48  ;;  %v3622_v62 = vsel %vm312_vm1, %v3587_v27, 0.0 }
 0x44c   : > { %v6311_v39 = vpop.f32.mrf.mxu0 }
 0x44d   : > { %v3588_v11 = vmul.f32 %v6311_v39, %v6311_v39  ;;  %v3523_v63 = vsel %vm312_vm1, %v6311_v39, 0.0 }
 0x44f   : > { %v3624_v7 = vsel %vm312_vm1, %v3588_v11, 0.0 }
 0x454   : > { %v6317_v16 = vpop.f32.mrf.mxu0 }
 0x455   : > { %v3589_v23 = vmul.f32 %v6317_v16, %v6317_v16  ;;  %v3525_v17 = vsel %vm312_vm1, %v6317_v16, 0.0 }
 0x457   : > { %4332 = vmatmul.msk.bf16.gmra.mxu0 %vm454_vm2, %v3363_v36  ;;  %v3626_v18 = vsel %vm312_vm1, %v3589_v23, 0.0 }
 0x45c   : > { %v6320_v15 = vpop.f32.mrf.mxu0 }
 0x45d   : > { %v3590_v50 = vmul.f32 %v6320_v15, %v6320_v15  ;;  %v3527_v44 = vsel %vm312_vm1, %v6320_v15, 0.0 }
 0x45f   : > { %v3628_v60 = vsel %vm312_vm1, %v3590_v50, 0.0 }
 0x464   : > { %v6326_v4 = vpop.f32.mrf.mxu0 }
 0x465   : > { %v3591_v22 = vmul.f32 %v6326_v4, %v6326_v4  ;;  %v3529_v6 = vsel %vm312_vm1, %v6326_v4, 0.0 }
 0x467   : > { %4333 = vmatmul.msk.bf16.gmra.mxu0 %vm454_vm2, %v3364_v2 }
 0x46c   : > { %v6329_v29 = vpop.f32.mrf.mxu0 }
 0x46d   : > { %v3592_v2 = vmul.f32 %v6329_v29, %v6329_v29 }
 0x46f   : > { %v3632_v26 = vsel %vm312_vm1, %v3592_v2, 0.0 }
 0x474   : > { %v6331_v5 = vpop.f32.mrf.mxu0 }
 0x477   : > { %4334 = vmatmul.msk.bf16.gmra.mxu0 %vm454_vm2, %v3365_v56  ;;  %v3583_v56 = vmul.f32 %v6290_v41, %v6290_v41 }
 0x479   : > { %v3615_v43 = vsel %vm312_vm1, %v3583_v56, 0.0 }
 0x47a   : > { %v3617_v46 = vadd.f32 %v3616_v24, %v3615_v43 }
 0x47c   : > { %v6334_v37 = vpop.f32.mrf.mxu0 }
 0x47d   : > { %v3594_v43 = vmul.f32 %v6334_v37, %v6334_v37 }
 0x484   : > { %v6336_v19 = vpop.f32.mrf.mxu0 }
 0x487   : > { %4335 = vmatmul.msk.bf16.gmra.mxu0 %vm454_vm2, %v3366_v49  ;;  %v3515_v49 = vsel %vm312_vm1, %v6293_v47, 0.0 }
 0x488   : > { %v3516_v9 = vadd.f32 %v3515_v49, %v3514_v3  ;;  %v3630_v49 = vsel %vm312_vm1, %v3591_v22, 0.0  ;;  %v3593_v3 = vmul.f32 %v6331_v5, %v6331_v5 }
 0x48a   : > { %v3518_v55 = vadd.f32 %v3517_v10, %v3516_v9  ;;  %v3533_v9 = vsel %vm312_vm1, %v6331_v5, 0.0  ;;  %v3634_v27 = vsel %vm312_vm1, %v3593_v3, 0.0 }
 0x48c   : > { %v6339_v13 = vpop.f32.mrf.mxu0  ;;  %v3520_v25 = vadd.f32 %v3519_v54, %v3518_v55  ;;  %v3535_v55 = vsel %vm312_vm1, %v6334_v37, 0.0 }
 0x48e   : > { %v3522_v33 = vadd.f32 %v3521_v1, %v3520_v25  ;;  %v3537_v25 = vsel %vm312_vm1, %v6336_v19, 0.0 }
 0x490   : > { %v3524_v51 = vadd.f32 %v3523_v63, %v3522_v33 }
 0x492   : > { %v3526_v36 = vadd.f32 %v3525_v17, %v3524_v51 }
 0x494   : > { %v6341_v61 = vpop.f32.mrf.mxu0  ;;  %v3528_v56 = vadd.f32 %v3527_v44, %v3526_v36 }
 0x495   : > { %v3541_v51 = vsel %vm312_vm1, %v6341_v61, 0.0 }
 0x496   : > { %v3530_v24 = vadd.f32 %v3529_v6, %v3528_v56 }
 0x497   : > { %4336 = vmatmul.msk.bf16.gmra.mxu0 %vm454_vm2, %v3367_v21  ;;  %v3585_v21 = vmul.f32 %v6299_v52, %v6299_v52 }
 0x499   : > { %v3618_v20 = vsel %vm312_vm1, %v3585_v21, 0.0  ;;  %v3531_v21 = vsel %vm312_vm1, %v6329_v29, 0.0 }
 0x49a   : > { %v3619_v31 = vadd.f32 %v3618_v20, %v3617_v46  ;;  %v3532_v54 = vadd.f32 %v3531_v21, %v3530_v24  ;;  %v3595_v46 = vmul.f32 %v6336_v19, %v6336_v19 }
 0x49c   : > { %v6344_v58 = vpop.f32.mrf.mxu0  ;;  %v3621_v32 = vadd.f32 %v3620_v57, %v3619_v31  ;;  %v3534_v1 = vadd.f32 %v3533_v9, %v3532_v54  ;;  %v3636_v31 = vsel %vm312_vm1, %v3594_v43, 0.0  ;;  %v3638_v33 = vsel %vm312_vm1, %v3595_v46, 0.0 }
 0x49e   : > { %v3623_v48 = vadd.f32 %v3622_v62, %v3621_v32  ;;  %v3596_v62 = vmul.f32 %v6339_v13, %v6339_v13  ;;  %v3536_v23 = vadd.f32 %v3535_v55, %v3534_v1  ;;  %v3539_v32 = vsel %vm312_vm1, %v6339_v13, 0.0 }
 0x4a0   : > { %v3625_v14 = vadd.f32 %v3624_v7, %v3623_v48  ;;  %v3597_v7 = vmul.f32 %v6341_v61, %v6341_v61  ;;  %v3538_v50 = vadd.f32 %v3537_v25, %v3536_v23  ;;  %v3640_v48 = vsel %vm312_vm1, %v3596_v62, 0.0 }
 0x4a2   : > { %v3627_v0 = vadd.f32 %v3626_v18, %v3625_v14  ;;  %v3598_v18 = vmul.f32 %v6344_v58, %v6344_v58  ;;  %v3540_v22 = vadd.f32 %v3539_v32, %v3538_v50  ;;  %v3642_v36 = vsel %vm312_vm1, %v3597_v7, 0.0 }
 0x4a3   : > { %v3543_v14 = vsel %vm312_vm1, %v6344_v58, 0.0 }
 0x4a4   : > { %v6346_v34 = vpop.f32.mrf.mxu0  ;;  %v3629_v10 = vadd.f32 %v3628_v60, %v3627_v0  ;;  %v3542_v2 = vadd.f32 %v3541_v51, %v3540_v22  ;;  %v3644_v56 = vsel %vm312_vm1, %v3598_v18, 0.0 }
 0x4a5   : > { %v3599_v60 = vmul.f32 %v6346_v34, %v6346_v34 }
 0x4a6   : > { %v3631_v20 = vadd.f32 %v3630_v49, %v3629_v10  ;;  %v3545_v49 = vsel %vm312_vm1, %v6346_v34, 0.0  ;;  %v3544_v24 = vadd.f32 %v3543_v14, %v3542_v2 }
 0x4a7   : > { %v3646_v10 = vsel %vm312_vm1, %v3599_v60, 0.0 }
 0x4a8   : > { %v3633_v57 = vadd.f32 %v3632_v26, %v3631_v20  ;;  %v3546_v20 = vadd.f32 %v3545_v49, %v3544_v24 }
 0x4aa   : > { %v3635_v63 = vadd.f32 %v3634_v27, %v3633_v57 }
 0x4ac   : > { %v6348_v53 = vpop.f32.mrf.mxu0  ;;  %v3637_v17 = vadd.f32 %v3636_v31, %v3635_v63 }
 0x4ad   : > { %v3600_v21 = vmul.f32 %v6348_v53, %v6348_v53  ;;  %v3547_v26 = vsel %vm312_vm1, %v6348_v53, 0.0 }
 0x4ae   : > { %v3639_v44 = vadd.f32 %v3638_v33, %v3637_v17  ;;  %v3548_v57 = vadd.f32 %v3547_v26, %v3546_v20 }
 0x4af   : > { %v3648_v54 = vsel %vm312_vm1, %v3600_v21, 0.0 }
 0x4b0   : > { %v3641_v6 = vadd.f32 %v3640_v48, %v3639_v44 }
 0x4b2   : > { %v3643_v3 = vadd.f32 %v3642_v36, %v3641_v6 }
 0x4b4   : > { %v6350_v8 = vpop.f32.mrf.mxu0  ;;  %v3645_v43 = vadd.f32 %v3644_v56, %v3643_v3 }
 0x4b5   : > { %v3601_v9 = vmul.f32 %v6350_v8, %v6350_v8  ;;  %v3549_v27 = vsel %vm312_vm1, %v6350_v8, 0.0 }
 0x4b6   : > { %v3647_v46 = vadd.f32 %v3646_v10, %v3645_v43  ;;  %v3550_v63 = vadd.f32 %v3549_v27, %v3548_v57 }
 0x4b7   : > { %v3650_v1 = vsel %vm312_vm1, %v3601_v9, 0.0 }
 0x4b8   : > { %v3649_v62 = vadd.f32 %v3648_v54, %v3647_v46 }
 0x4ba   : > { %v3651_v17 = vadd.f32 %v3650_v1, %v3649_v62 }
 0x4bc   : > { %v6352_v28 = vpop.f32.mrf.mxu0 }
 0x4bd   : > { %v3602_v55 = vmul.f32 %v6352_v28, %v6352_v28  ;;  %v3551_v31 = vsel %vm312_vm1, %v6352_v28, 0.0 }
 0x4be   : > { %v3552_v50 = vadd.f32 %v3551_v31, %v3550_v63 }
 0x4bf   : > { %v3652_v33 = vsel %vm312_vm1, %v3602_v55, 0.0 }
 0x4c0   : > { %v3653_v44 = vadd.f32 %v3652_v33, %v3651_v17 }
 0x4c4   : > { %v6354_v45 = vpop.f32.mrf.mxu0 }
 0x4c5   : > { %v3603_v25 = vmul.f32 %v6354_v45, %v6354_v45  ;;  %v3553_v32 = vsel %vm312_vm1, %v6354_v45, 0.0 }
 0x4c6   : > { %v3554_v22 = vadd.f32 %v3553_v32, %v3552_v50 }
 0x4c7   : > { %v3654_v48 = vsel %vm312_vm1, %v3603_v25, 0.0 }
 0x4c8   : > { %v3655_v6 = vadd.f32 %v3654_v48, %v3653_v44 }
 0x4cc   : > { %v6356_v35 = vpop.f32.mrf.mxu0 }
 0x4cd   : > { %v3604_v7 = vmul.f32 %v6356_v35, %v6356_v35  ;;  %v3555_v51 = vsel %vm312_vm1, %v6356_v35, 0.0 }
 0x4ce   : > { %v3556_v2 = vadd.f32 %v3555_v51, %v3554_v22 }
 0x4cf   : > { %v3656_v36 = vsel %vm312_vm1, %v3604_v7, 0.0 }
 0x4d0   : > { %v3657_v3 = vadd.f32 %v3656_v36, %v3655_v6 }
 0x4d4   : > { %v6358_v59 = vpop.f32.mrf.mxu0 }
 0x4d5   : > { %v3605_v18 = vmul.f32 %v6358_v59, %v6358_v59  ;;  %v3557_v14 = vsel %vm312_vm1, %v6358_v59, 0.0 }
 0x4d6   : > { %v3558_v24 = vadd.f32 %v3557_v14, %v3556_v2 }
 0x4d7   : > { %v3658_v56 = vsel %vm312_vm1, %v3605_v18, 0.0 }
 0x4d8   : > { %v3659_v20 = vadd.f32 %v3658_v56, %v3657_v3 }
 0x4dc   : > { %v6360_v12 = vpop.f32.mrf.mxu0 }
 0x4dd   : > { %v3606_v60 = vmul.f32 %v6360_v12, %v6360_v12  ;;  %v3559_v49 = vsel %vm312_vm1, %v6360_v12, 0.0 }
 0x4de   : > { %v3560_v54 = vadd.f32 %v3559_v49, %v3558_v24 }
 0x4df   : > { %v3660_v26 = vsel %vm312_vm1, %v3606_v60, 0.0 }
 0x4e0   : > { %v3661_v57 = vadd.f32 %v3660_v26, %v3659_v20 }
 0x4e4   : > { %v6383_v38 = vpop.f32.mrf.mxu0 }
 0x4e5   : > { %v3607_v21 = vmul.f32 %v6383_v38, %v6383_v38  ;;  %v3561_v9 = vsel %vm312_vm1, %v6383_v38, 0.0 }
 0x4e6   : > { %v3562_v1 = vadd.f32 %v3561_v9, %v3560_v54 }
 0x4e7   : > { %v3662_v27 = vsel %vm312_vm1, %v3607_v21, 0.0 }
 0x4e8   : > { %v3663_v63 = vadd.f32 %v3662_v27, %v3661_v57 }
 0x4ec   : > { %v6405_v42 = vpop.f32.mrf.mxu0 }
 0x4ed   : > { %v3608_v43 = vmul.f32 %v6405_v42, %v6405_v42  ;;  %v3563_v55 = vsel %vm312_vm1, %v6405_v42, 0.0 }
 0x4ee   : > { %v3564_v33 = vadd.f32 %v3563_v55, %v3562_v1 }
 0x4ef   : > { %v3664_v31 = vsel %vm312_vm1, %v3608_v43, 0.0 }
 0x4f0   : > { %v3665_v50 = vadd.f32 %v3664_v31, %v3663_v63 }
 0x4f4   : > { %v6427_v11 = vpop.f32.mrf.mxu0 }
 0x4f5   : > { %v3609_v46 = vmul.f32 %v6427_v11, %v6427_v11  ;;  %v3565_v25 = vsel %vm312_vm1, %v6427_v11, 0.0 }
 0x4f6   : > { %v3566_v48 = vadd.f32 %v3565_v25, %v3564_v33 }
 0x4f7   : > { %v3666_v32 = vsel %vm312_vm1, %v3609_v46, 0.0 }
 0x4f8   : > { %v3667_v36 = vadd.f32 %v3666_v32, %v3665_v50 }
 0x4fc   : > { %v6449_v0 = vpop.f32.mrf.mxu0 }
 0x4fd   : > { %v3610_v62 = vmul.f32 %v6449_v0, %v6449_v0  ;;  %v3567_v7 = vsel %vm312_vm1, %v6449_v0, 0.0 }
 0x4fe   : > { %v3568_v14 = vadd.f32 %v3567_v7, %v3566_v48 }
 0x4ff   : > { %v3668_v18 = vsel %vm312_vm1, %v3610_v62, 0.0 }
 0x500   : > { %v3669_v56 = vadd.f32 %v3668_v18, %v3667_v36 }
 0x504   : > { %v6471_v23 = vpop.f32.mrf.mxu0 }
 0x505   : > { %v3611_v17 = vmul.f32 %v6471_v23, %v6471_v23  ;;  %v3569_v44 = vsel %vm312_vm1, %v6471_v23, 0.0 }
 0x506   : > { %v3570_v49 = vadd.f32 %v3569_v44, %v3568_v14 }
 0x507   : > { %v3670_v60 = vsel %vm312_vm1, %v3611_v17, 0.0 }
 0x508   : > { %v3671_v24 = vadd.f32 %v3670_v60, %v3669_v56 }
 0x50c   : > { %v6493_v10 = vpop.f32.mrf.mxu0 }
 0x50d   : > { %v3612_v22 = vmul.f32 %v6493_v10, %v6493_v10  ;;  %v3571_v6 = vsel %vm312_vm1, %v6493_v10, 0.0 }
 0x50e   : > { %v3572_v26 = vadd.f32 %v3571_v6, %v3570_v49 }
 0x50f   : > { %v3672_v21 = vsel %vm312_vm1, %v3612_v22, 0.0 }
 0x510   : > { %v3673_v43 = vadd.f32 %v3672_v21, %v3671_v24 }
 0x514   : > { %v6515_v51 = vpop.f32.mrf.mxu0 }
 0x515   : > { %v3613_v2 = vmul.f32 %v6515_v51, %v6515_v51  ;;  %v3573_v3 = vsel %vm312_vm1, %v6515_v51, 0.0 }
 0x516   : > { %v3574_v20 = vadd.f32 %v3573_v3, %v3572_v26 }
 0x517   : > { %v3674_v9 = vsel %vm312_vm1, %v3613_v2, 0.0 }
 0x518   : > { %v3675_v46 = vadd.f32 %v3674_v9, %v3673_v43 }
 0x51c   : > { %v6531_v54 = vpop.f32.mrf.mxu0 }
 0x51d   : > { %v3575_v27 = vsel %vm312_vm1, %v6531_v54, 0.0  ;;  %v3614_v55 = vmul.f32 %v6531_v54, %v6531_v54 }
 0x51e   : > { %v3576_v57 = vadd.f32 %v3575_v27, %v3574_v20 }
 0x51f   : > { %v3676_v1 = vsel %vm312_vm1, %v3614_v55, 0.0 }
 0x520   : > { %v3577_v31 = vrot.slane %v3576_v57, 4  ;;  %v3677_v25 = vadd.f32 %v3676_v1, %v3675_v46 }
 0x522   : > { %v3578_v62 = vadd.f32 %v3577_v31, %v3576_v57  ;;  %v3678_v63 = vrot.slane %v3677_v25, 4  ;;  %v6657_v31 = vld [vmem:[%s4577_s22 + $0x50] sm:$0xff]  }
 0x524   : > { %v3579_v33 = vrot.slane %v3578_v62, 2  ;;  %v3679_v32 = vadd.f32 %v3678_v63, %v3677_v25 }
 0x526   : > { %v3580_v7 = vadd.f32 %v3579_v33, %v3578_v62  ;;  %v3680_v17 = vrot.slane %v3679_v32, 2  ;;  %v6640_v33 = vld [vmem:[%s4577_s22 + $0x38] sm:$0xff]  }
 0x527   : > { %v4444_v63 = vunpack.c.l.bf16 %v6640_v33 }
 0x528   : > { %v3581_v50 = vrot.slane %v3580_v7, 1  ;;  %v3681_v48 = vadd.f32 %v3680_v17, %v3679_v32 }
 0x52a   : > { %v3582_v18 = vadd.f32 %v3581_v50, %v3580_v7  ;;  %v3682_v44 = vrot.slane %v3681_v48, 1 }
 0x52c   : > { %v3683_v22 = vadd.f32 %v3682_v44, %v3681_v48  ;;  %v6538_v36 = vmul.f32 0.00390625, %v3582_v18  ;;  %v6625_v44 = vld [vmem:[%s4577_s22 + $0x28] sm:$0xff]  }
 0x52e   : > { %v3685_v14 = vmul.f32 0.00390625, %v3683_v22  ;;  %v3686_v60 = vmul.f32 %v6538_v36, %v6538_v36  ;;  %v3700_v26 = vsub.f32 %v6290_v41, %v6538_v36  ;;  %v3701_v9 = vsub.f32 %v6293_v47, %v6538_v36  ;;  %v6612_v22 = vld [vmem:[%s4577_s22 + $0x18] sm:$0xff]  }
 0x52f   : > { %v3702_v43 = vsub.f32 %v6299_v52, %v6538_v36  ;;  %v3703_v20 = vsub.f32 %v6302_v30, %v6538_v36  ;;  %v3704_v27 = vsub.f32 %v6308_v40, %v6538_v36  ;;  %v3705_v55 = vsub.f32 %v6311_v39, %v6538_v36  ;;  %v6677_v52 = vld [vmem:[%s4577_s22 + $0x60] sm:$0xff]  }
 0x530   : > { %v3687_v6 = vsub.f32 %v3685_v14, %v3686_v60  ;;  %v3706_v57 = vsub.f32 %v6317_v16, %v6538_v36  ;;  %v3707_v41 = vsub.f32 %v6320_v15, %v6538_v36  ;;  %v3708_v47 = vsub.f32 %v6326_v4, %v6538_v36  ;;  %v6589_v14 = vld [vmem:[%s4577_s22] sm:$0xff]  }
 0x531   : > { %v4417_v60 = vunpack.c.h.bf16 %v6589_v14  ;;  %v7055_v15 = vsub.f32 %v6329_v29, %v6538_v36 }
 0x532   : > { %v3688_v2 = vmax.f32 %v3687_v6, 0.0  ;;  %v6628_v6 = vld [vmem:[%s4577_s22 + $0x30] sm:$0xff]  }
 0x534   : > { %v3689_v56 = vadd.f32 1e-05, %v3688_v2  ;;  %v6615_v2 = vld [vmem:[%s4577_s22 + $0x20] sm:$0xff]  }
 0x536   : > { %4518 = vrsqrt.f32 %v3689_v56  ;;  %vm3696_vm2 = vweird.f32 %v3689_v56 }
 0x53c   : > { %v4519_v49 = vpop.eup %4518 }
 0x53d   : > { %v3691_v21 = vmul.f32 %v4519_v49, %v3689_v56  ;;  %vm3697_vm1 = vweird.f32 %v4519_v49 }
 0x53e   : > { %vm3698_vm5 = vmor %vm3696_vm2, %vm3697_vm1 }
 0x53f   : > { %v3692_v3 = vmul.f32 %v4519_v49, %v3691_v21  ;;  %v4416_v21 = vunpack.c.l.bf16 %v6589_v14 }
 0x541   : > { %v3693_v24 = vmul.f32 0.5, %v3692_v3  ;;  %v6600_v3 = vld [vmem:[%s4577_s22 + $0x8] sm:$0xff]  }
 0x542   : > { %v4420_v50 = vunpack.c.l.bf16 %v6600_v3  ;;  %v4421_v17 = vunpack.c.h.bf16 %v6600_v3 }
 0x543   : > { %v3694_v46 = vsub.f32 1.5, %v3693_v24  ;;  %v6603_v24 = vld [vmem:[%s4577_s22 + $0x10] sm:$0xff]  }
 0x544   : > { %v4424_v56 = vunpack.c.l.bf16 %v6603_v24 }
 0x545   : > { %v3695_v18 = vmul.f32 %v4519_v49, %v3694_v46  ;;  %v6650_v46 = vld [vmem:[%s4577_s22 + $0x48] sm:$0xff]  }
 0x547   : > { %v6630_v48 = vsel %vm3698_vm5, %v4519_v49, %v3695_v18  ;;  %v6643_v49 = vld [vmem:[%s4577_s22 + $0x40] sm:$0xff]   ;;  %v6660_v18 = vld [vmem:[%s4577_s22 + $0x58] sm:$0xff]  }
 0x548   : > { %v3732_v7 = vmul.f32 %v3700_v26, %v6630_v48  ;;  %v3733_v14 = vmul.f32 %v3701_v9, %v6630_v48  ;;  %v3734_v32 = vmul.f32 %v3702_v43, %v6630_v48  ;;  %v3735_v62 = vmul.f32 %v3703_v20, %v6630_v48 }
 0x549   : > { %v3736_v43 = vmul.f32 %v3704_v27, %v6630_v48  ;;  %v3737_v30 = vmul.f32 %v3705_v55, %v6630_v48  ;;  %v6687_v27 = vld [vmem:[%s4577_s22 + $0x68] sm:$0xff]   ;;  %v3738_v1 = vmul.f32 %v3706_v57, %v6630_v48  ;;  %v3739_v39 = vmul.f32 %v3707_v41, %v6630_v48 }
 0x54a   : > { %v3764_v3 = vmax.f32 %v3732_v7, 0.0  ;;  %v3765_v25 = vmax.f32 %v3733_v14, 0.0  ;;  %v3766_v26 = vmax.f32 %v3734_v32, 0.0  ;;  %v3767_v55 = vmax.f32 %v3735_v62, 0.0 }
 0x54b   : > { %v3740_v20 = vmul.f32 %v3708_v47, %v6630_v48  ;;  %v3768_v16 = vmax.f32 %v3736_v43, 0.0  ;;  %v3741_v41 = vmul.f32 %v7055_v15, %v6630_v48  ;;  %v7056_v62 = vsub.f32 %v6331_v5, %v6538_v36 }
 0x54c   : > { %v3769_v14 = vmax.f32 %v3737_v30, 0.0  ;;  %v4469_v4 = vunpack.c.h.bf16 %v6687_v27  ;;  %v3770_v47 = vmax.f32 %v3738_v1, 0.0  ;;  %v3860_v43 = vadd.f32 %v4416_v21, %v3764_v3 }
 0x54d   : > { %v3742_v7 = vmul.f32 %v7056_v62, %v6630_v48  ;;  %v3861_v40 = vadd.f32 %v4417_v60, %v3765_v25  ;;  %v3862_v57 = vadd.f32 %v4420_v50, %v3766_v26  ;;  %v7057_v32 = vsub.f32 %v6334_v37, %v6538_v36 }
 0x54e   : > { %v3771_v29 = vmax.f32 %v3739_v39, 0.0  ;;  %v3863_v15 = vadd.f32 %v4421_v17, %v3767_v55  ;;  %v7058_v5 = vsub.f32 %v6336_v19, %v6538_v36  ;;  %v7059_v1 = vsub.f32 %v6339_v13, %v6538_v36 }
 0x54f   : > { %v3743_v9 = vmul.f32 %v7057_v32, %v6630_v48  ;;  %v3772_v25 = vmax.f32 %v3740_v20, 0.0  ;;  %v3864_v50 = vadd.f32 %v4424_v56, %v3768_v16  ;;  %v7060_v37 = vsub.f32 %v6341_v61, %v6538_v36 }
 0x550   : > { %v3744_v62 = vmul.f32 %v7058_v5, %v6630_v48  ;;  %v3745_v21 = vmul.f32 %v7059_v1, %v6630_v48  ;;  %v3773_v19 = vmax.f32 %v3741_v41, 0.0  ;;  %v3774_v60 = vmax.f32 %v3742_v7, 0.0 }
 0x551   : > { %v3746_v17 = vmul.f32 %v7060_v37, %v6630_v48  ;;  %v7061_v3 = vunpack.c.h.bf16 %v6603_v24  ;;  %v7062_v26 = vunpack.c.l.bf16 %v6612_v22  ;;  %v3892_v30 = vpack.c.bf16 %v3860_v43, %v3860_v43 }
 0x552   : > { %v3893_v20 = vpack.c.bf16 %v3861_v40, %v3861_v40  ;;  %v3894_v39 = vpack.c.bf16 %v3862_v57, %v3862_v57  ;;  %v7063_v55 = vsub.f32 %v6344_v58, %v6538_v36  ;;  %v3775_v61 = vmax.f32 %v3743_v9, 0.0 }
 0x553   : > { %v3865_v13 = vadd.f32 %v7061_v3, %v3769_v14  ;;  %v3866_v56 = vadd.f32 %v7062_v26, %v3770_v47  ;;  %v7064_v32 = vunpack.c.h.bf16 %v6612_v22  ;;  %v3895_v7 = vpack.c.bf16 %v3863_v15, %v3863_v15  ;;  %3925 = vst.msk [vmem:[%s6731_s17] sm:$0xf] %vm3924_vm6, %v3892_v30 }
 0x554   : > { %v3747_v16 = vmul.f32 %v7063_v55, %v6630_v48  ;;  %v7065_v24 = vsub.f32 %v6346_v34, %v6538_v36  ;;  %v3776_v47 = vmax.f32 %v3744_v62, 0.0  ;;  %v7066_v40 = vunpack.c.l.bf16 %v6615_v2  ;;  %3926 = vst.msk [vmem:[%s6731_s17 + $0x4] sm:$0xf] %vm3924_vm6, %v3893_v20 }
 0x555   : > { %v3867_v41 = vadd.f32 %v7064_v32, %v3771_v29  ;;  %v3896_v43 = vpack.c.bf16 %v3864_v50, %v3864_v50  ;;  %v7067_v58 = vsub.f32 %v6348_v53, %v6538_v36  ;;  %v3777_v9 = vmax.f32 %v3745_v21, 0.0  ;;  %3927 = vst.msk [vmem:[%s6731_s17 + $0x8] sm:$0xf] %vm3924_vm6, %v3894_v39 }
 0x556   : > { %v3748_v14 = vmul.f32 %v7065_v24, %v6630_v48  ;;  %v3868_v57 = vadd.f32 %v7066_v40, %v3772_v25  ;;  %v7068_v29 = vunpack.c.h.bf16 %v6615_v2  ;;  %v3897_v5 = vpack.c.bf16 %v3865_v13, %v3865_v13  ;;  %3928 = vst.msk [vmem:[%s6731_s17 + $0xc] sm:$0xf] %vm3924_vm6, %v3895_v7 }
 0x557   : > { %v3749_v22 = vmul.f32 %v7067_v58, %v6630_v48  ;;  %v7069_v34 = vsub.f32 %v6350_v8, %v6538_v36  ;;  %v3778_v1 = vmax.f32 %v3746_v17, 0.0  ;;  %v7070_v25 = vunpack.c.l.bf16 %v6625_v44  ;;  %3929 = vst.msk [vmem:[%s6731_s17 + $0x10] sm:$0xf] %vm3924_vm6, %v3896_v43 }
 0x558   : > { %v3869_v15 = vadd.f32 %v7068_v29, %v3773_v19  ;;  %v3898_v37 = vpack.c.bf16 %v3866_v56, %v3866_v56  ;;  %v7071_v53 = vsub.f32 %v6352_v28, %v6538_v36  ;;  %v3779_v21 = vmax.f32 %v3747_v16, 0.0  ;;  %3930 = vst.msk [vmem:[%s6731_s17 + $0x14] sm:$0xf] %vm3924_vm6, %v3897_v5 }
 0x559   : > { %v3750_v62 = vmul.f32 %v7069_v34, %v6630_v48  ;;  %v3870_v50 = vadd.f32 %v7070_v25, %v3774_v60  ;;  %v7072_v19 = vunpack.c.h.bf16 %v6625_v44  ;;  %v3899_v13 = vpack.c.bf16 %v3867_v41, %v3867_v41 }
 0x55a   : > { %v3751_v2 = vmul.f32 %v7071_v53, %v6630_v48  ;;  %v7073_v8 = vsub.f32 %v6354_v45, %v6538_v36  ;;  %v3780_v60 = vmax.f32 %v3748_v14, 0.0  ;;  %v7074_v26 = vunpack.c.l.bf16 %v6628_v6  ;;  %3931 = vst.msk [vmem:[%s6731_s17 + $0x18] sm:$0xf] %vm3924_vm6, %v3898_v37 }
 0x55b   : > { %v3871_v3 = vadd.f32 %v7072_v19, %v3775_v61  ;;  %v3900_v30 = vpack.c.bf16 %v3868_v57, %v3868_v57  ;;  %v7075_v28 = vsub.f32 %v6356_v35, %v6538_v36  ;;  %v3781_v20 = vmax.f32 %v3749_v22, 0.0  ;;  %3932 = vst.msk [vmem:[%s6731_s17 + $0x1c] sm:$0xf] %vm3924_vm6, %v3899_v13 }
 0x55c   : > { %v3752_v17 = vmul.f32 %v7073_v8, %v6630_v48  ;;  %v3872_v56 = vadd.f32 %v7074_v26, %v3776_v47  ;;  %v7076_v39 = vunpack.c.h.bf16 %v6628_v6  ;;  %v3901_v16 = vpack.c.bf16 %v3869_v15, %v3869_v15  ;;  %v4496_v26 = vld [vmem:[%s4577_s22 + $0x70] sm:$0xff]  }
 0x55d   : > { %v3753_v44 = vmul.f32 %v7075_v28, %v6630_v48  ;;  %v7077_v45 = vsub.f32 %v6358_v59, %v6538_v36  ;;  %v3782_v32 = vmax.f32 %v3750_v62, 0.0  ;;  %v3874_v41 = vadd.f32 %v4444_v63, %v3778_v1  ;;  %3933 = vst.msk [vmem:[%s6731_s17 + $0x20] sm:$0xf] %vm3924_vm6, %v3900_v30 }
 0x55e   : > { %v3873_v55 = vadd.f32 %v7076_v39, %v3777_v9  ;;  %v3902_v7 = vpack.c.bf16 %v3870_v50, %v3870_v50  ;;  %v7078_v35 = vsub.f32 %v6360_v12, %v6538_v36  ;;  %v3783_v24 = vmax.f32 %v3751_v2, 0.0  ;;  %3934 = vst.msk [vmem:[%s6731_s17 + $0x24] sm:$0xf] %vm3924_vm6, %v3901_v16 }
 0x55f   : > { %v3754_v61 = vmul.f32 %v7077_v45, %v6630_v48  ;;  %v7079_v14 = vunpack.c.h.bf16 %v6640_v33  ;;  %v3903_v40 = vpack.c.bf16 %v3871_v3, %v3871_v3  ;;  %v7080_v59 = vsub.f32 %v6383_v38, %v6538_v36 }
 0x560   : > { %v3755_v6 = vmul.f32 %v7078_v35, %v6630_v48  ;;  %v3784_v57 = vmax.f32 %v3752_v17, 0.0  ;;  %v7081_v43 = vunpack.c.l.bf16 %v6643_v49  ;;  %v3904_v22 = vpack.c.bf16 %v3872_v56, %v3872_v56  ;;  %3935 = vst.msk [vmem:[%s6731_s17 + $0x28] sm:$0xf] %vm3924_vm6, %v3902_v7 }
 0x561   : > { %v3875_v47 = vadd.f32 %v7079_v14, %v3779_v21  ;;  %v3756_v63 = vmul.f32 %v7080_v59, %v6630_v48  ;;  %v7082_v12 = vsub.f32 %v6405_v42, %v6538_v36  ;;  %v3785_v9 = vmax.f32 %v3753_v44, 0.0  ;;  %3936 = vst.msk [vmem:[%s6731_s17 + $0x2c] sm:$0xf] %vm3924_vm6, %v3903_v40 }
 0x562   : > { %v3876_v58 = vadd.f32 %v7081_v43, %v3780_v60  ;;  %v7083_v29 = vunpack.c.h.bf16 %v6643_v49  ;;  %v3905_v5 = vpack.c.bf16 %v3873_v55, %v3873_v55  ;;  %v7084_v38 = vsub.f32 %v6427_v11, %v6538_v36  ;;  %3937 = vst.msk [vmem:[%s6731_s17 + $0x30] sm:$0xf] %vm3924_vm6, %v3904_v22 }
 0x563   : > { %v3757_v33 = vmul.f32 %v7082_v12, %v6630_v48  ;;  %v3786_v62 = vmax.f32 %v3754_v61, 0.0  ;;  %v7085_v1 = vunpack.c.l.bf16 %v6650_v46  ;;  %v3906_v42 = vpack.c.bf16 %v3874_v41, %v3874_v41  ;;  %v4497_v61 = vld [vmem:[%s4577_s22 + $0x78] sm:$0xff]  }
 0x564   : > { %v3877_v15 = vadd.f32 %v7083_v29, %v3781_v20  ;;  %v3758_v34 = vmul.f32 %v7084_v38, %v6630_v48  ;;  %v7086_v49 = vsub.f32 %v6449_v0, %v6538_v36  ;;  %v3787_v37 = vmax.f32 %v3755_v6, 0.0  ;;  %3938 = vst.msk [vmem:[%s6731_s17 + $0x34] sm:$0xf] %vm3924_vm6, %v3905_v5 }
 0x565   : > { %v3878_v25 = vadd.f32 %v7085_v1, %v3782_v32  ;;  %v7087_v53 = vunpack.c.h.bf16 %v6650_v46  ;;  %v3907_v11 = vpack.c.bf16 %v3875_v47, %v3875_v47  ;;  %v7088_v21 = vsub.f32 %v6471_v23, %v6538_v36  ;;  %3939 = vst.msk [vmem:[%s6731_s17 + $0x38] sm:$0xf] %vm3924_vm6, %v3906_v42 }
 0x566   : > { %v3759_v50 = vmul.f32 %v7086_v49, %v6630_v48  ;;  %v3788_v3 = vmax.f32 %v3756_v63, 0.0  ;;  %v7089_v13 = vunpack.c.l.bf16 %v6657_v31  ;;  %v3908_v0 = vpack.c.bf16 %v3876_v58, %v3876_v58 }
 0x567   : > { %v3879_v2 = vadd.f32 %v7087_v53, %v3783_v24  ;;  %v3760_v19 = vmul.f32 %v7088_v21, %v6630_v48  ;;  %v7090_v46 = vsub.f32 %v6493_v10, %v6538_v36  ;;  %v3789_v60 = vmax.f32 %v3757_v33, 0.0  ;;  %3940 = vst.msk [vmem:[%s6731_s17 + $0x3c] sm:$0xf] %vm3924_vm6, %v3907_v11 }
 0x568   : > { %v3880_v8 = vadd.f32 %v7089_v13, %v3784_v57  ;;  %v7091_v23 = vunpack.c.h.bf16 %v6657_v31  ;;  %v3909_v30 = vpack.c.bf16 %v3877_v15, %v3877_v15  ;;  %v7092_v28 = vsub.f32 %v6515_v51, %v6538_v36  ;;  %3941 = vst.msk [vmem:[%s6731_s17 + $0x40] sm:$0xf] %vm3924_vm6, %v3908_v0 }
 0x569   : > { %v3761_v17 = vmul.f32 %v7090_v46, %v6630_v48  ;;  %v3790_v20 = vmax.f32 %v3758_v34, 0.0  ;;  %v7093_v39 = vunpack.c.l.bf16 %v6660_v18  ;;  %v3910_v55 = vpack.c.bf16 %v3878_v25, %v3878_v25 }
 0x56a   : > { %v3881_v56 = vadd.f32 %v7091_v23, %v3785_v9  ;;  %v3762_v44 = vmul.f32 %v7092_v28, %v6630_v48  ;;  %v7094_v31 = vsub.f32 %v6531_v54, %v6538_v36  ;;  %v3791_v45 = vmax.f32 %v3759_v50, 0.0  ;;  %3942 = vst.msk [vmem:[%s6731_s17 + $0x44] sm:$0xf] %vm3924_vm6, %v3909_v30 }
 0x56b   : > { %v3882_v10 = vadd.f32 %v7093_v39, %v3786_v62  ;;  %v7095_v32 = vunpack.c.h.bf16 %v6660_v18  ;;  %v3911_v41 = vpack.c.bf16 %v3879_v2, %v3879_v2  ;;  %v3792_v7 = vmax.f32 %v3760_v19, 0.0  ;;  %3943 = vst.msk [vmem:[%s6731_s17 + $0x48] sm:$0xf] %vm3924_vm6, %v3910_v55 }
 0x56c   : > { %v3763_v16 = vmul.f32 %v7094_v31, %v6630_v48  ;;  %v4472_v35 = vunpack.c.l.bf16 %v4496_v26  ;;  %v7096_v6 = vunpack.c.l.bf16 %v6677_v52  ;;  %v3912_v14 = vpack.c.bf16 %v3880_v8, %v3880_v8 }
 0x56d   : > { %v3883_v51 = vadd.f32 %v7095_v32, %v3787_v37  ;;  %v3793_v54 = vmax.f32 %v3761_v17, 0.0  ;;  %v4473_v36 = vunpack.c.h.bf16 %v4496_v26  ;;  %v7097_v48 = vunpack.c.h.bf16 %v6677_v52  ;;  %3944 = vst.msk [vmem:[%s6731_s17 + $0x4c] sm:$0xf] %vm3924_vm6, %v3911_v41 }
 0x56e   : > { %v3884_v24 = vadd.f32 %v7096_v6, %v3788_v3  ;;  %v3913_v47 = vpack.c.bf16 %v3881_v56, %v3881_v56  ;;  %v3794_v40 = vmax.f32 %v3762_v44, 0.0  ;;  %v4476_v59 = vunpack.c.l.bf16 %v4497_v61  ;;  %3945 = vst.msk [vmem:[%s6731_s17 + $0x50] sm:$0xf] %vm3924_vm6, %v3912_v14 }
 0x56f   : > { %v3885_v18 = vadd.f32 %v7097_v48, %v3789_v60  ;;  %v7098_v63 = vunpack.c.l.bf16 %v6687_v27  ;;  %v3914_v43 = vpack.c.bf16 %v3882_v10, %v3882_v10  ;;  %v3795_v58 = vmax.f32 %v3763_v16, 0.0 }
 0x570   : > { %v4477_v22 = vunpack.c.h.bf16 %v4497_v61  ;;  %v3887_v52 = vadd.f32 %v4469_v4, %v3791_v45  ;;  %v3915_v12 = vpack.c.bf16 %v3883_v51, %v3883_v51  ;;  %v3888_v33 = vadd.f32 %v4472_v35, %v3792_v7  ;;  %3946 = vst.msk [vmem:[%s6731_s17 + $0x54] sm:$0xf] %vm3924_vm6, %v3913_v47 }
 0x571   : > { %v3886_v57 = vadd.f32 %v7098_v63, %v3790_v20  ;;  %v3916_v9 = vpack.c.bf16 %v3884_v24, %v3884_v24  ;;  %v3889_v29 = vadd.f32 %v4473_v36, %v3793_v54  ;;  %v3917_v15 = vpack.c.bf16 %v3885_v18, %v3885_v18  ;;  %3947 = vst.msk [vmem:[%s6731_s17 + $0x58] sm:$0xf] %vm3924_vm6, %v3914_v43 }
 0x572   : > { %v3890_v5 = vadd.f32 %v4476_v59, %v3794_v40  ;;  %v3891_v4 = vadd.f32 %v4477_v22, %v3795_v58  ;;  %v3919_v38 = vpack.c.bf16 %v3887_v52, %v3887_v52  ;;  %3948 = vst.msk [vmem:[%s6731_s17 + $0x5c] sm:$0xf] %vm3924_vm6, %v3915_v12  ;;  %v3920_v34 = vpack.c.bf16 %v3888_v33, %v3888_v33 }
 0x573   : > { %v3918_v27 = vpack.c.bf16 %v3886_v57, %v3886_v57  ;;  %3949 = vst.msk [vmem:[%s6731_s17 + $0x60] sm:$0xf] %vm3924_vm6, %v3916_v9  ;;  %v3921_v62 = vpack.c.bf16 %v3889_v29, %v3889_v29 }
 0x574   : > { %3950 = vst.msk [vmem:[%s6731_s17 + $0x64] sm:$0xf] %vm3924_vm6, %v3917_v15  ;;  %v3922_v1 = vpack.c.bf16 %v3890_v5, %v3890_v5  ;;  %v3923_v25 = vpack.c.bf16 %v3891_v4, %v3891_v4 }
 0x575   : > { %3951 = vst.msk [vmem:[%s6731_s17 + $0x68] sm:$0xf] %vm3924_vm6, %v3918_v27 }
 0x576   : > { %3952 = vst.msk [vmem:[%s6731_s17 + $0x6c] sm:$0xf] %vm3924_vm6, %v3919_v38 }
 0x577   : > { %3953 = vst.msk [vmem:[%s6731_s17 + $0x70] sm:$0xf] %vm3924_vm6, %v3920_v34 }
 0x578   : > { %3954 = vst.msk [vmem:[%s6731_s17 + $0x74] sm:$0xf] %vm3924_vm6, %v3921_v62 }
 0x579   : > { %3955 = vst.msk [vmem:[%s6731_s17 + $0x78] sm:$0xf] %vm3924_vm6, %v3922_v1 }
 0x57a   : > { %3956 = vst.msk [vmem:[%s6731_s17 + $0x7c] sm:$0xf] %vm3924_vm6, %v3923_v25 }
 0x57b PF: > { %s14_s15 = sadd.s32 1, %s4526_s15  }
 0x57c   : > { %p11_p4 = scmp.ge.s32.totalorder %s14_s15, 4  }
 0x57e   :  { %13 = sbr.rel (!%p11_p4) target bundleno = 1 (0x1), region = 68 }

</bundles_post_ra>
